<compile_context>
chip_gen: v5e
topology: v5e:2x2
jax: 0.10.0
libtpu: 0.0.40
codegen_flags: <defaults>
</compile_context>

<pallas_src>
import jax
import jax.numpy as jnp
from jax.experimental import pallas as pl
from jax.experimental.pallas import tpu as pltpu


def _round_up(x, m):
    return (x + m - 1) // m * m


def _nerf_kernel(
    xd_ref,                        # (tile_n, in_pad)  bf16   [x_enc | d_enc | 0]
    w1_ref, b1_ref,                # (in_pad, H) bf16, (1, H) f32  (zero rows on pad)
    w2_ref, b2_ref,                # (H, H)      bf16, (1, H) f32
    w3_ref, b3_ref,                # (H, H)      bf16, (1, H) f32
    wfs_ref, bfs_ref,              # (H, H+1)    bf16, (1, H+1) f32  [feature | sigma]
    wr1a_ref, wr1b_ref, br1_ref,   # (H, H//2), (in_pad, H//2) bf16, (1, H//2) f32
    wr2_ref, br2_ref,              # (H//2, 3)   bf16, (1, 3) f32
    out_ref,                       # (tile_n, 4) f32   [rgb | sigma]
):
    H = wfs_ref.shape[0]
    xd = xd_ref[...]

    # fc1: three Linear + ReLU layers (bf16 operands, f32 accumulation).
    h = jnp.dot(xd, w1_ref[...], preferred_element_type=jnp.float32) + b1_ref[...]
    h = jnp.maximum(h, 0.0).astype(jnp.bfloat16)
    h = jnp.dot(h, w2_ref[...], preferred_element_type=jnp.float32) + b2_ref[...]
    h = jnp.maximum(h, 0.0).astype(jnp.bfloat16)
    h = jnp.dot(h, w3_ref[...], preferred_element_type=jnp.float32) + b3_ref[...]
    h = jnp.maximum(h, 0.0).astype(jnp.bfloat16)

    # Fused feature/sigma head: columns [0, H) = fc_feature, column H = fc_sigma.
    fs = jnp.dot(h, wfs_ref[...], preferred_element_type=jnp.float32) + bfs_ref[...]
    feature = fs[:, :H].astype(jnp.bfloat16)
    sigma = fs[:, H:H + 1]

    # fc_rgb[0]: cat(feature, d_enc) @ Wr1 == feature @ Wr1a + xd @ Wr1b_pad
    # (Wr1b_pad carries the d_enc rows at their lane offsets, zeros elsewhere;
    #  algebraically exact split of the concat matmul).
    hr = (jnp.dot(feature, wr1a_ref[...], preferred_element_type=jnp.float32)
          + jnp.dot(xd, wr1b_ref[...], preferred_element_type=jnp.float32)
          + br1_ref[...])
    hr = jnp.maximum(hr, 0.0).astype(jnp.bfloat16)

    # fc_rgb[2]
    rgb = jnp.dot(hr, wr2_ref[...], preferred_element_type=jnp.float32) + br2_ref[...]

    # Final torch.cat([rgb, sigma], -1) done as two slice stores (no XLU concat).
    out_ref[:, 0:3] = rgb.astype(out_ref.dtype)
    out_ref[:, 3:4] = sigma.astype(out_ref.dtype)


def _pack_params(params, in_dim_pos, in_dim_dir, in_pad):
    """Repack raw (in, out) f32 weights into the padded / fused bf16 kernel weights."""
    (w1, b1, w2, b2, w3, b3, ws, bs, wf, bf, wr1, br1, wr2, br2) = params
    H = w2.shape[0]
    wdt = jnp.bfloat16

    # Layer 1: pad input rows out to the lane-padded input width.
    w1p = jnp.zeros((in_pad, H), jnp.float32).at[:in_dim_pos].set(w1).astype(wdt)

    # Fused feature + sigma head.
    wfs = jnp.concatenate([wf, ws], axis=1).astype(wdt)     # (H, H+1)
    bfs = jnp.concatenate([bf, bs], axis=1)                 # (1, H+1) f32

    # fc_rgb[0]: split cat(feature, d_enc) @ wr1 into feature- and xd-driven parts.
    wr1a = wr1[:H].astype(wdt)                              # (H, H//2)
    wr1b = jnp.zeros((in_pad, wr1.shape[1]), jnp.float32)
    wr1b = wr1b.at[in_dim_pos:in_dim_pos + in_dim_dir].set(wr1[H:]).astype(wdt)

    return (w1p, b1,
            w2.astype(wdt), b2,
            w3.astype(wdt), b3,
            wfs, bfs,
            wr1a, wr1b, br1,
            wr2.astype(wdt), br2)


def nerf_forward(x_enc, d_enc, params, *, tile_n=512):
    """Pallas NeRF forward. x_enc: (N, in_dim_pos) f32, d_enc: (N, in_dim_dir) f32."""
    N, in_dim_pos = x_enc.shape
    _, in_dim_dir = d_enc.shape
    H = params[2].shape[0]                      # w2: (H, H)
    half = params[-2].shape[0]                  # wr2: (H//2, 3)

    in_pad = _round_up(in_dim_pos + in_dim_dir, 128)
    n_pad = _round_up(N, tile_n)

    # Lane-dense packed input: [x_enc | d_enc | zero pad], bf16.
    xd = jnp.zeros((n_pad, in_pad), jnp.bfloat16)
    xd = xd.at[:N, :in_dim_pos].set(x_enc.astype(jnp.bfloat16))
    xd = xd.at[:N, in_dim_pos:in_dim_pos + in_dim_dir].set(d_enc.astype(jnp.bfloat16))

    weights = list(_pack_params(params, in_dim_pos, in_dim_dir, in_pad))

    def full_spec(arr):
        nd = arr.ndim
        return pl.BlockSpec(arr.shape, lambda i, _nd=nd: (0,) * _nd)

    grid_spec = pltpu.PrefetchScalarGridSpec(
        num_scalar_prefetch=0,
        grid=(n_pad // tile_n,),
        in_specs=[pl.BlockSpec((tile_n, in_pad), lambda i: (i, 0))]
                 + [full_spec(w) for w in weights],
        out_specs=pl.BlockSpec((tile_n, 4), lambda i: (i, 0)),
    )

    # Advisory cost estimate so XLA schedules producers/consumers sensibly.
    flops_per_row = 2 * (in_pad * H + H * H + H * H + H * (H + 1)
                         + H * half + in_pad * half + half * 3)
    weight_bytes = sum(int(w.size) * w.dtype.itemsize for w in weights)
    cost = pl.CostEstimate(
        flops=int(flops_per_row) * int(n_pad),
        transcendentals=0,
        bytes_accessed=int(n_pad) * (in_pad * 2 + 4 * 4) + int(weight_bytes),
    )

    out = pl.pallas_call(
        _nerf_kernel,
        out_shape=jax.ShapeDtypeStruct((n_pad, 4), jnp.float32),
        grid_spec=grid_spec,
        compiler_params=pltpu.CompilerParams(
            dimension_semantics=("parallel",),
            vmem_limit_bytes=32 * 1024 * 1024,
        ),
        cost_estimate=cost,
    )(xd, *weights)

    return out[:N] if n_pad != N else out


def init_params(key, in_dim_pos, in_dim_dir, hidden_dim):
    """Deterministic synthetic weights stored as (in, out) (PyTorch's W.T)."""
    ks = jax.random.split(key, 8)

    def lin(k, fan_in, fan_out):
        kw, kb = jax.random.split(k)
        scale = 1.0 / jnp.sqrt(fan_in)
        w = jax.random.uniform(kw, (fan_in, fan_out), jnp.float32, -scale, scale)
        b = jax.random.uniform(kb, (1, fan_out), jnp.float32, -scale, scale)
        return w, b

    w1, b1 = lin(ks[0], in_dim_pos, hidden_dim)
    w2, b2 = lin(ks[1], hidden_dim, hidden_dim)
    w3, b3 = lin(ks[2], hidden_dim, hidden_dim)
    ws, bs = lin(ks[3], hidden_dim, 1)
    wf, bf = lin(ks[4], hidden_dim, hidden_dim)
    wr1, br1 = lin(ks[5], hidden_dim + in_dim_dir, hidden_dim // 2)
    wr2, br2 = lin(ks[6], hidden_dim // 2, 3)
    return (w1, b1, w2, b2, w3, b3, ws, bs, wf, bf, wr1, br1, wr2, br2)


def nerf_reference(x_enc, d_enc, params, compute_dtype=jnp.float32):
    """Pure-JAX reference matching the PyTorch forward semantics.

    compute_dtype=bfloat16 mirrors the kernel's mixed precision (bf16 operands,
    f32 accumulation); float32 is the exact original-module semantics.
    """
    (w1, b1, w2, b2, w3, b3, ws, bs, wf, bf, wr1, br1, wr2, br2) = params
    cd = compute_dtype

    def lin(h, w, b):
        return jnp.dot(h.astype(cd), w.astype(cd),
                       preferred_element_type=jnp.float32) + b

    h = jnp.maximum(lin(x_enc, w1, b1), 0.0)
    h = jnp.maximum(lin(h, w2, b2), 0.0)
    h = jnp.maximum(lin(h, w3, b3), 0.0)
    sigma = lin(h, ws, bs)
    feature = lin(h, wf, bf)
    h_combined = jnp.concatenate([feature, d_enc.astype(jnp.float32)], axis=-1)
    hr = jnp.maximum(lin(h_combined, wr1, br1), 0.0)
    rgb = lin(hr, wr2, br2)
    return jnp.concatenate([rgb, sigma], axis=-1)


if __name__ == "__main__":
    # Default positional encodings (L_pos=10, L_dir=4); hidden_dim kept small
    # but MXU/lane-aligned for the demo (production NeRF uses 256).
    L_pos, L_dir, hidden_dim = 10, 4, 128
    in_dim_pos = 3 + 3 * 2 * L_pos   # 63
    in_dim_dir = 3 + 3 * 2 * L_dir   # 27
    N = 2048
    tile_n = 512                     # 4 grid steps -> both v7x TCs get work

    key = jax.random.PRNGKey(0)
    k_x, k_d, k_p = jax.random.split(key, 3)
    x_enc = jax.random.normal(k_x, (N, in_dim_pos), jnp.float32)
    d_enc = jax.random.normal(k_d, (N, in_dim_dir), jnp.float32)
    params = init_params(k_p, in_dim_pos, in_dim_dir, hidden_dim)

    out = nerf_forward(x_enc, d_enc, params, tile_n=tile_n)
    out = jax.block_until_ready(out)
    assert out.shape == (N, 4)

    # Mixed-precision reference (same bf16 operands / f32 accumulation).
    ref_bf16 = nerf_reference(x_enc, d_enc, params, compute_dtype=jnp.bfloat16)
    assert jnp.allclose(out, ref_bf16, atol=1e-2, rtol=1e-2), \
        float(jnp.max(jnp.abs(out - ref_bf16)))

    # Loose sanity check against the exact fp32 module semantics
    # (difference is only bf16 rounding of weights/activations).
    ref_f32 = nerf_reference(x_enc, d_enc, params, compute_dtype=jnp.float32)
    assert jnp.allclose(out, ref_f32, atol=1e-1, rtol=1e-1)

    print("KERNEL_OK")
</pallas_src>

<mosaic_0001>
module attributes {stable_mosaic.version = 11 : i64} {
  func.func @_nerf_kernel(%arg0: i32, %arg1: memref<512x128xbf16, #tpu.memory_space<vmem>>, %arg2: memref<128x128xbf16, #tpu.memory_space<vmem>>, %arg3: memref<1x128xf32, #tpu.memory_space<vmem>>, %arg4: memref<128x128xbf16, #tpu.memory_space<vmem>>, %arg5: memref<1x128xf32, #tpu.memory_space<vmem>>, %arg6: memref<128x128xbf16, #tpu.memory_space<vmem>>, %arg7: memref<1x128xf32, #tpu.memory_space<vmem>>, %arg8: memref<128x129xbf16, #tpu.memory_space<vmem>>, %arg9: memref<1x129xf32, #tpu.memory_space<vmem>>, %arg10: memref<128x64xbf16, #tpu.memory_space<vmem>>, %arg11: memref<128x64xbf16, #tpu.memory_space<vmem>>, %arg12: memref<1x64xf32, #tpu.memory_space<vmem>>, %arg13: memref<64x3xbf16, #tpu.memory_space<vmem>>, %arg14: memref<1x3xf32, #tpu.memory_space<vmem>>, %arg15: memref<512x4xf32, #tpu.memory_space<vmem>>) attributes {dimension_semantics = [#tpu.dimension_semantics<parallel>], iteration_bounds = array<i64: 4>, scalar_prefetch = 0 : i64, scratch_operands = 0 : i64, tpu.core_type = #tpu.core_type<tc>, window_params = [{transform_indices = @transform_0, window_bounds = array<i64: 512, 128>}, {pipeline_mode = #tpu.pipeline_mode<synchronous>, transform_indices = @transform_1, window_bounds = array<i64: 128, 128>}, {pipeline_mode = #tpu.pipeline_mode<synchronous>, transform_indices = @transform_2, window_bounds = array<i64: 1, 128>}, {pipeline_mode = #tpu.pipeline_mode<synchronous>, transform_indices = @transform_3, window_bounds = array<i64: 128, 128>}, {pipeline_mode = #tpu.pipeline_mode<synchronous>, transform_indices = @transform_4, window_bounds = array<i64: 1, 128>}, {pipeline_mode = #tpu.pipeline_mode<synchronous>, transform_indices = @transform_5, window_bounds = array<i64: 128, 128>}, {pipeline_mode = #tpu.pipeline_mode<synchronous>, transform_indices = @transform_6, window_bounds = array<i64: 1, 128>}, {pipeline_mode = #tpu.pipeline_mode<synchronous>, transform_indices = @transform_7, window_bounds = array<i64: 128, 129>}, {pipeline_mode = #tpu.pipeline_mode<synchronous>, transform_indices = @transform_8, window_bounds = array<i64: 1, 129>}, {pipeline_mode = #tpu.pipeline_mode<synchronous>, transform_indices = @transform_9, window_bounds = array<i64: 128, 64>}, {pipeline_mode = #tpu.pipeline_mode<synchronous>, transform_indices = @transform_10, window_bounds = array<i64: 128, 64>}, {pipeline_mode = #tpu.pipeline_mode<synchronous>, transform_indices = @transform_11, window_bounds = array<i64: 1, 64>}, {pipeline_mode = #tpu.pipeline_mode<synchronous>, transform_indices = @transform_12, window_bounds = array<i64: 64, 3>}, {pipeline_mode = #tpu.pipeline_mode<synchronous>, transform_indices = @transform_13, window_bounds = array<i64: 1, 3>}, {transform_indices = @transform_14, window_bounds = array<i64: 512, 4>}]} {
    %c0 = arith.constant 0 : index
    %c0_0 = arith.constant 0 : index
    %0 = vector.load %arg1[%c0, %c0_0] : memref<512x128xbf16, #tpu.memory_space<vmem>>, vector<512x128xbf16>
    %c0_1 = arith.constant 0 : index
    %c0_2 = arith.constant 0 : index
    %1 = vector.load %arg2[%c0_1, %c0_2] : memref<128x128xbf16, #tpu.memory_space<vmem>>, vector<128x128xbf16>
    %cst = arith.constant dense<0.000000e+00> : vector<512x128xf32>
    %2 = tpu.matmul %0, %1, %cst {dimension_numbers = #tpu.dot_dimension_numbers<[1], [0], [0], [1], [0, 0, 1, 1], [], []>} : vector<512x128xbf16>, vector<128x128xbf16>, vector<512x128xf32> -> vector<512x128xf32>
    %c0_3 = arith.constant 0 : index
    %c0_4 = arith.constant 0 : index
    %3 = vector.load %arg3[%c0_3, %c0_4] : memref<1x128xf32, #tpu.memory_space<vmem>>, vector<1x128xf32>
    %4 = vector.broadcast %3 : vector<1x128xf32> to vector<512x128xf32>
    %5 = arith.addf %2, %4 : vector<512x128xf32>
    %cst_5 = arith.constant 0.000000e+00 : f32
    %6 = vector.broadcast %cst_5 : f32 to vector<512x128xf32>
    %7 = arith.maximumf %5, %6 : vector<512x128xf32>
    %8 = arith.truncf %7 : vector<512x128xf32> to vector<512x128xbf16>
    %c0_6 = arith.constant 0 : index
    %c0_7 = arith.constant 0 : index
    %9 = vector.load %arg4[%c0_6, %c0_7] : memref<128x128xbf16, #tpu.memory_space<vmem>>, vector<128x128xbf16>
    %cst_8 = arith.constant dense<0.000000e+00> : vector<512x128xf32>
    %10 = tpu.matmul %8, %9, %cst_8 {dimension_numbers = #tpu.dot_dimension_numbers<[1], [0], [0], [1], [0, 0, 1, 1], [], []>} : vector<512x128xbf16>, vector<128x128xbf16>, vector<512x128xf32> -> vector<512x128xf32>
    %c0_9 = arith.constant 0 : index
    %c0_10 = arith.constant 0 : index
    %11 = vector.load %arg5[%c0_9, %c0_10] : memref<1x128xf32, #tpu.memory_space<vmem>>, vector<1x128xf32>
    %12 = vector.broadcast %11 : vector<1x128xf32> to vector<512x128xf32>
    %13 = arith.addf %10, %12 : vector<512x128xf32>
    %cst_11 = arith.constant 0.000000e+00 : f32
    %14 = vector.broadcast %cst_11 : f32 to vector<512x128xf32>
    %15 = arith.maximumf %13, %14 : vector<512x128xf32>
    %16 = arith.truncf %15 : vector<512x128xf32> to vector<512x128xbf16>
    %c0_12 = arith.constant 0 : index
    %c0_13 = arith.constant 0 : index
    %17 = vector.load %arg6[%c0_12, %c0_13] : memref<128x128xbf16, #tpu.memory_space<vmem>>, vector<128x128xbf16>
    %cst_14 = arith.constant dense<0.000000e+00> : vector<512x128xf32>
    %18 = tpu.matmul %16, %17, %cst_14 {dimension_numbers = #tpu.dot_dimension_numbers<[1], [0], [0], [1], [0, 0, 1, 1], [], []>} : vector<512x128xbf16>, vector<128x128xbf16>, vector<512x128xf32> -> vector<512x128xf32>
    %c0_15 = arith.constant 0 : index
    %c0_16 = arith.constant 0 : index
    %19 = vector.load %arg7[%c0_15, %c0_16] : memref<1x128xf32, #tpu.memory_space<vmem>>, vector<1x128xf32>
    %20 = vector.broadcast %19 : vector<1x128xf32> to vector<512x128xf32>
    %21 = arith.addf %18, %20 : vector<512x128xf32>
    %cst_17 = arith.constant 0.000000e+00 : f32
    %22 = vector.broadcast %cst_17 : f32 to vector<512x128xf32>
    %23 = arith.maximumf %21, %22 : vector<512x128xf32>
    %24 = arith.truncf %23 : vector<512x128xf32> to vector<512x128xbf16>
    %c0_18 = arith.constant 0 : index
    %c0_19 = arith.constant 0 : index
    %25 = vector.load %arg8[%c0_18, %c0_19] : memref<128x129xbf16, #tpu.memory_space<vmem>>, vector<128x129xbf16>
    %cst_20 = arith.constant dense<0.000000e+00> : vector<512x129xf32>
    %26 = tpu.matmul %24, %25, %cst_20 {dimension_numbers = #tpu.dot_dimension_numbers<[1], [0], [0], [1], [0, 0, 1, 1], [], []>} : vector<512x128xbf16>, vector<128x129xbf16>, vector<512x129xf32> -> vector<512x129xf32>
    %c0_21 = arith.constant 0 : index
    %c0_22 = arith.constant 0 : index
    %27 = vector.load %arg9[%c0_21, %c0_22] : memref<1x129xf32, #tpu.memory_space<vmem>>, vector<1x129xf32>
    %28 = vector.broadcast %27 : vector<1x129xf32> to vector<512x129xf32>
    %29 = arith.addf %26, %28 : vector<512x129xf32>
    %30 = vector.extract_strided_slice %29 {offsets = [0, 0], sizes = [512, 128], strides = [1, 1]} : vector<512x129xf32> to vector<512x128xf32>
    %31 = arith.truncf %30 : vector<512x128xf32> to vector<512x128xbf16>
    %32 = vector.extract_strided_slice %29 {offsets = [0, 128], sizes = [512, 1], strides = [1, 1]} : vector<512x129xf32> to vector<512x1xf32>
    %c0_23 = arith.constant 0 : index
    %c0_24 = arith.constant 0 : index
    %33 = vector.load %arg10[%c0_23, %c0_24] : memref<128x64xbf16, #tpu.memory_space<vmem>>, vector<128x64xbf16>
    %cst_25 = arith.constant dense<0.000000e+00> : vector<512x64xf32>
    %34 = tpu.matmul %31, %33, %cst_25 {dimension_numbers = #tpu.dot_dimension_numbers<[1], [0], [0], [1], [0, 0, 1, 1], [], []>} : vector<512x128xbf16>, vector<128x64xbf16>, vector<512x64xf32> -> vector<512x64xf32>
    %c0_26 = arith.constant 0 : index
    %c0_27 = arith.constant 0 : index
    %35 = vector.load %arg11[%c0_26, %c0_27] : memref<128x64xbf16, #tpu.memory_space<vmem>>, vector<128x64xbf16>
    %cst_28 = arith.constant dense<0.000000e+00> : vector<512x64xf32>
    %36 = tpu.matmul %0, %35, %cst_28 {dimension_numbers = #tpu.dot_dimension_numbers<[1], [0], [0], [1], [0, 0, 1, 1], [], []>} : vector<512x128xbf16>, vector<128x64xbf16>, vector<512x64xf32> -> vector<512x64xf32>
    %37 = arith.addf %34, %36 : vector<512x64xf32>
    %c0_29 = arith.constant 0 : index
    %c0_30 = arith.constant 0 : index
    %38 = vector.load %arg12[%c0_29, %c0_30] : memref<1x64xf32, #tpu.memory_space<vmem>>, vector<1x64xf32>
    %39 = vector.broadcast %38 : vector<1x64xf32> to vector<512x64xf32>
    %40 = arith.addf %37, %39 : vector<512x64xf32>
    %cst_31 = arith.constant 0.000000e+00 : f32
    %41 = vector.broadcast %cst_31 : f32 to vector<512x64xf32>
    %42 = arith.maximumf %40, %41 : vector<512x64xf32>
    %43 = arith.truncf %42 : vector<512x64xf32> to vector<512x64xbf16>
    %c0_32 = arith.constant 0 : index
    %c0_33 = arith.constant 0 : index
    %44 = vector.load %arg13[%c0_32, %c0_33] : memref<64x3xbf16, #tpu.memory_space<vmem>>, vector<64x3xbf16>
    %cst_34 = arith.constant dense<0.000000e+00> : vector<512x3xf32>
    %45 = tpu.matmul %43, %44, %cst_34 {dimension_numbers = #tpu.dot_dimension_numbers<[1], [0], [0], [1], [0, 0, 1, 1], [], []>} : vector<512x64xbf16>, vector<64x3xbf16>, vector<512x3xf32> -> vector<512x3xf32>
    %c0_35 = arith.constant 0 : index
    %c0_36 = arith.constant 0 : index
    %46 = vector.load %arg14[%c0_35, %c0_36] : memref<1x3xf32, #tpu.memory_space<vmem>>, vector<1x3xf32>
    %47 = vector.broadcast %46 : vector<1x3xf32> to vector<512x3xf32>
    %48 = arith.addf %45, %47 : vector<512x3xf32>
    %c0_37 = arith.constant 0 : index
    %c0_38 = arith.constant 0 : index
    %49 = vector.load %arg15[%c0_37, %c0_38] : memref<512x4xf32, #tpu.memory_space<vmem>>, vector<512x3xf32>
    tpu.vector_store %arg15[%c0_37, %c0_38], %48 {strides = array<i32>} : memref<512x4xf32, #tpu.memory_space<vmem>>, vector<512x3xf32>,
    %c0_39 = arith.constant 0 : index
    %c3 = arith.constant 3 : index
    %50 = vector.load %arg15[%c0_39, %c3] : memref<512x4xf32, #tpu.memory_space<vmem>>, vector<512x1xf32>
    tpu.vector_store %arg15[%c0_39, %c3], %32 {strides = array<i32>} : memref<512x4xf32, #tpu.memory_space<vmem>>, vector<512x1xf32>,
    return
  }
  func.func @transform_0(%arg0: i32) -> (i32, i32) {
    %c0_i32 = arith.constant 0 : i32
    %c0_i32_0 = arith.constant 0 : i32
    return %arg0, %c0_i32 : i32, i32
  }
  func.func @transform_1(%arg0: i32) -> (i32, i32) {
    %c0_i32 = arith.constant 0 : i32
    %c0_i32_0 = arith.constant 0 : i32
    %c0_i32_1 = arith.constant 0 : i32
    return %c0_i32, %c0_i32_0 : i32, i32
  }
  func.func @transform_2(%arg0: i32) -> (i32, i32) {
    %c0_i32 = arith.constant 0 : i32
    %c0_i32_0 = arith.constant 0 : i32
    %c0_i32_1 = arith.constant 0 : i32
    return %c0_i32, %c0_i32_0 : i32, i32
  }
  func.func @transform_3(%arg0: i32) -> (i32, i32) {
    %c0_i32 = arith.constant 0 : i32
    %c0_i32_0 = arith.constant 0 : i32
    %c0_i32_1 = arith.constant 0 : i32
    return %c0_i32, %c0_i32_0 : i32, i32
  }
  func.func @transform_4(%arg0: i32) -> (i32, i32) {
    %c0_i32 = arith.constant 0 : i32
    %c0_i32_0 = arith.constant 0 : i32
    %c0_i32_1 = arith.constant 0 : i32
    return %c0_i32, %c0_i32_0 : i32, i32
  }
  func.func @transform_5(%arg0: i32) -> (i32, i32) {
    %c0_i32 = arith.constant 0 : i32
    %c0_i32_0 = arith.constant 0 : i32
    %c0_i32_1 = arith.constant 0 : i32
    return %c0_i32, %c0_i32_0 : i32, i32
  }
  func.func @transform_6(%arg0: i32) -> (i32, i32) {
    %c0_i32 = arith.constant 0 : i32
    %c0_i32_0 = arith.constant 0 : i32
    %c0_i32_1 = arith.constant 0 : i32
    return %c0_i32, %c0_i32_0 : i32, i32
  }
  func.func @transform_7(%arg0: i32) -> (i32, i32) {
    %c0_i32 = arith.constant 0 : i32
    %c0_i32_0 = arith.constant 0 : i32
    %c0_i32_1 = arith.constant 0 : i32
    return %c0_i32, %c0_i32_0 : i32, i32
  }
  func.func @transform_8(%arg0: i32) -> (i32, i32) {
    %c0_i32 = arith.constant 0 : i32
    %c0_i32_0 = arith.constant 0 : i32
    %c0_i32_1 = arith.constant 0 : i32
    return %c0_i32, %c0_i32_0 : i32, i32
  }
  func.func @transform_9(%arg0: i32) -> (i32, i32) {
    %c0_i32 = arith.constant 0 : i32
    %c0_i32_0 = arith.constant 0 : i32
    %c0_i32_1 = arith.constant 0 : i32
    return %c0_i32, %c0_i32_0 : i32, i32
  }
  func.func @transform_10(%arg0: i32) -> (i32, i32) {
    %c0_i32 = arith.constant 0 : i32
    %c0_i32_0 = arith.constant 0 : i32
    %c0_i32_1 = arith.constant 0 : i32
    return %c0_i32, %c0_i32_0 : i32, i32
  }
  func.func @transform_11(%arg0: i32) -> (i32, i32) {
    %c0_i32 = arith.constant 0 : i32
    %c0_i32_0 = arith.constant 0 : i32
    %c0_i32_1 = arith.constant 0 : i32
    return %c0_i32, %c0_i32_0 : i32, i32
  }
  func.func @transform_12(%arg0: i32) -> (i32, i32) {
    %c0_i32 = arith.constant 0 : i32
    %c0_i32_0 = arith.constant 0 : i32
    %c0_i32_1 = arith.constant 0 : i32
    return %c0_i32, %c0_i32_0 : i32, i32
  }
  func.func @transform_13(%arg0: i32) -> (i32, i32) {
    %c0_i32 = arith.constant 0 : i32
    %c0_i32_0 = arith.constant 0 : i32
    %c0_i32_1 = arith.constant 0 : i32
    return %c0_i32, %c0_i32_0 : i32, i32
  }
  func.func @transform_14(%arg0: i32) -> (i32, i32) {
    %c0_i32 = arith.constant 0 : i32
    %c0_i32_0 = arith.constant 0 : i32
    return %arg0, %c0_i32 : i32, i32
  }
}

</mosaic_0001>

<bundles_post_ra>
// kernel: tpu_custom_call.1
= control target key start
LH: loop header
LB: loop body
LE: loop exit
PB: predicated region body
PF: predicated region fallthrough
CT: control target
= control target key end

     0   :  { %s6115_s0 = inlined_call_operand.hbm [shape: bf16[2048,128], index: 0, kind: input, shape index: {}]   ;;  %s6116_s1 = inlined_call_operand.vmem [shape: bf16[128,128], index: 1, kind: input, shape index: {}]   ;;  %s6117_s2 = inlined_call_operand.vmem [shape: f32[1,128], index: 2, kind: input, shape index: {}]   ;;  %s6118_s3 = inlined_call_operand.vmem [shape: bf16[128,128], index: 3, kind: input, shape index: {}]   ;;  %s6119_s4 = inlined_call_operand.vmem [shape: f32[1,128], index: 4, kind: input, shape index: {}]   ;;  %s6120_s5 = inlined_call_operand.vmem [shape: bf16[128,128], index: 5, kind: input, shape index: {}]   ;;  %s6121_s6 = inlined_call_operand.vmem [shape: f32[1,128], index: 6, kind: input, shape index: {}]   ;;  %s6122_s7 = inlined_call_operand.vmem [shape: bf16[128,129], index: 7, kind: input, shape index: {}]   ;;  %s6123_s8 = inlined_call_operand.vmem [shape: f32[1,129], index: 8, kind: input, shape index: {}]   ;;  %s6124_s9 = inlined_call_operand.vmem [shape: bf16[128,64], index: 9, kind: input, shape index: {}]   ;;  %s6125_s10 = inlined_call_operand.vmem [shape: bf16[128,64], index: 10, kind: input, shape index: {}]   ;;  %s6126_s11 = inlined_call_operand.vmem [shape: f32[1,64], index: 11, kind: input, shape index: {}]   ;;  %s6127_s12 = inlined_call_operand.vmem [shape: bf16[64,3], index: 12, kind: input, shape index: {}]   ;;  %s6128_s13 = inlined_call_operand.vmem [shape: f32[1,3], index: 13, kind: input, shape index: {}]   ;;  %s6129_s14 = inlined_call_operand.vmem [shape: f32[2048,4], index: 14, kind: output, shape index: {}]  }
   0x1   :  { %6134 = sst [smem:[#allocation8_spill]] %s6129_s14 }
   0x2   :  { %19 = vsyncpa [#allocation3], 0 }
   0x3   :  { %21 = vsyncpa [#allocation3 + $0x1], 0  ;;  %s4339_s29 = smov 0   ;;  %s4341_s30 = smov 0  }
   0x4   :  { %s4343_s15 = smov 0   ;;  %s4345_s16 = smov 0  }
   0x5 LB: > { %6135 = sst [smem:[#allocation5_spill]] %s4255_s15  ;;  %s6130_s17 = sadd.s32 4294967295, %s4259_s16   ;;  %s4259_s16 = sphi %s4345_s16, %s6149_s16   ;;  %s4255_s15 = sphi %s4343_s15, %s6151_s15   ;;  %s4251_s30 = sphi %s4341_s30, %s6153_s30   ;;  %s4247_s29 = sphi %s4339_s29, %s6152_s29  }
   0x6   : > { %s4359_s18 = sadd.s32 1, %s4259_s16   ;;  %s34_s20 = sadd.s32 1, %s4255_s15 }
   0x7   : > { %6136 = sst [smem:[#allocation6_spill]] %s4359_s18  ;;  %s31_s19 = ssub.s32 %s4259_s16, %s4359_s18 }
   0x8   : > { %p32_p0 = scmp.eq.s32.totalorder %s31_s19, 0  ;;  %p41_p1 = scmp.ne.s32.totalorder %s4255_s15, %s4251_s30 }
   0x9   : > { %p42_p2 = scmp.eq.s32.totalorder %s4259_s16, 0  ;;  %p47_p3 = scmp.ne.s32.totalorder %s4251_s30, %s4247_s29 }
   0xa   : > { %s4369_s21 = scalar_select %p32_p0, %s4255_s15, %s34_s20  }
   0xb   : > { %p4371_p4 = por %p42_p2, %p41_p1  ;;  %p48_p5 = scmp.eq.s32.totalorder %s6130_s17, 0 }
   0xc   : > { %6137 = sst [smem:[#allocation7_spill]] %s4369_s21  ;;  %p4117_p6 = scmp.lt.s32.totalorder %s4259_s16, 4 }
   0xd   : > { %p4378_p7 = por %p48_p5, %p47_p3  ;;  %s409_s24 = sand.u32 1, %s4255_s15  }
   0xe   : > { %s3609_s25 = sshll.u32 %s409_s24, 8  ;;  %s4018_s26 = sshll.u32 %s4259_s16, 8 }
   0xf   : > { %s418_s29 = scalar_lea.hbm %s6115_s0, %s4018_s26  ;;  %s413_s19 = scalar_lea.vmem [#allocation2], %s3609_s25 }
  0x10   : > { %s421_s20 = sshll.u32 %s413_s19, 4  ;;  %s419_s21 = sshll.u32 %s418_s29, 4  ;;  %s422_s20 = int_to_ptr.vmem [resolvable:$true] %s421_s20  ;;  %s420_s21 = int_to_ptr.hbm [resolvable:$true] %s419_s21 }
  0x11   : > { %p4389_p8 = pnand %p4117_p6, %p4371_p4  ;;  %p3612_p9 = scmp.ge.s32.totalorder %s4259_s16, 1 }
  0x12   : > { %s410_s18 = scalar_lea.sflag [#allocation3], %s409_s24  ;;  %s4195_s15 = sshra.s32 %s420_s21, 4  ;;  %s4196_s15 = int_to_ptr.hbm [resolvable:$true] %s4195_s15 }
  0x13   : > { %s4197_s14 = scalar_lea.hbm %s4196_s15, 256  ;;  %p4199_p11 = pneg %p4389_p8 }
  0x14   : > { %p4198_p10 = scmp.ne.s32.totalorder %s4196_s15, %s4197_s14  ;;  %s4202_s27 = scalar_lea.hbm %s6115_s0, 1024 }
  0x15   : > { %p4203_p0 = scmp.lt.s32.totalorder %s4196_s15, %s6115_s0  ;;  %p4204_p1 = scmp.lt.s32.totalorder %s4202_s27, %s4197_s14 }
  0x16   : > { %p4200_p12 = pnand %p4199_p11, %p4198_p10 }
  0x17   : > { %p4205_p2 = por %p4204_p1, %p4203_p0 }
  0x18   : > { %p4201_p13 = pneg %p4200_p12 }
  0x1a   : > { %p4206_p3 = pnand %p4205_p2, %p4201_p13 }
  0x1c   : > { %4209 = shalt.err (!%p4206_p3)
}
  0x1d   : > { %s4261_s24 = smov 64   ;;  %s4262_s29 = smov 4  }
  0x1e   : > { %4116 = dma.hbm_to_vmem [thread:$0]  (!%p4389_p8), %s420_s21, 4096, %s422_s20, %s410_s18, %s4261_s24, %s4261_s24, %s4262_s29  }
  0x1f   : > { %p429_p4 = scmp.lt.s32.totalorder %s4259_s16, 5 }
  0x21   : > { %p430_p5 = pnand %p3612_p9, %p429_p4 }
  0x22   : > { %s435_s19 = sand.u32 (!%p430_p5), 1, %s4251_s30  }
  0x23   : > { %433 = sbr.rel (%p430_p5) target bundleno = 1653 (0x675), region = 76  ;;  %s3613_s25 = sshll.u32 (!%p430_p5), %s435_s19, 8 }
  0x24   : > { %s436_s15 = scalar_lea.sflag (!%p430_p5), [#allocation3], %s435_s19  ;;  %s4408_s14 = scalar_lea.vmem (!%p430_p5), [#allocation2], %s3613_s25 }
  0x28   : > { %4242 = dma.done.wait (%p4378_p7), %s436_s15, 4096  }
  0x29   : > { %4244 = vsyncadd (%p4378_p7), %s436_s15, 4294963200  ;;  %v4058_v0 = vld [vmem:[%s6116_s1 + $0x38] sm:$0xff]  ;;  %v4057_v1 = vld [vmem:[%s6116_s1 + $0x30] sm:$0xff]  ;;  %s4263_s17 = smov 3   ;;  %vm2886_vm0 = vcmask 523264   ;;  %s6142_s27 = sadd.s32 4294967295, %s4259_s16  }
  0x2a   : > { %817 = vmatpush.bf16.msra.mxu0 %v4058_v0  ;;  %v4056_v2 = vld [vmem:[%s6116_s1 + $0x28] sm:$0xff]  ;;  %v4055_v3 = vld [vmem:[%s6116_s1 + $0x20] sm:$0xff]  ;;  %v4054_v4 = vld [vmem:[%s6116_s1 + $0x18] sm:$0xff]  ;;  %s3614_s18 = sshll.u32 %s6142_s27, 6  ;;  %s6143_s28 = sld [smem:[#allocation8_spill]]  ;;  %vm3152_vm1 = vcmask 23552  }
  0x2b   : > { %v4053_v5 = vld [vmem:[%s6116_s1 + $0x10] sm:$0xff]  ;;  %v4052_v6 = vld [vmem:[%s6116_s1 + $0x8] sm:$0xff]  ;;  %v4051_v7 = vld [vmem:[%s6116_s1] sm:$0xff]  ;;  %p487_p6 = scmp.lt.s32.totalorder %s3614_s18, 255  ;;  %vm3473_vm2 = vcmask 31768  }
  0x2c   : > { %v4019_v8 = vld [vmem:[%s4408_s14] sm:$0xff]  ;;  %v4020_v9 = vld [vmem:[%s4408_s14 + $0x8] sm:$0xff]  ;;  %v4021_v10 = vld [vmem:[%s4408_s14 + $0x10] sm:$0xff] }
  0x2d   : > { %v4022_v11 = vld [vmem:[%s4408_s14 + $0x18] sm:$0xff]  ;;  %v4023_v12 = vld [vmem:[%s4408_s14 + $0x20] sm:$0xff]  ;;  %v4024_v14 = vld [vmem:[%s4408_s14 + $0x28] sm:$0xff]  ;;  %s6155_s18 = smov (!%p487_p6, %s3614_s18), 255 }
  0x2e   : > { %818 = vmatpush.bf16.msra.mxu0 %v4057_v1  ;;  %v4066_v13 = vld [vmem:[%s6118_s3 + $0x38] sm:$0xff]  ;;  %v4065_v15 = vld [vmem:[%s6118_s3 + $0x30] sm:$0xff]  ;;  %v4064_v16 = vld [vmem:[%s6118_s3 + $0x28] sm:$0xff]  ;;  %s3615_s16 = sshll.u32 %s6155_s18, 3 }
  0x2f   : > { %1150 = vmatpush.bf16.msra.mxu1 %v4066_v13  ;;  %v4063_v17 = vld [vmem:[%s6118_s3 + $0x20] sm:$0xff]  ;;  %v4062_v18 = vld [vmem:[%s6118_s3 + $0x18] sm:$0xff]  ;;  %v4025_v19 = vld [vmem:[%s4408_s14 + $0x30] sm:$0xff] }
  0x30   : > { %v4061_v20 = vld [vmem:[%s6118_s3 + $0x10] sm:$0xff]  ;;  %v4060_v21 = vld [vmem:[%s6118_s3 + $0x8] sm:$0xff]  ;;  %v4059_v22 = vld [vmem:[%s6118_s3] sm:$0xff]  ;;  %s5583_s24 = scalar_lea.vmem %s6143_s28, %s3615_s16 }
  0x31   : > { %v4026_v23 = vld [vmem:[%s4408_s14 + $0x38] sm:$0xff]  ;;  %v4027_v24 = vld [vmem:[%s4408_s14 + $0x40] sm:$0xff]  ;;  %v4028_v33 = vld [vmem:[%s4408_s14 + $0x48] sm:$0xff] }
  0x32   : > { %819 = vmatpush.bf16.msra.mxu0 %v4056_v2  ;;  %v4474_v26 = vld [vmem:[%s6117_s2] ss:$0 sm:$0xff]  ;;  %v4029_v41 = vld [vmem:[%s4408_s14 + $0x50] sm:$0xff]  ;;  %v4030_v49 = vld [vmem:[%s4408_s14 + $0x58] sm:$0xff] }
  0x33   : > { %1151 = vmatpush.bf16.msra.mxu1 %v4065_v15  ;;  %v4031_v57 = vld [vmem:[%s4408_s14 + $0x60] sm:$0xff]  ;;  %v4032_v1 = vld [vmem:[%s4408_s14 + $0x68] sm:$0xff] }
  0x34   : > { %v4072_v13 = vld [vmem:[%s6120_s5 + $0x28] sm:$0xff] }
  0x36   : > { %820 = vmatpush.bf16.msra.mxu0 %v4055_v3 }
  0x37   : > { %1152 = vmatpush.bf16.msra.mxu1 %v4064_v16 }
  0x3a   : > { %821 = vmatpush.bf16.msra.mxu0 %v4054_v4 }
  0x3b   : > { %1153 = vmatpush.bf16.msra.mxu1 %v4063_v17 }
  0x3e   : > { %822 = vmatpush.bf16.msra.mxu0 %v4053_v5 }
  0x3f   : > { %1154 = vmatpush.bf16.msra.mxu1 %v4062_v18  ;;  %v4070_v18 = vld [vmem:[%s6120_s5 + $0x18] sm:$0xff] }
  0x42   : > { %823 = vmatpush.bf16.msra.mxu0 %v4052_v6  ;;  %v4074_v6 = vld [vmem:[%s6120_s5 + $0x38] sm:$0xff] }
  0x43   : > { %1155 = vmatpush.bf16.msra.mxu1 %v4061_v20  ;;  %1483 = vmatpush.bf16.msra.mxu2 %v4074_v6 }
  0x46   : > { %824 = vmatpush.bf16.msra.mxu0 %v4051_v7 }
  0x47   : > { %1156 = vmatpush.bf16.msra.mxu1 %v4060_v21 }
  0x49   : > { %825 = vmatmul.bf16.vlgmr.msra.gmra.mxu0 %v4019_v8 }
  0x4b   : > { %1157 = vmatpush.bf16.msra.mxu1 %v4059_v22  ;;  %v4069_v22 = vld [vmem:[%s6120_s5 + $0x10] sm:$0xff] }
  0x59   : > { %830 = vmatmul.bf16.gmra.mxu0 %v4020_v9 }
  0x69   : > { %835 = vmatmul.bf16.gmra.mxu0 %v4021_v10  ;;  %v4073_v10 = vld [vmem:[%s6120_s5 + $0x30] sm:$0xff] }
  0x6a   : > { %1484 = vmatpush.bf16.msra.mxu2 %v4073_v10 }
  0x6e   : > { %1485 = vmatpush.bf16.msra.mxu2 %v4072_v13 }
  0x79   : > { %840 = vmatmul.bf16.gmra.mxu0 %v4022_v11  ;;  %v4033_v11 = vld [vmem:[%s4408_s14 + $0x70] sm:$0xff] }
  0x89   : > { %845 = vmatmul.bf16.gmra.mxu0 %v4023_v12 }
  0x99   : > { %850 = vmatmul.bf16.gmra.mxu0 %v4024_v14  ;;  %v4071_v14 = vld [vmem:[%s6120_s5 + $0x20] sm:$0xff] }
  0x9a   : > { %1486 = vmatpush.bf16.msra.mxu2 %v4071_v14 }
  0x9e   : > { %1487 = vmatpush.bf16.msra.mxu2 %v4070_v18 }
  0xa2   : > { %1488 = vmatpush.bf16.msra.mxu2 %v4069_v22 }
  0xa9   : > { %855 = vmatmul.bf16.gmra.mxu0 %v4025_v19 }
  0xb9   : > { %860 = vmatmul.bf16.gmra.mxu0 %v4026_v23  ;;  %v4034_v23 = vld [vmem:[%s4408_s14 + $0x78] sm:$0xff] }
  0xc6   : > { %v826_v25 = vpop.f32.mrf.mxu0 }
  0xc7   : > { %v827_v27 = vadd.f32 %v4474_v26, %v826_v25  ;;  %v4068_v25 = vld [vmem:[%s6120_s5 + $0x8] sm:$0xff] }
  0xc8   : > { %1489 = vmatpush.bf16.msra.mxu2 %v4068_v25 }
  0xc9   : > { %865 = vmatmul.bf16.gmra.mxu0 %v4027_v24  ;;  %v986_v30 = vmax.f32 %v827_v27, 0.0  ;;  %v4067_v27 = vld [vmem:[%s6120_s5] sm:$0xff] }
  0xcc   : > { %1490 = vmatpush.bf16.msra.mxu2 %v4067_v27 }
  0xce   : > { %v828_v28 = vpop.f32.mrf.mxu0 }
  0xcf   : > { %v829_v29 = vadd.f32 %v4474_v26, %v828_v28 }
  0xd1   : > { %v987_v31 = vmax.f32 %v829_v29, 0.0 }
  0xd3   : > { %v1050_v32 = vpack.c.bf16 %v987_v31, %v986_v30 }
  0xd5   : > { %1158 = vmatmul.bf16.vlgmr.msra.gmra.mxu1 %v1050_v32 }
  0xd6   : > { %v831_v34 = vpop.f32.mrf.mxu0 }
  0xd7   : > { %v832_v35 = vadd.f32 %v4474_v26, %v831_v34 }
  0xd9   : > { %870 = vmatmul.bf16.gmra.mxu0 %v4028_v33  ;;  %v988_v38 = vmax.f32 %v832_v35, 0.0  ;;  %v4098_v33 = vld [vmem:[%s6124_s9 + $0x38] sm:$0xff]  ;;  %v4035_v35 = vld [vmem:[%s4408_s14 + $0x80] sm:$0xff] }
  0xda   : > { %2517 = vmatpush.bf16.msrb.mxu2 %v4098_v33 }
  0xde   : > { %v833_v36 = vpop.f32.mrf.mxu0 }
  0xdf   : > { %v834_v37 = vadd.f32 %v4474_v26, %v833_v36 }
  0xe1   : > { %v989_v39 = vmax.f32 %v834_v37, 0.0  ;;  %v4106_v37 = vld [vmem:[%s6125_s10 + $0x38] sm:$0xff] }
  0xe2   : > { %2300 = vmatpush.bf16.msrb.mxu1 %v4106_v37 }
  0xe3   : > { %v1051_v40 = vpack.c.bf16 %v989_v39, %v988_v38 }
  0xe5   : > { %1163 = vmatmul.bf16.gmra.mxu1 %v1051_v40 }
  0xe6   : > { %v836_v42 = vpop.f32.mrf.mxu0 }
  0xe7   : > { %v837_v43 = vadd.f32 %v4474_v26, %v836_v42 }
  0xe9   : > { %875 = vmatmul.bf16.gmra.mxu0 %v4029_v41  ;;  %v990_v46 = vmax.f32 %v837_v43, 0.0 }
  0xee   : > { %v838_v44 = vpop.f32.mrf.mxu0 }
  0xef   : > { %v839_v45 = vadd.f32 %v4474_v26, %v838_v44 }
  0xf1   : > { %v991_v47 = vmax.f32 %v839_v45, 0.0  ;;  %v4535_v45 = vld [vmem:[%s6119_s4] ss:$0 sm:$0xff] }
  0xf3   : > { %v1052_v48 = vpack.c.bf16 %v991_v47, %v990_v46  ;;  %v4036_v46 = vld [vmem:[%s4408_s14 + $0x88] sm:$0xff] }
  0xf5   : > { %1168 = vmatmul.bf16.gmra.mxu1 %v1052_v48 }
  0xf6   : > { %v841_v50 = vpop.f32.mrf.mxu0 }
  0xf7   : > { %v842_v51 = vadd.f32 %v4474_v26, %v841_v50 }
  0xf9   : > { %880 = vmatmul.bf16.gmra.mxu0 %v4030_v49  ;;  %v992_v54 = vmax.f32 %v842_v51, 0.0 }
  0xfe   : > { %v843_v52 = vpop.f32.mrf.mxu0 }
  0xff   : > { %v844_v53 = vadd.f32 %v4474_v26, %v843_v52 }
 0x101   : > { %v993_v55 = vmax.f32 %v844_v53, 0.0 }
 0x103   : > { %v1053_v56 = vpack.c.bf16 %v993_v55, %v992_v54 }
 0x105   : > { %1173 = vmatmul.bf16.gmra.mxu1 %v1053_v56 }
 0x106   : > { %v846_v58 = vpop.f32.mrf.mxu0 }
 0x107   : > { %v847_v59 = vadd.f32 %v4474_v26, %v846_v58 }
 0x109   : > { %885 = vmatmul.bf16.gmra.mxu0 %v4031_v57  ;;  %v994_v62 = vmax.f32 %v847_v59, 0.0 }
 0x10e   : > { %v848_v60 = vpop.f32.mrf.mxu0 }
 0x10f   : > { %v849_v61 = vadd.f32 %v4474_v26, %v848_v60 }
 0x111   : > { %v995_v63 = vmax.f32 %v849_v61, 0.0  ;;  %v4037_v61 = vld [vmem:[%s4408_s14 + $0x90] sm:$0xff] }
 0x113   : > { %v1054_v0 = vpack.c.bf16 %v995_v63, %v994_v62 }
 0x115   : > { %1178 = vmatmul.bf16.gmra.mxu1 %v1054_v0  ;;  %v4089_v0 = vld [vmem:[%s6122_s7 + $0x74] sm:$0xf] }
 0x116   : > { %v851_v2 = vpop.f32.mrf.mxu0 }
 0x117   : > { %v852_v3 = vadd.f32 %v4474_v26, %v851_v2 }
 0x119   : > { %890 = vmatmul.bf16.gmra.mxu0 %v4032_v1  ;;  %v996_v7 = vmax.f32 %v852_v3, 0.0  ;;  %v3900_v1 = vld [vmem:[%s6122_s7 + $0x78] sm:$0xf0] }
 0x11a   : > { %v3903_v3 = vor.u32 %v4089_v0, %v3900_v1  ;;  %v4041_v0 = vld [vmem:[%s4408_s14 + $0xb0] sm:$0xff] }
 0x11c   : > { %2019 = vmatpush.bf16.msrb.mxu0 %v3903_v3  ;;  %v4087_v3 = vld [vmem:[%s6122_s7 + $0x64] sm:$0xf] }
 0x11e   : > { %v853_v4 = vpop.f32.mrf.mxu0 }
 0x11f   : > { %v854_v5 = vadd.f32 %v4474_v26, %v853_v4 }
 0x121   : > { %v997_v8 = vmax.f32 %v854_v5, 0.0 }
 0x123   : > { %v1055_v9 = vpack.c.bf16 %v997_v8, %v996_v7 }
 0x125   : > { %1183 = vmatmul.bf16.gmra.mxu1 %v1055_v9 }
 0x126   : > { %v856_v12 = vpop.f32.mrf.mxu0 }
 0x127   : > { %v857_v15 = vadd.f32 %v4474_v26, %v856_v12 }
 0x129   : > { %895 = vmatmul.bf16.gmra.mxu0 %v4033_v11  ;;  %v998_v19 = vmax.f32 %v857_v15, 0.0  ;;  %v4038_v15 = vld [vmem:[%s4408_s14 + $0x98] sm:$0xff] }
 0x12e   : > { %v858_v16 = vpop.f32.mrf.mxu0 }
 0x12f   : > { %v859_v17 = vadd.f32 %v4474_v26, %v858_v16 }
 0x131   : > { %v999_v20 = vmax.f32 %v859_v17, 0.0 }
 0x133   : > { %v1056_v21 = vpack.c.bf16 %v999_v20, %v998_v19 }
 0x135   : > { %1188 = vmatmul.bf16.gmra.mxu1 %v1056_v21 }
 0x136   : > { %v861_v24 = vpop.f32.mrf.mxu0 }
 0x137   : > { %v862_v28 = vadd.f32 %v4474_v26, %v861_v24 }
 0x139   : > { %900 = vmatmul.bf16.gmra.mxu0 %v4034_v23  ;;  %v1000_v31 = vmax.f32 %v862_v28, 0.0 }
 0x13e   : > { %v863_v29 = vpop.f32.mrf.mxu0 }
 0x13f   : > { %v864_v30 = vadd.f32 %v4474_v26, %v863_v29  ;;  %v4097_v29 = vld [vmem:[%s6124_s9 + $0x30] sm:$0xff] }
 0x140   : > { %2518 = vmatpush.bf16.msrb.mxu2 %v4097_v29  ;;  %v4086_v29 = vld [vmem:[%s6122_s7 + $0x54] sm:$0xf0] }
 0x141   : > { %v1001_v32 = vmax.f32 %v864_v30, 0.0 }
 0x143   : > { %v1057_v34 = vpack.c.bf16 %v1001_v32, %v1000_v31  ;;  %v4039_v32 = vld [vmem:[%s4408_s14 + $0xa0] sm:$0xff] }
 0x145   : > { %1193 = vmatmul.bf16.gmra.mxu1 %v1057_v34 }
 0x146   : > { %v866_v36 = vpop.f32.mrf.mxu0 }
 0x147   : > { %v867_v38 = vadd.f32 %v4474_v26, %v866_v36 }
 0x149   : > { %905 = vmatmul.bf16.gmra.mxu0 %v4035_v35  ;;  %v1002_v41 = vmax.f32 %v867_v38, 0.0  ;;  %v4105_v35 = vld [vmem:[%s6125_s10 + $0x30] sm:$0xff] }
 0x14a   : > { %2301 = vmatpush.bf16.msrb.mxu1 %v4105_v35 }
 0x14e   : > { %v868_v39 = vpop.f32.mrf.mxu0 }
 0x14f   : > { %v869_v40 = vadd.f32 %v4474_v26, %v868_v39 }
 0x151   : > { %v1003_v42 = vmax.f32 %v869_v40, 0.0 }
 0x152   : > { %v1159_v43 = vpop.f32.mrf.mxu1 }
 0x153   : > { %v1058_v44 = vpack.c.bf16 %v1003_v42, %v1002_v41  ;;  %v1160_v48 = vadd.f32 %v4535_v45, %v1159_v43 }
 0x155   : > { %1198 = vmatmul.bf16.gmra.mxu1 %v1058_v44  ;;  %v1319_v51 = vmax.f32 %v1160_v48, 0.0 }
 0x156   : > { %v871_v47 = vpop.f32.mrf.mxu0 }
 0x157   : > { %v872_v52 = vadd.f32 %v4474_v26, %v871_v47 }
 0x159   : > { %910 = vmatmul.bf16.gmra.mxu0 %v4036_v46  ;;  %v1004_v57 = vmax.f32 %v872_v52, 0.0 }
 0x15a   : > { %v1161_v49 = vpop.f32.mrf.mxu1 }
 0x15b   : > { %v1162_v50 = vadd.f32 %v4535_v45, %v1161_v49  ;;  %v4040_v49 = vld [vmem:[%s4408_s14 + $0xa8] sm:$0xff] }
 0x15d   : > { %v1320_v53 = vmax.f32 %v1162_v50, 0.0 }
 0x15e   : > { %v873_v54 = vpop.f32.mrf.mxu0 }
 0x15f   : > { %v874_v55 = vadd.f32 %v4474_v26, %v873_v54  ;;  %v1383_v56 = vpack.c.bf16 %v1320_v53, %v1319_v51 }
 0x161   : > { %v1005_v58 = vmax.f32 %v874_v55, 0.0  ;;  %1491 = vmatmul.bf16.vlgmr.msra.gmra.mxu2 %v1383_v56 }
 0x162   : > { %v1164_v59 = vpop.f32.mrf.mxu1 }
 0x163   : > { %v1059_v60 = vpack.c.bf16 %v1005_v58, %v1004_v57  ;;  %v1165_v63 = vadd.f32 %v4535_v45, %v1164_v59 }
 0x165   : > { %1203 = vmatmul.bf16.gmra.mxu1 %v1059_v60  ;;  %v1321_v5 = vmax.f32 %v1165_v63, 0.0 }
 0x166   : > { %v876_v62 = vpop.f32.mrf.mxu0 }
 0x167   : > { %v877_v6 = vadd.f32 %v4474_v26, %v876_v62 }
 0x169   : > { %915 = vmatmul.bf16.gmra.mxu0 %v4037_v61  ;;  %v1006_v11 = vmax.f32 %v877_v6, 0.0 }
 0x16a   : > { %v1166_v2 = vpop.f32.mrf.mxu1 }
 0x16b   : > { %v1167_v4 = vadd.f32 %v4535_v45, %v1166_v2 }
 0x16d   : > { %v1322_v7 = vmax.f32 %v1167_v4, 0.0  ;;  %v3892_v4 = vld [vmem:[%s6122_s7 + $0x68] sm:$0xf0] }
 0x16e   : > { %v878_v8 = vpop.f32.mrf.mxu0  ;;  %v3895_v6 = vor.u32 %v4087_v3, %v3892_v4  ;;  %v4076_v3 = vld [vmem:[%s6122_s7 + $0x4] sm:$0xf0] }
 0x16f   : > { %v879_v9 = vadd.f32 %v4474_v26, %v878_v8  ;;  %v1384_v10 = vpack.c.bf16 %v1322_v7, %v1321_v5 }
 0x170   : > { %2020 = vmatpush.bf16.msrb.mxu0 %v3895_v6 }
 0x171   : > { %v1007_v12 = vmax.f32 %v879_v9, 0.0  ;;  %1496 = vmatmul.bf16.gmra.mxu2 %v1384_v10 }
 0x172   : > { %v1169_v13 = vpop.f32.mrf.mxu1 }
 0x173   : > { %v1060_v14 = vpack.c.bf16 %v1007_v12, %v1006_v11  ;;  %v1170_v17 = vadd.f32 %v4535_v45, %v1169_v13 }
 0x175   : > { %1208 = vmatmul.bf16.gmra.mxu1 %v1060_v14  ;;  %v1323_v20 = vmax.f32 %v1170_v17, 0.0  ;;  %v4090_v17 = vld [vmem:[%s6122_s7 + $0x74] sm:$0xf0] }
 0x176   : > { %v881_v16 = vpop.f32.mrf.mxu0 }
 0x177   : > { %v882_v21 = vadd.f32 %v4474_v26, %v881_v16  ;;  %v3898_v16 = vld [vmem:[%s6122_s7 + $0x70] sm:$0xf] }
 0x179   : > { %920 = vmatmul.bf16.gmra.mxu0 %v4038_v15  ;;  %v1008_v27 = vmax.f32 %v882_v21, 0.0  ;;  %v4042_v21 = vld [vmem:[%s4408_s14 + $0xb8] sm:$0xff] }
 0x17a   : > { %v1171_v18 = vpop.f32.mrf.mxu1 }
 0x17b   : > { %v1172_v19 = vadd.f32 %v4535_v45, %v1171_v18 }
 0x17d   : > { %v1324_v22 = vmax.f32 %v1172_v19, 0.0  ;;  %v3899_v19 = vor.u32 %v4090_v17, %v3898_v16 }
 0x17e   : > { %v883_v23 = vpop.f32.mrf.mxu0 }
 0x17f   : > { %v884_v24 = vadd.f32 %v4474_v26, %v883_v23  ;;  %v1385_v25 = vpack.c.bf16 %v1324_v22, %v1323_v20  ;;  %1850 = vmatpush.bf16.msra.mxu3 %v3899_v19  ;;  %v3890_v22 = vld [vmem:[%s6122_s7 + $0x60] sm:$0xf]  ;;  %v4088_v23 = vld [vmem:[%s6122_s7 + $0x64] sm:$0xf0] }
 0x181   : > { %v1009_v28 = vmax.f32 %v884_v24, 0.0  ;;  %1501 = vmatmul.bf16.gmra.mxu2 %v1385_v25  ;;  %v3891_v25 = vor.u32 %v4088_v23, %v3890_v22 }
 0x182   : > { %v1174_v30 = vpop.f32.mrf.mxu1 }
 0x183   : > { %v1061_v31 = vpack.c.bf16 %v1009_v28, %v1008_v27  ;;  %v1175_v34 = vadd.f32 %v4535_v45, %v1174_v30  ;;  %1851 = vmatpush.bf16.msra.mxu3 %v3891_v25  ;;  %v3882_v28 = vld [vmem:[%s6122_s7 + $0x50] sm:$0xf] }
 0x185   : > { %1213 = vmatmul.bf16.gmra.mxu1 %v1061_v31  ;;  %v1325_v38 = vmax.f32 %v1175_v34, 0.0  ;;  %v3883_v31 = vor.u32 %v4086_v29, %v3882_v28 }
 0x186   : > { %v886_v33 = vpop.f32.mrf.mxu0 }
 0x187   : > { %v887_v39 = vadd.f32 %v4474_v26, %v886_v33  ;;  %1852 = vmatpush.bf16.msra.mxu3 %v3883_v31 }
 0x189   : > { %925 = vmatmul.bf16.gmra.mxu0 %v4039_v32  ;;  %v1010_v44 = vmax.f32 %v887_v39, 0.0 }
 0x18a   : > { %v1176_v36 = vpop.f32.mrf.mxu1 }
 0x18b   : > { %v1177_v37 = vadd.f32 %v4535_v45, %v1176_v36  ;;  %v3874_v36 = vld [vmem:[%s6122_s7 + $0x40] sm:$0xf] }
 0x18d   : > { %v1326_v40 = vmax.f32 %v1177_v37, 0.0  ;;  %v4084_v37 = vld [vmem:[%s6122_s7 + $0x44] sm:$0xf0] }
 0x18e   : > { %v888_v41 = vpop.f32.mrf.mxu0  ;;  %v3875_v39 = vor.u32 %v4084_v37, %v3874_v36 }
 0x18f   : > { %v889_v42 = vadd.f32 %v4474_v26, %v888_v41  ;;  %v1386_v43 = vpack.c.bf16 %v1326_v40, %v1325_v38 }
 0x190   : > { %1853 = vmatpush.bf16.msra.mxu3 %v3875_v39 }
 0x191   : > { %v1011_v46 = vmax.f32 %v889_v42, 0.0  ;;  %1506 = vmatmul.bf16.gmra.mxu2 %v1386_v43 }
 0x192   : > { %v1179_v47 = vpop.f32.mrf.mxu1 }
 0x193   : > { %v1062_v48 = vpack.c.bf16 %v1011_v46, %v1010_v44  ;;  %v1180_v51 = vadd.f32 %v4535_v45, %v1179_v47  ;;  %v4096_v44 = vld [vmem:[%s6124_s9 + $0x28] sm:$0xff]  ;;  %v3866_v46 = vld [vmem:[%s6122_s7 + $0x30] sm:$0xf]  ;;  %v4082_v47 = vld [vmem:[%s6122_s7 + $0x34] sm:$0xf0] }
 0x194   : > { %2519 = vmatpush.bf16.msrb.mxu2 %v4096_v44 }
 0x195   : > { %1218 = vmatmul.bf16.gmra.mxu1 %v1062_v48  ;;  %v1327_v54 = vmax.f32 %v1180_v51, 0.0  ;;  %v4043_v51 = vld [vmem:[%s4408_s14 + $0xc0] sm:$0xff] }
 0x196   : > { %v891_v50 = vpop.f32.mrf.mxu0 }
 0x197   : > { %v892_v55 = vadd.f32 %v4474_v26, %v891_v50 }
 0x199   : > { %930 = vmatmul.bf16.gmra.mxu0 %v4040_v49  ;;  %v1012_v60 = vmax.f32 %v892_v55, 0.0  ;;  %v3867_v49 = vor.u32 %v4082_v47, %v3866_v46 }
 0x19a   : > { %v1181_v52 = vpop.f32.mrf.mxu1 }
 0x19b   : > { %v1182_v53 = vadd.f32 %v4535_v45, %v1181_v52  ;;  %1854 = vmatpush.bf16.msra.mxu3 %v3867_v49  ;;  %v3858_v52 = vld [vmem:[%s6122_s7 + $0x20] sm:$0xf] }
 0x19d   : > { %v1328_v56 = vmax.f32 %v1182_v53, 0.0  ;;  %v4080_v53 = vld [vmem:[%s6122_s7 + $0x24] sm:$0xf0] }
 0x19e   : > { %v893_v57 = vpop.f32.mrf.mxu0  ;;  %v3859_v55 = vor.u32 %v4080_v53, %v3858_v52 }
 0x19f   : > { %v894_v58 = vadd.f32 %v4474_v26, %v893_v57  ;;  %v1387_v59 = vpack.c.bf16 %v1328_v56, %v1327_v54  ;;  %v4104_v57 = vld [vmem:[%s6125_s10 + $0x28] sm:$0xff] }
 0x1a0   : > { %1855 = vmatpush.bf16.msra.mxu3 %v3859_v55  ;;  %2302 = vmatpush.bf16.msrb.mxu1 %v4104_v57  ;;  %v4046_v57 = vld [vmem:[%s4408_s14 + $0xd8] sm:$0xff] }
 0x1a1   : > { %v1013_v61 = vmax.f32 %v894_v58, 0.0  ;;  %1511 = vmatmul.bf16.gmra.mxu2 %v1387_v59  ;;  %v3850_v58 = vld [vmem:[%s6122_s7 + $0x10] sm:$0xf]  ;;  %v4078_v59 = vld [vmem:[%s6122_s7 + $0x14] sm:$0xf0] }
 0x1a2   : > { %v1184_v62 = vpop.f32.mrf.mxu1 }
 0x1a3   : > { %v1063_v63 = vpack.c.bf16 %v1013_v61, %v1012_v60  ;;  %v1185_v2 = vadd.f32 %v4535_v45, %v1184_v62  ;;  %v3851_v61 = vor.u32 %v4078_v59, %v3850_v58 }
 0x1a5   : > { %1223 = vmatmul.bf16.gmra.mxu1 %v1063_v63  ;;  %v1329_v8 = vmax.f32 %v1185_v2, 0.0  ;;  %1856 = vmatpush.bf16.msra.mxu3 %v3851_v61  ;;  %v3842_v2 = vld [vmem:[%s6122_s7] sm:$0xf] }
 0x1a6   : > { %v896_v1 = vpop.f32.mrf.mxu0 }
 0x1a7   : > { %v897_v9 = vadd.f32 %v4474_v26, %v896_v1 }
 0x1a9   : > { %935 = vmatmul.bf16.gmra.mxu0 %v4041_v0  ;;  %v1014_v14 = vmax.f32 %v897_v9, 0.0 }
 0x1aa   : > { %v1186_v5 = vpop.f32.mrf.mxu1 }
 0x1ab   : > { %v1187_v7 = vadd.f32 %v4535_v45, %v1186_v5  ;;  %v3843_v5 = vor.u32 %v4076_v3, %v3842_v2 }
 0x1ad   : > { %v1330_v10 = vmax.f32 %v1187_v7, 0.0  ;;  %1857 = vmatpush.bf16.msra.mxu3 %v3843_v5 }
 0x1ae   : > { %v898_v11 = vpop.f32.mrf.mxu0 }
 0x1af   : > { %v899_v12 = vadd.f32 %v4474_v26, %v898_v11  ;;  %v1388_v13 = vpack.c.bf16 %v1330_v10, %v1329_v8 }
 0x1b1   : > { %v1015_v15 = vmax.f32 %v899_v12, 0.0  ;;  %1516 = vmatmul.bf16.gmra.mxu2 %v1388_v13  ;;  %v4044_v12 = vld [vmem:[%s4408_s14 + $0xc8] sm:$0xff] }
 0x1b2   : > { %v1189_v18 = vpop.f32.mrf.mxu1 }
 0x1b3   : > { %v1064_v20 = vpack.c.bf16 %v1015_v15, %v1014_v14  ;;  %v1190_v27 = vadd.f32 %v4535_v45, %v1189_v18  ;;  %v4110_v14 = vld [vmem:[%s6127_s12 + $0x18] sm:$0xff] }
 0x1b4   : > { %2987 = vmatpush.bf16.msrb.mxu3 %v4110_v14 }
 0x1b5   : > { %1228 = vmatmul.bf16.gmra.mxu1 %v1064_v20  ;;  %v1331_v34 = vmax.f32 %v1190_v27, 0.0 }
 0x1b6   : > { %v901_v24 = vpop.f32.mrf.mxu0 }
 0x1b7   : > { %v902_v33 = vadd.f32 %v4474_v26, %v901_v24 }
 0x1b9   : > { %940 = vmatmul.bf16.gmra.mxu0 %v4042_v21  ;;  %v1016_v42 = vmax.f32 %v902_v33, 0.0 }
 0x1ba   : > { %v1191_v30 = vpop.f32.mrf.mxu1 }
 0x1bb   : > { %v1192_v32 = vadd.f32 %v4535_v45, %v1191_v30  ;;  %v4045_v30 = vld [vmem:[%s4408_s14 + $0xd0] sm:$0xff] }
 0x1bd   : > { %v1332_v35 = vmax.f32 %v1192_v32, 0.0  ;;  %v4661_v32 = vld [vmem:[%s6121_s6] ss:$0 sm:$0xff] }
 0x1be   : > { %v903_v38 = vpop.f32.mrf.mxu0 }
 0x1bf   : > { %v904_v40 = vadd.f32 %v4474_v26, %v903_v38  ;;  %v1389_v41 = vpack.c.bf16 %v1332_v35, %v1331_v34  ;;  %v4085_v34 = vld [vmem:[%s6122_s7 + $0x54] sm:$0xf]  ;;  %v3884_v35 = vld [vmem:[%s6122_s7 + $0x58] sm:$0xf0] }
 0x1c0   : > { %v3887_v37 = vor.u32 %v4085_v34, %v3884_v35 }
 0x1c1   : > { %v1017_v43 = vmax.f32 %v904_v40, 0.0  ;;  %1521 = vmatmul.bf16.gmra.mxu2 %v1389_v41 }
 0x1c2   : > { %v1194_v48 = vpop.f32.mrf.mxu1  ;;  %2021 = vmatpush.bf16.msrb.mxu0 %v3887_v37 }
 0x1c3   : > { %v1065_v50 = vpack.c.bf16 %v1017_v43, %v1016_v42  ;;  %v1195_v56 = vadd.f32 %v4535_v45, %v1194_v48 }
 0x1c5   : > { %1233 = vmatmul.bf16.gmra.mxu1 %v1065_v50  ;;  %v1333_v63 = vmax.f32 %v1195_v56, 0.0 }
 0x1c6   : > { %v906_v54 = vpop.f32.mrf.mxu0 }
 0x1c7   : > { %v907_v0 = vadd.f32 %v4474_v26, %v906_v54 }
 0x1c9   : > { %945 = vmatmul.bf16.gmra.mxu0 %v4043_v51  ;;  %v1018_v8 = vmax.f32 %v907_v0, 0.0 }
 0x1ca   : > { %v1196_v60 = vpop.f32.mrf.mxu1 }
 0x1cb   : > { %v1197_v62 = vadd.f32 %v4535_v45, %v1196_v60 }
 0x1cd   : > { %v1334_v1 = vmax.f32 %v1197_v62, 0.0 }
 0x1ce   : > { %v908_v4 = vpop.f32.mrf.mxu0 }
 0x1cf   : > { %v909_v6 = vadd.f32 %v4474_v26, %v908_v4  ;;  %v1390_v7 = vpack.c.bf16 %v1334_v1, %v1333_v63 }
 0x1d1   : > { %v1019_v9 = vmax.f32 %v909_v6, 0.0  ;;  %1526 = vmatmul.bf16.gmra.mxu2 %v1390_v7 }
 0x1d2   : > { %v1199_v10 = vpop.f32.mrf.mxu1 }
 0x1d3   : > { %v1066_v11 = vpack.c.bf16 %v1019_v9, %v1018_v8  ;;  %v1200_v15 = vadd.f32 %v4535_v45, %v1199_v10 }
 0x1d5   : > { %1238 = vmatmul.bf16.gmra.mxu1 %v1066_v11  ;;  %v1335_v18 = vmax.f32 %v1200_v15, 0.0 }
 0x1d6   : > { %v911_v13 = vpop.f32.mrf.mxu0 }
 0x1d7   : > { %v912_v19 = vadd.f32 %v4474_v26, %v911_v13 }
 0x1d9   : > { %950 = vmatmul.bf16.gmra.mxu0 %v4044_v12  ;;  %v1020_v24 = vmax.f32 %v912_v19, 0.0  ;;  %v4095_v12 = vld [vmem:[%s6124_s9 + $0x20] sm:$0xff] }
 0x1da   : > { %v1201_v16 = vpop.f32.mrf.mxu1  ;;  %2520 = vmatpush.bf16.msrb.mxu2 %v4095_v12  ;;  %v4103_v19 = vld [vmem:[%s6125_s10 + $0x20] sm:$0xff] }
 0x1db   : > { %v1202_v17 = vadd.f32 %v4535_v45, %v1201_v16  ;;  %v4047_v16 = vld [vmem:[%s4408_s14 + $0xe0] sm:$0xff]  ;;  %2303 = vmatpush.bf16.msrb.mxu1 %v4103_v19 }
 0x1dd   : > { %v1336_v20 = vmax.f32 %v1202_v17, 0.0 }
 0x1de   : > { %v913_v21 = vpop.f32.mrf.mxu0 }
 0x1df   : > { %v914_v22 = vadd.f32 %v4474_v26, %v913_v21  ;;  %v1391_v23 = vpack.c.bf16 %v1336_v20, %v1335_v18 }
 0x1e1   : > { %v1021_v25 = vmax.f32 %v914_v22, 0.0  ;;  %1531 = vmatmul.bf16.gmra.mxu2 %v1391_v23 }
 0x1e2   : > { %v1204_v27 = vpop.f32.mrf.mxu1 }
 0x1e3   : > { %v1067_v28 = vpack.c.bf16 %v1021_v25, %v1020_v24  ;;  %v1205_v33 = vadd.f32 %v4535_v45, %v1204_v27 }
 0x1e4   : > { %v1492_v29 = vpop.f32.mrf.mxu2 }
 0x1e5   : > { %1243 = vmatmul.bf16.gmra.mxu1 %v1067_v28  ;;  %v1493_v38 = vadd.f32 %v4661_v32, %v1492_v29  ;;  %v1337_v41 = vmax.f32 %v1205_v33, 0.0 }
 0x1e6   : > { %v916_v31 = vpop.f32.mrf.mxu0 }
 0x1e7   : > { %v917_v42 = vadd.f32 %v4474_v26, %v916_v31  ;;  %v1652_v47 = vmax.f32 %v1493_v38, 0.0 }
 0x1e9   : > { %955 = vmatmul.bf16.gmra.mxu0 %v4045_v30  ;;  %v1022_v51 = vmax.f32 %v917_v42, 0.0 }
 0x1ea   : > { %v1206_v36 = vpop.f32.mrf.mxu1 }
 0x1eb   : > { %v1207_v39 = vadd.f32 %v4535_v45, %v1206_v36 }
 0x1ec   : > { %v1494_v40 = vpop.f32.mrf.mxu2 }
 0x1ed   : > { %v1338_v43 = vmax.f32 %v1207_v39, 0.0  ;;  %v1495_v44 = vadd.f32 %v4661_v32, %v1494_v40  ;;  %v4083_v40 = vld [vmem:[%s6122_s7 + $0x44] sm:$0xf] }
 0x1ee   : > { %v918_v46 = vpop.f32.mrf.mxu0 }
 0x1ef   : > { %v1653_v48 = vmax.f32 %v1495_v44, 0.0  ;;  %v919_v49 = vadd.f32 %v4474_v26, %v918_v46  ;;  %v1392_v50 = vpack.c.bf16 %v1338_v43, %v1337_v41  ;;  %v3876_v41 = vld [vmem:[%s6122_s7 + $0x48] sm:$0xf0] }
 0x1f0   : > { %v3879_v43 = vor.u32 %v4083_v40, %v3876_v41  ;;  %v4048_v44 = vld [vmem:[%s4408_s14 + $0xe8] sm:$0xff] }
 0x1f1   : > { %v1023_v52 = vmax.f32 %v919_v49, 0.0  ;;  %1536 = vmatmul.bf16.gmra.mxu2 %v1392_v50  ;;  %v4675_v53 = vpack.c.bf16 %v1653_v48, %v1652_v47  ;;  %v4081_v47 = vld [vmem:[%s6122_s7 + $0x34] sm:$0xf]  ;;  %v3868_v48 = vld [vmem:[%s6122_s7 + $0x38] sm:$0xf0] }
 0x1f2   : > { %v1209_v54 = vpop.f32.mrf.mxu1  ;;  %2022 = vmatpush.bf16.msrb.mxu0 %v3879_v43  ;;  %v3871_v49 = vor.u32 %v4081_v47, %v3868_v48 }
 0x1f3   : > { %1858 = vmatmul.bf16.vlgmr.msra.gmra.mxu3 %v4675_v53  ;;  %v1068_v55 = vpack.c.bf16 %v1023_v52, %v1022_v51  ;;  %v1210_v59 = vadd.f32 %v4535_v45, %v1209_v54 }
 0x1f4   : > { %v1497_v56 = vpop.f32.mrf.mxu2 }
 0x1f5   : > { %1248 = vmatmul.bf16.gmra.mxu1 %v1068_v55  ;;  %v1498_v61 = vadd.f32 %v4661_v32, %v1497_v56  ;;  %v1339_v0 = vmax.f32 %v1210_v59, 0.0  ;;  %v4079_v55 = vld [vmem:[%s6122_s7 + $0x24] sm:$0xf]  ;;  %v3860_v56 = vld [vmem:[%s6122_s7 + $0x28] sm:$0xf0] }
 0x1f6   : > { %v921_v58 = vpop.f32.mrf.mxu0  ;;  %2023 = vmatpush.bf16.msrb.mxu0 %v3871_v49 }
 0x1f7   : > { %v922_v1 = vadd.f32 %v4474_v26, %v921_v58  ;;  %v1654_v5 = vmax.f32 %v1498_v61, 0.0  ;;  %v3863_v58 = vor.u32 %v4079_v55, %v3860_v56 }
 0x1f9   : > { %960 = vmatmul.bf16.gmra.mxu0 %v4046_v57  ;;  %v1024_v9 = vmax.f32 %v922_v1, 0.0 }
 0x1fa   : > { %v1211_v60 = vpop.f32.mrf.mxu1  ;;  %2024 = vmatpush.bf16.msrb.mxu0 %v3863_v58 }
 0x1fb   : > { %v1212_v62 = vadd.f32 %v4535_v45, %v1211_v60 }
 0x1fc   : > { %v1499_v63 = vpop.f32.mrf.mxu2 }
 0x1fd   : > { %v1340_v2 = vmax.f32 %v1212_v62, 0.0  ;;  %v1500_v3 = vadd.f32 %v4661_v32, %v1499_v63 }
 0x1fe   : > { %v923_v4 = vpop.f32.mrf.mxu0 }
 0x1ff   : > { %v1655_v6 = vmax.f32 %v1500_v3, 0.0  ;;  %v924_v7 = vadd.f32 %v4474_v26, %v923_v4  ;;  %v1393_v8 = vpack.c.bf16 %v1340_v2, %v1339_v0  ;;  %v4077_v4 = vld [vmem:[%s6122_s7 + $0x14] sm:$0xf] }
 0x201   : > { %v1025_v10 = vmax.f32 %v924_v7, 0.0  ;;  %1541 = vmatmul.bf16.gmra.mxu2 %v1393_v8  ;;  %v4685_v11 = vpack.c.bf16 %v1655_v6, %v1654_v5  ;;  %v3852_v5 = vld [vmem:[%s6122_s7 + $0x18] sm:$0xf0] }
 0x202   : > { %v1214_v13 = vpop.f32.mrf.mxu1  ;;  %v3855_v6 = vor.u32 %v4077_v4, %v3852_v5  ;;  %v4102_v4 = vld [vmem:[%s6125_s10 + $0x18] sm:$0xff] }
 0x203   : > { %1863 = vmatmul.bf16.gmra.mxu3 %v4685_v11  ;;  %v1069_v14 = vpack.c.bf16 %v1025_v10, %v1024_v9  ;;  %v1215_v18 = vadd.f32 %v4535_v45, %v1214_v13  ;;  %v4075_v13 = vld [vmem:[%s6122_s7 + $0x4] sm:$0xf]  ;;  %2304 = vmatpush.bf16.msrb.mxu1 %v4102_v4 }
 0x204   : > { %v1502_v15 = vpop.f32.mrf.mxu2  ;;  %2025 = vmatpush.bf16.msrb.mxu0 %v3855_v6 }
 0x205   : > { %1253 = vmatmul.bf16.gmra.mxu1 %v1069_v14  ;;  %v1503_v21 = vadd.f32 %v4661_v32, %v1502_v15  ;;  %v1341_v24 = vmax.f32 %v1215_v18, 0.0  ;;  %v3844_v14 = vld [vmem:[%s6122_s7 + $0x8] sm:$0xf0] }
 0x206   : > { %v926_v17 = vpop.f32.mrf.mxu0 }
 0x207   : > { %v927_v25 = vadd.f32 %v4474_v26, %v926_v17  ;;  %v1656_v30 = vmax.f32 %v1503_v21, 0.0  ;;  %v4049_v17 = vld [vmem:[%s4408_s14 + $0xf0] sm:$0xff] }
 0x209   : > { %965 = vmatmul.bf16.gmra.mxu0 %v4047_v16  ;;  %v1026_v35 = vmax.f32 %v927_v25, 0.0  ;;  %v3847_v16 = vor.u32 %v4075_v13, %v3844_v14 }
 0x20a   : > { %v1216_v20 = vpop.f32.mrf.mxu1 }
 0x20b   : > { %v1217_v22 = vadd.f32 %v4535_v45, %v1216_v20  ;;  %2026 = vmatpush.bf16.msrb.mxu0 %v3847_v16 }
 0x20c   : > { %v1504_v23 = vpop.f32.mrf.mxu2 }
 0x20d   : > { %v1342_v27 = vmax.f32 %v1217_v22, 0.0  ;;  %v1505_v28 = vadd.f32 %v4661_v32, %v1504_v23 }
 0x20e   : > { %v928_v29 = vpop.f32.mrf.mxu0 }
 0x20f   : > { %v1657_v31 = vmax.f32 %v1505_v28, 0.0  ;;  %v929_v33 = vadd.f32 %v4474_v26, %v928_v29  ;;  %v1394_v34 = vpack.c.bf16 %v1342_v27, %v1341_v24 }
 0x211   : > { %v1027_v36 = vmax.f32 %v929_v33, 0.0  ;;  %1546 = vmatmul.bf16.gmra.mxu2 %v1394_v34  ;;  %v4701_v37 = vpack.c.bf16 %v1657_v31, %v1656_v30 }
 0x212   : > { %v1219_v38 = vpop.f32.mrf.mxu1 }
 0x213   : > { %1868 = vmatmul.bf16.gmra.mxu3 %v4701_v37  ;;  %v1070_v39 = vpack.c.bf16 %v1027_v36, %v1026_v35  ;;  %v1220_v50 = vadd.f32 %v4535_v45, %v1219_v38 }
 0x214   : > { %v1507_v42 = vpop.f32.mrf.mxu2 }
 0x215   : > { %1258 = vmatmul.bf16.gmra.mxu1 %v1070_v39  ;;  %v1508_v52 = vadd.f32 %v4661_v32, %v1507_v42  ;;  %v1343_v59 = vmax.f32 %v1220_v50, 0.0  ;;  %v4050_v42 = vld [vmem:[%s4408_s14 + $0xf8] sm:$0xff] }
 0x216   : > { %v931_v46 = vpop.f32.mrf.mxu0 }
 0x217   : > { %v932_v60 = vadd.f32 %v4474_v26, %v931_v46  ;;  %v1658_v0 = vmax.f32 %v1508_v52, 0.0 }
 0x219   : > { %970 = vmatmul.bf16.gmra.mxu0 %v4048_v44  ;;  %v1028_v7 = vmax.f32 %v932_v60, 0.0 }
 0x21a   : > { %v1221_v51 = vpop.f32.mrf.mxu1 }
 0x21b   : > { %v1222_v54 = vadd.f32 %v4535_v45, %v1221_v51 }
 0x21c   : > { %v1509_v57 = vpop.f32.mrf.mxu2 }
 0x21d   : > { %v1344_v61 = vmax.f32 %v1222_v54, 0.0  ;;  %v1510_v62 = vadd.f32 %v4661_v32, %v1509_v57 }
 0x21e   : > { %v933_v63 = vpop.f32.mrf.mxu0 }
 0x21f   : > { %v1659_v1 = vmax.f32 %v1510_v62, 0.0  ;;  %v934_v2 = vadd.f32 %v4474_v26, %v933_v63  ;;  %v1395_v3 = vpack.c.bf16 %v1344_v61, %v1343_v59  ;;  %v4094_v63 = vld [vmem:[%s6124_s9 + $0x18] sm:$0xff] }
 0x220   : > { %2521 = vmatpush.bf16.msrb.mxu2 %v4094_v63 }
 0x221   : > { %v1029_v8 = vmax.f32 %v934_v2, 0.0  ;;  %1551 = vmatmul.bf16.gmra.mxu2 %v1395_v3  ;;  %v4735_v9 = vpack.c.bf16 %v1659_v1, %v1658_v0 }
 0x222   : > { %v1224_v10 = vpop.f32.mrf.mxu1 }
 0x223   : > { %1873 = vmatmul.bf16.gmra.mxu3 %v4735_v9  ;;  %v1071_v12 = vpack.c.bf16 %v1029_v8, %v1028_v7  ;;  %v1225_v19 = vadd.f32 %v4535_v45, %v1224_v10 }
 0x224   : > { %v1512_v15 = vpop.f32.mrf.mxu2 }
 0x225   : > { %1263 = vmatmul.bf16.gmra.mxu1 %v1071_v12  ;;  %v1513_v21 = vadd.f32 %v4661_v32, %v1512_v15  ;;  %v1345_v24 = vmax.f32 %v1225_v19, 0.0  ;;  %v4777_v12 = vld [vmem:[%s6117_s2] ss:$0 sm:$0xff] }
 0x226   : > { %v936_v18 = vpop.f32.mrf.mxu0 }
 0x227   : > { %v937_v25 = vadd.f32 %v4474_v26, %v936_v18  ;;  %v1660_v30 = vmax.f32 %v1513_v21, 0.0 }
 0x229   : > { %975 = vmatmul.bf16.gmra.mxu0 %v4049_v17  ;;  %v1030_v35 = vmax.f32 %v937_v25, 0.0 }
 0x22a   : > { %v1226_v20 = vpop.f32.mrf.mxu1 }
 0x22b   : > { %v1227_v22 = vadd.f32 %v4535_v45, %v1226_v20 }
 0x22c   : > { %v1514_v23 = vpop.f32.mrf.mxu2 }
 0x22d   : > { %v1346_v27 = vmax.f32 %v1227_v22, 0.0  ;;  %v1515_v28 = vadd.f32 %v4661_v32, %v1514_v23 }
 0x22e   : > { %v938_v29 = vpop.f32.mrf.mxu0 }
 0x22f   : > { %v1661_v31 = vmax.f32 %v1515_v28, 0.0  ;;  %v939_v33 = vadd.f32 %v4474_v26, %v938_v29  ;;  %v1396_v34 = vpack.c.bf16 %v1346_v27, %v1345_v24  ;;  %v4109_v28 = vld [vmem:[%s6127_s12 + $0x10] sm:$0xff] }
 0x230   : > { %2988 = vmatpush.bf16.msrb.mxu3 %v4109_v28 }
 0x231   : > { %v1031_v36 = vmax.f32 %v939_v33, 0.0  ;;  %1556 = vmatmul.bf16.gmra.mxu2 %v1396_v34  ;;  %v4751_v38 = vpack.c.bf16 %v1661_v31, %v1660_v30 }
 0x232   : > { %v1229_v39 = vpop.f32.mrf.mxu1 }
 0x233   : > { %1878 = vmatmul.bf16.gmra.mxu3 %v4751_v38  ;;  %v1072_v40 = vpack.c.bf16 %v1031_v36, %v1030_v35  ;;  %v1230_v44 = vadd.f32 %v4535_v45, %v1229_v39 }
 0x234   : > { %v1517_v41 = vpop.f32.mrf.mxu2 }
 0x235   : > { %1268 = vmatmul.bf16.gmra.mxu1 %v1072_v40  ;;  %v1518_v47 = vadd.f32 %v4661_v32, %v1517_v41  ;;  %v1347_v50 = vmax.f32 %v1230_v44, 0.0 }
 0x236   : > { %v941_v43 = vpop.f32.mrf.mxu0 }
 0x237   : > { %v942_v51 = vadd.f32 %v4474_v26, %v941_v43  ;;  %v1662_v56 = vmax.f32 %v1518_v47, 0.0 }
 0x239   : > { %980 = vmatmul.bf16.gmra.mxu0 %v4050_v42  ;;  %v1032_v60 = vmax.f32 %v942_v51, 0.0 }
 0x23a   : > { %v1231_v46 = vpop.f32.mrf.mxu1 }
 0x23b   : > { %v1232_v48 = vadd.f32 %v4535_v45, %v1231_v46 }
 0x23c   : > { %v1519_v49 = vpop.f32.mrf.mxu2 }
 0x23d   : > { %v1348_v52 = vmax.f32 %v1232_v48, 0.0  ;;  %v1520_v54 = vadd.f32 %v4661_v32, %v1519_v49 }
 0x23e   : > { %v943_v55 = vpop.f32.mrf.mxu0 }
 0x23f   : > { %v1663_v57 = vmax.f32 %v1520_v54, 0.0  ;;  %v944_v58 = vadd.f32 %v4474_v26, %v943_v55  ;;  %v1397_v59 = vpack.c.bf16 %v1348_v52, %v1347_v50 }
 0x241   : > { %v1033_v61 = vmax.f32 %v944_v58, 0.0  ;;  %1561 = vmatmul.bf16.gmra.mxu2 %v1397_v59  ;;  %v4761_v62 = vpack.c.bf16 %v1663_v57, %v1662_v56 }
 0x242   : > { %v1234_v0 = vpop.f32.mrf.mxu1 }
 0x243   : > { %1883 = vmatmul.bf16.gmra.mxu3 %v4761_v62  ;;  %v1073_v1 = vpack.c.bf16 %v1033_v61, %v1032_v60  ;;  %v1235_v26 = vadd.f32 %v4535_v45, %v1234_v0 }
 0x244   : > { %v1522_v2 = vpop.f32.mrf.mxu2 }
 0x245   : > { %1273 = vmatmul.bf16.gmra.mxu1 %v1073_v1  ;;  %v1523_v6 = vadd.f32 %v4661_v32, %v1522_v2  ;;  %v1349_v10 = vmax.f32 %v1235_v26, 0.0 }
 0x246   : > { %v946_v3 = vpop.f32.mrf.mxu0 }
 0x247   : > { %v947_v13 = vadd.f32 %v4777_v12, %v946_v3  ;;  %v1664_v16 = vmax.f32 %v1523_v6, 0.0 }
 0x249   : > { %2027 = vmatmul.bf16.vlgmr.msrb.gmra.mxu0 %v4675_v53  ;;  %v1034_v20 = vmax.f32 %v947_v13, 0.0 }
 0x24a   : > { %v1236_v5 = vpop.f32.mrf.mxu1 }
 0x24b   : > { %v1237_v7 = vadd.f32 %v4535_v45, %v1236_v5 }
 0x24c   : > { %v1524_v8 = vpop.f32.mrf.mxu2 }
 0x24d   : > { %v1350_v53 = vmax.f32 %v1237_v7, 0.0  ;;  %v1525_v14 = vadd.f32 %v4661_v32, %v1524_v8 }
 0x24e   : > { %v948_v15 = vpop.f32.mrf.mxu0 }
 0x24f   : > { %v1665_v17 = vmax.f32 %v1525_v14, 0.0  ;;  %v949_v18 = vadd.f32 %v4777_v12, %v948_v15  ;;  %v1398_v19 = vpack.c.bf16 %v1350_v53, %v1349_v10  ;;  %v4811_v53 = vld [vmem:[%s6123_s8] sm:$0x3] }
 0x251   : > { %v1035_v21 = vmax.f32 %v949_v18, 0.0  ;;  %1566 = vmatmul.bf16.gmra.mxu2 %v1398_v19  ;;  %v4782_v22 = vpack.c.bf16 %v1665_v17, %v1664_v16  ;;  %v4817_v16 = vperm.slane %v4811_v53, 0 }
 0x252   : > { %v1239_v23 = vpop.f32.mrf.mxu1 }
 0x253   : > { %1888 = vmatmul.bf16.gmra.mxu3 %v4782_v22  ;;  %v1074_v24 = vpack.c.bf16 %v1035_v21, %v1034_v20  ;;  %v1240_v29 = vadd.f32 %v4535_v45, %v1239_v23 }
 0x254   : > { %v1527_v25 = vpop.f32.mrf.mxu2 }
 0x255   : > { %1278 = vmatmul.bf16.gmra.mxu1 %v1074_v24  ;;  %v1528_v31 = vadd.f32 %v4661_v32, %v1527_v25  ;;  %v1351_v35 = vmax.f32 %v1240_v29, 0.0 }
 0x256   : > { %v951_v27 = vpop.f32.mrf.mxu0 }
 0x257   : > { %v952_v36 = vadd.f32 %v4777_v12, %v951_v27  ;;  %v1666_v42 = vmax.f32 %v1528_v31, 0.0 }
 0x259   : > { %2032 = vmatmul.bf16.gmra.mxu0 %v4685_v11  ;;  %v1036_v11 = vmax.f32 %v952_v36, 0.0 }
 0x25a   : > { %v1241_v30 = vpop.f32.mrf.mxu1 }
 0x25b   : > { %v1242_v33 = vadd.f32 %v4535_v45, %v1241_v30 }
 0x25c   : > { %v1529_v34 = vpop.f32.mrf.mxu2 }
 0x25d   : > { %v1352_v39 = vmax.f32 %v1242_v33, 0.0  ;;  %v1530_v40 = vadd.f32 %v4661_v32, %v1529_v34 }
 0x25e   : > { %v953_v41 = vpop.f32.mrf.mxu0 }
 0x25f   : > { %v1667_v43 = vmax.f32 %v1530_v40, 0.0  ;;  %v954_v44 = vadd.f32 %v4777_v12, %v953_v41  ;;  %v1399_v46 = vpack.c.bf16 %v1352_v39, %v1351_v35  ;;  %v4093_v39 = vld [vmem:[%s6124_s9 + $0x10] sm:$0xff] }
 0x260   : > { %2522 = vmatpush.bf16.msrb.mxu2 %v4093_v39 }
 0x261   : > { %v1037_v47 = vmax.f32 %v954_v44, 0.0  ;;  %1571 = vmatmul.bf16.gmra.mxu2 %v1399_v46  ;;  %v4795_v48 = vpack.c.bf16 %v1667_v43, %v1666_v42  ;;  %v4840_v46 = vld [vmem:[%s6119_s4] ss:$0 sm:$0xff] }
 0x262   : > { %v1244_v49 = vpop.f32.mrf.mxu1 }
 0x263   : > { %1893 = vmatmul.bf16.gmra.mxu3 %v4795_v48  ;;  %v1075_v50 = vpack.c.bf16 %v1037_v47, %v1036_v11  ;;  %v1245_v54 = vadd.f32 %v4535_v45, %v1244_v49  ;;  %v4101_v47 = vld [vmem:[%s6125_s10 + $0x10] sm:$0xff] }
 0x264   : > { %v1532_v51 = vpop.f32.mrf.mxu2  ;;  %2305 = vmatpush.bf16.msrb.mxu1 %v4101_v47 }
 0x265   : > { %1283 = vmatmul.bf16.gmra.mxu1 %v1075_v50  ;;  %v1533_v56 = vadd.f32 %v4661_v32, %v1532_v51  ;;  %v1353_v59 = vmax.f32 %v1245_v54, 0.0 }
 0x266   : > { %v956_v52 = vpop.f32.mrf.mxu0 }
 0x267   : > { %v957_v60 = vadd.f32 %v4777_v12, %v956_v52  ;;  %v1668_v1 = vmax.f32 %v1533_v56, 0.0 }
 0x269   : > { %2037 = vmatmul.bf16.gmra.mxu0 %v4701_v37  ;;  %v1038_v4 = vmax.f32 %v957_v60, 0.0 }
 0x26a   : > { %v1246_v55 = vpop.f32.mrf.mxu1 }
 0x26b   : > { %v1247_v57 = vadd.f32 %v4535_v45, %v1246_v55 }
 0x26c   : > { %v1534_v58 = vpop.f32.mrf.mxu2 }
 0x26d   : > { %v1354_v61 = vmax.f32 %v1247_v57, 0.0  ;;  %v1535_v63 = vadd.f32 %v4661_v32, %v1534_v58 }
 0x26e   : > { %v958_v0 = vpop.f32.mrf.mxu0 }
 0x26f   : > { %v1669_v2 = vmax.f32 %v1535_v63, 0.0  ;;  %v959_v3 = vadd.f32 %v4777_v12, %v958_v0  ;;  %v1400_v26 = vpack.c.bf16 %v1354_v61, %v1353_v59 }
 0x271   : > { %v1039_v37 = vmax.f32 %v959_v3, 0.0  ;;  %1576 = vmatmul.bf16.gmra.mxu2 %v1400_v26  ;;  %v4805_v5 = vpack.c.bf16 %v1669_v2, %v1668_v1 }
 0x272   : > { %v1249_v6 = vpop.f32.mrf.mxu1 }
 0x273   : > { %1898 = vmatmul.bf16.gmra.mxu3 %v4805_v5  ;;  %v1076_v7 = vpack.c.bf16 %v1039_v37, %v1038_v4  ;;  %v1250_v14 = vadd.f32 %v4535_v45, %v1249_v6 }
 0x274   : > { %v1537_v8 = vpop.f32.mrf.mxu2 }
 0x275   : > { %1288 = vmatmul.bf16.gmra.mxu1 %v1076_v7  ;;  %v1538_v15 = vadd.f32 %v4661_v32, %v1537_v8  ;;  %v1355_v20 = vmax.f32 %v1250_v14, 0.0 }
 0x276   : > { %v961_v10 = vpop.f32.mrf.mxu0  ;;  %v1859_v13 = vpop.f32.mrf.mxu3 }
 0x277   : > { %v962_v21 = vadd.f32 %v4777_v12, %v961_v10  ;;  %v1670_v25 = vmax.f32 %v1538_v15, 0.0  ;;  %v4823_v27 = vadd.f32 %v1859_v13, %v4817_v16 }
 0x279   : > { %2042 = vmatmul.bf16.gmra.mxu0 %v4735_v9  ;;  %v1040_v33 = vmax.f32 %v962_v21, 0.0 }
 0x27a   : > { %v1251_v17 = vpop.f32.mrf.mxu1 }
 0x27b   : > { %v1252_v18 = vadd.f32 %v4535_v45, %v1251_v17 }
 0x27c   : > { %v1539_v19 = vpop.f32.mrf.mxu2 }
 0x27d   : > { %v1356_v23 = vmax.f32 %v1252_v18, 0.0  ;;  %v1540_v24 = vadd.f32 %v4661_v32, %v1539_v19 }
 0x27e   : > { %v963_v9 = vpop.f32.mrf.mxu0  ;;  %v1861_v28 = vpop.f32.mrf.mxu3 }
 0x27f   : > { %v1671_v29 = vmax.f32 %v1540_v24, 0.0  ;;  %v964_v30 = vadd.f32 %v4777_v12, %v963_v9  ;;  %v4827_v31 = vadd.f32 %v1861_v28, %v4817_v16  ;;  %v1401_v45 = vpack.c.bf16 %v1356_v23, %v1355_v20 }
 0x281   : > { %v1041_v34 = vmax.f32 %v964_v30, 0.0  ;;  %v2188_v35 = vpack.c.bf16 %v4827_v31, %v4823_v27  ;;  %1581 = vmatmul.bf16.gmra.mxu2 %v1401_v45  ;;  %v4831_v36 = vpack.c.bf16 %v1671_v29, %v1670_v25  ;;  %v4167_v27 = vld [vmem:[%s4408_s14 + $0x30] sm:$0xff] }
 0x282   : > { %v1254_v40 = vpop.f32.mrf.mxu1 }
 0x283   : > { %1903 = vmatmul.bf16.gmra.mxu3 %v4831_v36  ;;  %v1077_v41 = vpack.c.bf16 %v1041_v34, %v1040_v33  ;;  %v1255_v11 = vadd.f32 %v4840_v46, %v1254_v40 }
 0x284   : > { %v1542_v42 = vpop.f32.mrf.mxu2 }
 0x285   : > { %1293 = vmatmul.bf16.gmra.mxu1 %v1077_v41  ;;  %v1543_v49 = vadd.f32 %v4661_v32, %v1542_v42  ;;  %v1357_v54 = vmax.f32 %v1255_v11, 0.0 }
 0x286   : > { %v966_v43 = vpop.f32.mrf.mxu0  ;;  %v1864_v44 = vpop.f32.mrf.mxu3 }
 0x287   : > { %v967_v55 = vadd.f32 %v4777_v12, %v966_v43  ;;  %v1672_v58 = vmax.f32 %v1543_v49, 0.0 }
 0x289   : > { %2047 = vmatmul.bf16.gmra.mxu0 %v4751_v38  ;;  %v4852_v38 = vadd.f32 %v1864_v44, %v4817_v16  ;;  %v1042_v2 = vmax.f32 %v967_v55, 0.0 }
 0x28a   : > { %v1256_v50 = vpop.f32.mrf.mxu1 }
 0x28b   : > { %v1257_v51 = vadd.f32 %v4840_v46, %v1256_v50 }
 0x28c   : > { %v1544_v52 = vpop.f32.mrf.mxu2 }
 0x28d   : > { %v1358_v56 = vmax.f32 %v1257_v51, 0.0  ;;  %v1545_v57 = vadd.f32 %v4661_v32, %v1544_v52 }
 0x28e   : > { %v968_v59 = vpop.f32.mrf.mxu0  ;;  %v1866_v60 = vpop.f32.mrf.mxu3 }
 0x28f   : > { %v1673_v61 = vmax.f32 %v1545_v57, 0.0  ;;  %v969_v63 = vadd.f32 %v4777_v12, %v968_v59  ;;  %v4856_v0 = vadd.f32 %v1866_v60, %v4817_v16  ;;  %v1402_v1 = vpack.c.bf16 %v1358_v56, %v1357_v54 }
 0x291   : > { %v1043_v3 = vmax.f32 %v969_v63, 0.0  ;;  %v2189_v26 = vpack.c.bf16 %v4856_v0, %v4852_v38  ;;  %1586 = vmatmul.bf16.gmra.mxu2 %v1402_v1  ;;  %v4860_v4 = vpack.c.bf16 %v1673_v61, %v1672_v58  ;;  %v4168_v38 = vld [vmem:[%s4408_s14 + $0x38] sm:$0xff] }
 0x292   : > { %v1259_v37 = vpop.f32.mrf.mxu1 }
 0x293   : > { %1908 = vmatmul.bf16.gmra.mxu3 %v4860_v4  ;;  %v1078_v6 = vpack.c.bf16 %v1043_v3, %v1042_v2  ;;  %v1260_v13 = vadd.f32 %v4840_v46, %v1259_v37 }
 0x294   : > { %v1547_v7 = vpop.f32.mrf.mxu2 }
 0x295   : > { %1298 = vmatmul.bf16.gmra.mxu1 %v1078_v6  ;;  %v1548_v14 = vadd.f32 %v4661_v32, %v1547_v7  ;;  %v1359_v19 = vmax.f32 %v1260_v13, 0.0 }
 0x296   : > { %v971_v8 = vpop.f32.mrf.mxu0  ;;  %v1869_v10 = vpop.f32.mrf.mxu3 }
 0x297   : > { %v972_v20 = vadd.f32 %v4777_v12, %v971_v8  ;;  %v1674_v24 = vmax.f32 %v1548_v14, 0.0  ;;  %v4870_v25 = vadd.f32 %v1869_v10, %v4817_v16 }
 0x299   : > { %2052 = vmatmul.bf16.gmra.mxu0 %v4761_v62  ;;  %v1044_v33 = vmax.f32 %v972_v20, 0.0 }
 0x29a   : > { %v1261_v15 = vpop.f32.mrf.mxu1 }
 0x29b   : > { %v1262_v17 = vadd.f32 %v4840_v46, %v1261_v15 }
 0x29c   : > { %v1549_v18 = vpop.f32.mrf.mxu2 }
 0x29d   : > { %v1360_v21 = vmax.f32 %v1262_v17, 0.0  ;;  %v1550_v23 = vadd.f32 %v4661_v32, %v1549_v18 }
 0x29e   : > { %v973_v9 = vpop.f32.mrf.mxu0  ;;  %v1871_v28 = vpop.f32.mrf.mxu3 }
 0x29f   : > { %v1675_v29 = vmax.f32 %v1550_v23, 0.0  ;;  %v974_v62 = vadd.f32 %v4777_v12, %v973_v9  ;;  %v4874_v30 = vadd.f32 %v1871_v28, %v4817_v16  ;;  %v1403_v45 = vpack.c.bf16 %v1360_v21, %v1359_v19 }
 0x2a1   : > { %v1045_v34 = vmax.f32 %v974_v62, 0.0  ;;  %v2190_v39 = vpack.c.bf16 %v4874_v30, %v4870_v25  ;;  %1591 = vmatmul.bf16.gmra.mxu2 %v1403_v45  ;;  %v4878_v40 = vpack.c.bf16 %v1675_v29, %v1674_v24  ;;  %v4169_v25 = vld [vmem:[%s4408_s14 + $0x40] sm:$0xff] }
 0x2a2   : > { %v1264_v41 = vpop.f32.mrf.mxu1 }
 0x2a3   : > { %1913 = vmatmul.bf16.gmra.mxu3 %v4878_v40  ;;  %v1079_v42 = vpack.c.bf16 %v1045_v34, %v1044_v33  ;;  %v1265_v47 = vadd.f32 %v4840_v46, %v1264_v41 }
 0x2a4   : > { %v1552_v43 = vpop.f32.mrf.mxu2 }
 0x2a5   : > { %1303 = vmatmul.bf16.gmra.mxu1 %v1079_v42  ;;  %v1553_v49 = vadd.f32 %v4661_v32, %v1552_v43  ;;  %v1361_v54 = vmax.f32 %v1265_v47, 0.0 }
 0x2a6   : > { %v976_v44 = vpop.f32.mrf.mxu0  ;;  %v1874_v11 = vpop.f32.mrf.mxu3 }
 0x2a7   : > { %v977_v55 = vadd.f32 %v4777_v12, %v976_v44  ;;  %v1676_v58 = vmax.f32 %v1553_v49, 0.0  ;;  %v4888_v59 = vadd.f32 %v1874_v11, %v4817_v16  ;;  %v4092_v49 = vld [vmem:[%s6124_s9 + $0x8] sm:$0xff] }
 0x2a8   : > { %2523 = vmatpush.bf16.msrb.mxu2 %v4092_v49 }
 0x2a9   : > { %2057 = vmatmul.bf16.gmra.mxu0 %v4782_v22  ;;  %v1046_v3 = vmax.f32 %v977_v55, 0.0 }
 0x2aa   : > { %v1266_v50 = vpop.f32.mrf.mxu1 }
 0x2ab   : > { %v1267_v51 = vadd.f32 %v4840_v46, %v1266_v50 }
 0x2ac   : > { %v1554_v52 = vpop.f32.mrf.mxu2 }
 0x2ad   : > { %v1362_v56 = vmax.f32 %v1267_v51, 0.0  ;;  %v1555_v57 = vadd.f32 %v4661_v32, %v1554_v52  ;;  %v4921_v51 = vperm.slane %v4811_v53, 1 }
 0x2ae   : > { %v978_v60 = vpop.f32.mrf.mxu0  ;;  %v1876_v61 = vpop.f32.mrf.mxu3 }
 0x2af   : > { %v1677_v63 = vmax.f32 %v1555_v57, 0.0  ;;  %v979_v22 = vadd.f32 %v4777_v12, %v978_v60  ;;  %v4892_v1 = vadd.f32 %v1876_v61, %v4817_v16  ;;  %v1404_v2 = vpack.c.bf16 %v1362_v56, %v1361_v54  ;;  %v4100_v57 = vld [vmem:[%s6125_s10 + $0x8] sm:$0xff] }
 0x2b0   : > { %2306 = vmatpush.bf16.msrb.mxu1 %v4100_v57 }
 0x2b1   : > { %v1047_v37 = vmax.f32 %v979_v22, 0.0  ;;  %v2191_v6 = vpack.c.bf16 %v4892_v1, %v4888_v59  ;;  %1596 = vmatmul.bf16.gmra.mxu2 %v1404_v2  ;;  %v4896_v7 = vpack.c.bf16 %v1677_v63, %v1676_v58  ;;  %v4170_v59 = vld [vmem:[%s4408_s14 + $0x48] sm:$0xff] }
 0x2b2   : > { %v1269_v8 = vpop.f32.mrf.mxu1 }
 0x2b3   : > { %1918 = vmatmul.bf16.gmra.mxu3 %v4896_v7  ;;  %v1080_v10 = vpack.c.bf16 %v1047_v37, %v1046_v3  ;;  %v1270_v17 = vadd.f32 %v4840_v46, %v1269_v8 }
 0x2b4   : > { %v1557_v13 = vpop.f32.mrf.mxu2 }
 0x2b5   : > { %1308 = vmatmul.bf16.gmra.mxu1 %v1080_v10  ;;  %v1558_v18 = vadd.f32 %v4661_v32, %v1557_v13  ;;  %v1363_v23 = vmax.f32 %v1270_v17, 0.0 }
 0x2b6   : > { %v981_v14 = vpop.f32.mrf.mxu0  ;;  %v1879_v15 = vpop.f32.mrf.mxu3 }
 0x2b7   : > { %v982_v24 = vadd.f32 %v4777_v12, %v981_v14  ;;  %v1678_v29 = vmax.f32 %v1558_v18, 0.0  ;;  %v4906_v62 = vadd.f32 %v1879_v15, %v4817_v16 }
 0x2b9   : > { %2062 = vmatmul.bf16.gmra.mxu0 %v4795_v48  ;;  %v1048_v43 = vmax.f32 %v982_v24, 0.0 }
 0x2ba   : > { %v1271_v19 = vpop.f32.mrf.mxu1 }
 0x2bb   : > { %v1272_v20 = vadd.f32 %v4840_v46, %v1271_v19 }
 0x2bc   : > { %v1559_v21 = vpop.f32.mrf.mxu2 }
 0x2bd   : > { %v1364_v9 = vmax.f32 %v1272_v20, 0.0  ;;  %v1560_v28 = vadd.f32 %v4661_v32, %v1559_v21 }
 0x2be   : > { %v983_v45 = vpop.f32.mrf.mxu0  ;;  %v1881_v33 = vpop.f32.mrf.mxu3 }
 0x2bf   : > { %v1679_v34 = vmax.f32 %v1560_v28, 0.0  ;;  %v984_v48 = vadd.f32 %v4777_v12, %v983_v45  ;;  %v4910_v41 = vadd.f32 %v1881_v33, %v4817_v16  ;;  %v1405_v42 = vpack.c.bf16 %v1364_v9, %v1363_v23  ;;  %v4108_v28 = vld [vmem:[%s6127_s12 + $0x8] sm:$0xff] }
 0x2c0   : > { %2989 = vmatpush.bf16.msrb.mxu3 %v4108_v28 }
 0x2c1   : > { %v1049_v44 = vmax.f32 %v984_v48, 0.0  ;;  %v2192_v11 = vpack.c.bf16 %v4910_v41, %v4906_v62  ;;  %1601 = vmatmul.bf16.gmra.mxu2 %v1405_v42  ;;  %v4914_v47 = vpack.c.bf16 %v1679_v34, %v1678_v29  ;;  %v4171_v62 = vld [vmem:[%s4408_s14 + $0x50] sm:$0xff] }
 0x2c2   : > { %v1274_v50 = vpop.f32.mrf.mxu1 }
 0x2c3   : > { %1923 = vmatmul.bf16.gmra.mxu3 %v4914_v47  ;;  %v1081_v12 = vpack.c.bf16 %v1049_v44, %v1048_v43  ;;  %v1275_v58 = vadd.f32 %v4840_v46, %v1274_v50 }
 0x2c4   : > { %v1562_v52 = vpop.f32.mrf.mxu2 }
 0x2c5   : > { %1313 = vmatmul.bf16.gmra.mxu1 %v1081_v12  ;;  %v1563_v53 = vadd.f32 %v4661_v32, %v1562_v52  ;;  %v1365_v22 = vmax.f32 %v1275_v58, 0.0 }
 0x2c6   : > { %v1884_v54 = vpop.f32.mrf.mxu3  ;;  %v2028_v55 = vpop.f32.mrf.mxu0 }
 0x2c7   : > { %v2029_v56 = vadd.f32 %v2028_v55, %v4921_v51  ;;  %v1680_v37 = vmax.f32 %v1563_v53, 0.0  ;;  %v4934_v8 = vadd.f32 %v1884_v54, %v4817_v16 }
 0x2c9   : > { %2067 = vmatmul.bf16.gmra.mxu0 %v4805_v5  ;;  %3281 = vrot.lane.b32.xlu0 %v2029_v56, %s4263_s17 }
 0x2ca   : > { %v1276_v60 = vpop.f32.mrf.mxu1 }
 0x2cb   : > { %v1277_v61 = vadd.f32 %v4840_v46, %v1276_v60 }
 0x2cc   : > { %v1564_v63 = vpop.f32.mrf.mxu2 }
 0x2cd   : > { %v1366_v2 = vmax.f32 %v1277_v61, 0.0  ;;  %v1565_v3 = vadd.f32 %v4661_v32, %v1564_v63 }
 0x2ce   : > { %v1886_v10 = vpop.f32.mrf.mxu3  ;;  %v2030_v5 = vpop.f32.mrf.mxu0 }
 0x2cf   : > { %v1681_v13 = vmax.f32 %v1565_v3, 0.0  ;;  %v4937_v14 = vadd.f32 %v1886_v10, %v4817_v16  ;;  %v2031_v15 = vadd.f32 %v2030_v5, %v4921_v51  ;;  %v1406_v17 = vpack.c.bf16 %v1366_v2, %v1365_v22 }
 0x2d1   : > { %v2193_v18 = vpack.c.bf16 %v4937_v14, %v4934_v8  ;;  %1606 = vmatmul.bf16.gmra.mxu2 %v1406_v17  ;;  %3283 = vrot.lane.b32.xlu0 %v2031_v15, %s4263_s17  ;;  %v4943_v19 = vpack.c.bf16 %v1681_v13, %v1680_v37  ;;  %v4172_v14 = vld [vmem:[%s4408_s14 + $0x58] sm:$0xff] }
 0x2d2   : > { %v1279_v20 = vpop.f32.mrf.mxu1 }
 0x2d3   : > { %1928 = vmatmul.bf16.gmra.mxu3 %v4943_v19  ;;  %v1280_v29 = vadd.f32 %v4840_v46, %v1279_v20 }
 0x2d4   : > { %v1567_v21 = vpop.f32.mrf.mxu2 }
 0x2d5   : > { %v1568_v45 = vadd.f32 %v4661_v32, %v1567_v21  ;;  %v1367_v42 = vmax.f32 %v1280_v29, 0.0 }
 0x2d6   : > { %v1889_v23 = vpop.f32.mrf.mxu3  ;;  %v2033_v24 = vpop.f32.mrf.mxu0 }
 0x2d7   : > { %v2034_v9 = vadd.f32 %v2033_v24, %v4921_v51  ;;  %v1682_v49 = vmax.f32 %v1568_v45, 0.0  ;;  %v4957_v50 = vadd.f32 %v1889_v23, %v4817_v16 }
 0x2d9   : > { %2072 = vmatmul.bf16.gmra.mxu0 %v4831_v36  ;;  %3285 = vrot.lane.b32.xlu1 %v2034_v9, %s4263_s17 }
 0x2da   : > { %v1281_v33 = vpop.f32.mrf.mxu1 }
 0x2db   : > { %v1282_v34 = vadd.f32 %v4840_v46, %v1281_v33 }
 0x2dc   : > { %v1569_v48 = vpop.f32.mrf.mxu2 }
 0x2dd   : > { %v1368_v43 = vmax.f32 %v1282_v34, 0.0  ;;  %v1570_v44 = vadd.f32 %v4661_v32, %v1569_v48 }
 0x2de   : > { %v1891_v12 = vpop.f32.mrf.mxu3  ;;  %v2035_v52 = vpop.f32.mrf.mxu0 }
 0x2df   : > { %v1683_v36 = vmax.f32 %v1570_v44, 0.0  ;;  %v4960_v54 = vadd.f32 %v1891_v12, %v4817_v16  ;;  %v2036_v55 = vadd.f32 %v2035_v52, %v4921_v51  ;;  %v1407_v56 = vpack.c.bf16 %v1368_v43, %v1367_v42 }
 0x2e1   : > { %v2194_v57 = vpack.c.bf16 %v4960_v54, %v4957_v50  ;;  %1611 = vmatmul.bf16.gmra.mxu2 %v1407_v56  ;;  %3287 = vrot.lane.b32.xlu1 %v2036_v55, %s4263_s17  ;;  %v4966_v58 = vpack.c.bf16 %v1683_v36, %v1682_v49  ;;  %v4996_v49 = vld [vmem:[%s6121_s6] ss:$0 sm:$0xff] }
 0x2e2   : > { %v1284_v53 = vpop.f32.mrf.mxu1  ;;  %v4173_v54 = vld [vmem:[%s4408_s14 + $0x60] sm:$0xff] }
 0x2e3   : > { %1933 = vmatmul.bf16.gmra.mxu3 %v4966_v58  ;;  %v1285_v2 = vadd.f32 %v4840_v46, %v1284_v53 }
 0x2e4   : > { %v1572_v60 = vpop.f32.mrf.mxu2 }
 0x2e5   : > { %v1573_v3 = vadd.f32 %v4661_v32, %v1572_v60  ;;  %v1369_v13 = vmax.f32 %v1285_v2, 0.0 }
 0x2e6   : > { %v1894_v61 = vpop.f32.mrf.mxu3  ;;  %v2038_v63 = vpop.f32.mrf.mxu0 }
 0x2e7   : > { %v2039_v22 = vadd.f32 %v2038_v63, %v4921_v51  ;;  %v1684_v20 = vmax.f32 %v1573_v3, 0.0  ;;  %v4977_v21 = vadd.f32 %v1894_v61, %v4817_v16 }
 0x2e9   : > { %2077 = vmatmul.bf16.gmra.mxu0 %v4860_v4  ;;  %3289 = vrot.lane.b32.xlu2 %v2039_v22, %s4263_s17 }
 0x2ea   : > { %v1286_v37 = vpop.f32.mrf.mxu1 }
 0x2eb   : > { %v1287_v10 = vadd.f32 %v4840_v46, %v1286_v37 }
 0x2ec   : > { %v1574_v5 = vpop.f32.mrf.mxu2 }
 0x2ed   : > { %v1370_v15 = vmax.f32 %v1287_v10, 0.0  ;;  %v1575_v17 = vadd.f32 %v4661_v32, %v1574_v5 }
 0x2ee   : > { %v1896_v23 = vpop.f32.mrf.mxu3  ;;  %v2040_v24 = vpop.f32.mrf.mxu0 }
 0x2ef   : > { %v1685_v9 = vmax.f32 %v1575_v17, 0.0  ;;  %v4980_v4 = vadd.f32 %v1896_v23, %v4817_v16  ;;  %v2041_v28 = vadd.f32 %v2040_v24, %v4921_v51  ;;  %v1408_v29 = vpack.c.bf16 %v1370_v15, %v1369_v13  ;;  %v4091_v15 = vld [vmem:[%s6124_s9] sm:$0xff] }
 0x2f0   : > { %2524 = vmatpush.bf16.msrb.mxu2 %v4091_v15 }
 0x2f1   : > { %v2195_v45 = vpack.c.bf16 %v4980_v4, %v4977_v21  ;;  %1616 = vmatmul.bf16.gmra.mxu2 %v1408_v29  ;;  %3291 = vrot.lane.b32.xlu2 %v2041_v28, %s4263_s17  ;;  %v4986_v32 = vpack.c.bf16 %v1685_v9, %v1684_v20  ;;  %v4099_v28 = vld [vmem:[%s6125_s10] sm:$0xff] }
 0x2f2   : > { %v1289_v33 = vpop.f32.mrf.mxu1  ;;  %2307 = vmatpush.bf16.msrb.mxu1 %v4099_v28 }
 0x2f3   : > { %1938 = vmatmul.bf16.gmra.mxu3 %v4986_v32  ;;  %v1290_v44 = vadd.f32 %v4840_v46, %v1289_v33 }
 0x2f4   : > { %v1577_v34 = vpop.f32.mrf.mxu2 }
 0x2f5   : > { %v1578_v12 = vadd.f32 %v4996_v49, %v1577_v34  ;;  %v1371_v56 = vmax.f32 %v1290_v44, 0.0 }
 0x2f6   : > { %v1899_v48 = vpop.f32.mrf.mxu3  ;;  %v2043_v42 = vpop.f32.mrf.mxu0 }
 0x2f7   : > { %v2044_v43 = vadd.f32 %v2043_v42, %v4921_v51  ;;  %v1686_v61 = vmax.f32 %v1578_v12, 0.0 }
 0x2f9   : > { %2082 = vmatmul.bf16.gmra.mxu0 %v4878_v40  ;;  %3293 = vrot.lane.b32.xlu0 %v2044_v43, %s4263_s17  ;;  %v5002_v40 = vadd.f32 %v1899_v48, %v4817_v16 }
 0x2fa   : > { %v1291_v52 = vpop.f32.mrf.mxu1 }
 0x2fb   : > { %v1292_v36 = vadd.f32 %v4840_v46, %v1291_v52  ;;  %v4161_v52 = vld [vmem:[%s4408_s14] sm:$0xff] }
 0x2fc   : > { %v1579_v55 = vpop.f32.mrf.mxu2  ;;  %2308 = vmatmul.bf16.vlgmr.msrb.gmra.mxu1 %v4161_v52 }
 0x2fd   : > { %v1372_v53 = vmax.f32 %v1292_v36, 0.0  ;;  %v1580_v60 = vadd.f32 %v4996_v49, %v1579_v55 }
 0x2fe   : > { %v1901_v63 = vpop.f32.mrf.mxu3  ;;  %v2045_v22 = vpop.f32.mrf.mxu0 }
 0x2ff   : > { %v1687_v2 = vmax.f32 %v1580_v60, 0.0  ;;  %v5005_v3 = vadd.f32 %v1901_v63, %v4817_v16  ;;  %v2046_v37 = vadd.f32 %v2045_v22, %v4921_v51  ;;  %v1409_v10 = vpack.c.bf16 %v1372_v53, %v1371_v56 }
 0x301   : > { %v2196_v5 = vpack.c.bf16 %v5005_v3, %v5002_v40  ;;  %1621 = vmatmul.bf16.gmra.mxu2 %v1409_v10  ;;  %3295 = vrot.lane.b32.xlu1 %v2046_v37, %s4263_s17  ;;  %v5011_v13 = vpack.c.bf16 %v1687_v2, %v1686_v61 }
 0x302   : > { %v1294_v17 = vpop.f32.mrf.mxu1 }
 0x303   : > { %1943 = vmatmul.bf16.gmra.mxu3 %v5011_v13  ;;  %v1295_v29 = vadd.f32 %v4840_v46, %v1294_v17 }
 0x304   : > { %v1582_v20 = vpop.f32.mrf.mxu2 }
 0x305   : > { %v1583_v33 = vadd.f32 %v4996_v49, %v1582_v20  ;;  %v1373_v43 = vmax.f32 %v1295_v29, 0.0 }
 0x306   : > { %v1904_v23 = vpop.f32.mrf.mxu3  ;;  %v2048_v24 = vpop.f32.mrf.mxu0 }
 0x307   : > { %v2049_v9 = vadd.f32 %v2048_v24, %v4921_v51  ;;  %v1688_v36 = vmax.f32 %v1583_v33, 0.0  ;;  %v5029_v55 = vadd.f32 %v1904_v23, %v4817_v16 }
 0x309   : > { %2087 = vmatmul.bf16.gmra.mxu0 %v4896_v7  ;;  %3297 = vrot.lane.b32.xlu2 %v2049_v9, %s4263_s17 }
 0x30a   : > { %v1296_v34 = vpop.f32.mrf.mxu1 }
 0x30b   : > { %v1297_v48 = vadd.f32 %v4840_v46, %v1296_v34 }
 0x30c   : > { %v1584_v42 = vpop.f32.mrf.mxu2 }
 0x30d   : > { %v1374_v44 = vmax.f32 %v1297_v48, 0.0  ;;  %v1585_v12 = vadd.f32 %v4996_v49, %v1584_v42  ;;  %v4162_v42 = vld [vmem:[%s4408_s14 + $0x8] sm:$0xff] }
 0x30e   : > { %v1906_v7 = vpop.f32.mrf.mxu3  ;;  %v2050_v56 = vpop.f32.mrf.mxu0  ;;  %2313 = vmatmul.bf16.gmra.mxu1 %v4162_v42 }
 0x30f   : > { %v1689_v53 = vmax.f32 %v1585_v12, 0.0  ;;  %v5032_v60 = vadd.f32 %v1906_v7, %v4817_v16  ;;  %v2051_v61 = vadd.f32 %v2050_v56, %v4921_v51  ;;  %v1410_v63 = vpack.c.bf16 %v1374_v44, %v1373_v43 }
 0x311   : > { %v2197_v22 = vpack.c.bf16 %v5032_v60, %v5029_v55  ;;  %1626 = vmatmul.bf16.gmra.mxu2 %v1410_v63  ;;  %3299 = vrot.lane.b32.xlu0 %v2051_v61, %s4263_s17  ;;  %v5038_v2 = vpack.c.bf16 %v1689_v53, %v1688_v36 }
 0x312   : > { %v1299_v37 = vpop.f32.mrf.mxu1 }
 0x313   : > { %1948 = vmatmul.bf16.gmra.mxu3 %v5038_v2  ;;  %v1300_v23 = vadd.f32 %v4840_v46, %v1299_v37 }
 0x314   : > { %v1587_v10 = vpop.f32.mrf.mxu2 }
 0x315   : > { %v1588_v24 = vadd.f32 %v4996_v49, %v1587_v10  ;;  %v1375_v33 = vmax.f32 %v1300_v23, 0.0 }
 0x316   : > { %v1909_v15 = vpop.f32.mrf.mxu3  ;;  %v2053_v17 = vpop.f32.mrf.mxu0 }
 0x317   : > { %v2054_v20 = vadd.f32 %v2053_v17, %v4921_v51  ;;  %v1690_v43 = vmax.f32 %v1588_v24, 0.0  ;;  %v5050_v44 = vadd.f32 %v1909_v15, %v4817_v16 }
 0x319   : > { %2092 = vmatmul.bf16.gmra.mxu0 %v4914_v47  ;;  %3301 = vrot.lane.b32.xlu1 %v2054_v20, %s4263_s17 }
 0x31a   : > { %v1301_v9 = vpop.f32.mrf.mxu1 }
 0x31b   : > { %v1302_v28 = vadd.f32 %v4840_v46, %v1301_v9 }
 0x31c   : > { %v1589_v29 = vpop.f32.mrf.mxu2 }
 0x31d   : > { %v1376_v34 = vmax.f32 %v1302_v28, 0.0  ;;  %v1590_v48 = vadd.f32 %v4996_v49, %v1589_v29 }
 0x31e   : > { %v1911_v12 = vpop.f32.mrf.mxu3  ;;  %v2055_v47 = vpop.f32.mrf.mxu0 }
 0x31f   : > { %v1691_v52 = vmax.f32 %v1590_v48, 0.0  ;;  %v5053_v36 = vadd.f32 %v1911_v12, %v4817_v16  ;;  %v2056_v7 = vadd.f32 %v2055_v47, %v4921_v51  ;;  %v1411_v56 = vpack.c.bf16 %v1376_v34, %v1375_v33  ;;  %v4163_v48 = vld [vmem:[%s4408_s14 + $0x10] sm:$0xff] }
 0x320   : > { %2318 = vmatmul.bf16.gmra.mxu1 %v4163_v48 }
 0x321   : > { %v2198_v53 = vpack.c.bf16 %v5053_v36, %v5050_v44  ;;  %1631 = vmatmul.bf16.gmra.mxu2 %v1411_v56  ;;  %3303 = vrot.lane.b32.xlu2 %v2056_v7, %s4263_s17  ;;  %v5059_v61 = vpack.c.bf16 %v1691_v52, %v1690_v43 }
 0x322   : > { %v1304_v63 = vpop.f32.mrf.mxu1 }
 0x323   : > { %1953 = vmatmul.bf16.gmra.mxu3 %v5059_v61  ;;  %v1305_v20 = vadd.f32 %v4840_v46, %v1304_v63 }
 0x324   : > { %v1592_v37 = vpop.f32.mrf.mxu2 }
 0x325   : > { %v1593_v23 = vadd.f32 %v4996_v49, %v1592_v37  ;;  %v1377_v29 = vmax.f32 %v1305_v20, 0.0 }
 0x326   : > { %v1914_v10 = vpop.f32.mrf.mxu3  ;;  %v2058_v15 = vpop.f32.mrf.mxu0 }
 0x327   : > { %v2059_v17 = vadd.f32 %v2058_v15, %v4921_v51  ;;  %v1692_v42 = vmax.f32 %v1593_v23, 0.0  ;;  %v5071_v43 = vadd.f32 %v1914_v10, %v4817_v16 }
 0x329   : > { %2097 = vmatmul.bf16.gmra.mxu0 %v4943_v19  ;;  %3305 = vrot.lane.b32.xlu0 %v2059_v17, %s4263_s17 }
 0x32a   : > { %v1306_v24 = vpop.f32.mrf.mxu1 }
 0x32b   : > { %v1307_v9 = vadd.f32 %v4840_v46, %v1306_v24 }
 0x32c   : > { %v1594_v28 = vpop.f32.mrf.mxu2 }
 0x32d   : > { %v1378_v33 = vmax.f32 %v1307_v9, 0.0  ;;  %v1595_v34 = vadd.f32 %v4996_v49, %v1594_v28 }
 0x32e   : > { %v1916_v12 = vpop.f32.mrf.mxu3  ;;  %v2060_v19 = vpop.f32.mrf.mxu0 }
 0x32f   : > { %v1693_v47 = vmax.f32 %v1595_v34, 0.0  ;;  %v5074_v52 = vadd.f32 %v1916_v12, %v4817_v16  ;;  %v2061_v7 = vadd.f32 %v2060_v19, %v4921_v51  ;;  %v1412_v56 = vpack.c.bf16 %v1378_v33, %v1377_v29  ;;  %v4164_v12 = vld [vmem:[%s4408_s14 + $0x18] sm:$0xff] }
 0x330   : > { %2323 = vmatmul.bf16.gmra.mxu1 %v4164_v12 }
 0x331   : > { %v2199_v63 = vpack.c.bf16 %v5074_v52, %v5071_v43  ;;  %1636 = vmatmul.bf16.gmra.mxu2 %v1412_v56  ;;  %3307 = vrot.lane.b32.xlu1 %v2061_v7, %s4263_s17  ;;  %v5080_v37 = vpack.c.bf16 %v1693_v47, %v1692_v42 }
 0x332   : > { %v1309_v15 = vpop.f32.mrf.mxu1 }
 0x333   : > { %1958 = vmatmul.bf16.gmra.mxu3 %v5080_v37  ;;  %v1310_v24 = vadd.f32 %v4840_v46, %v1309_v15 }
 0x334   : > { %v1597_v10 = vpop.f32.mrf.mxu2 }
 0x335   : > { %v1598_v9 = vadd.f32 %v4996_v49, %v1597_v10  ;;  %v1379_v34 = vmax.f32 %v1310_v24, 0.0 }
 0x336   : > { %v1919_v17 = vpop.f32.mrf.mxu3  ;;  %v2063_v20 = vpop.f32.mrf.mxu0 }
 0x337   : > { %v2064_v23 = vadd.f32 %v2063_v20, %v4921_v51  ;;  %v1694_v19 = vmax.f32 %v1598_v9, 0.0  ;;  %v5092_v47 = vadd.f32 %v1919_v17, %v4817_v16 }
 0x339   : > { %2102 = vmatmul.bf16.gmra.mxu0 %v4966_v58  ;;  %3309 = vrot.lane.b32.xlu2 %v2064_v23, %s4263_s17 }
 0x33a   : > { %v1311_v28 = vpop.f32.mrf.mxu1 }
 0x33b   : > { %v1312_v29 = vadd.f32 %v4840_v46, %v1311_v28 }
 0x33c   : > { %v1599_v33 = vpop.f32.mrf.mxu2 }
 0x33d   : > { %v1380_v48 = vmax.f32 %v1312_v29, 0.0  ;;  %v1600_v42 = vadd.f32 %v4996_v49, %v1599_v33 }
 0x33e   : > { %v1921_v7 = vpop.f32.mrf.mxu3  ;;  %v2065_v58 = vpop.f32.mrf.mxu0 }
 0x33f   : > { %v1695_v56 = vmax.f32 %v1600_v42, 0.0  ;;  %v5095_v15 = vadd.f32 %v1921_v7, %v4817_v16  ;;  %v2066_v10 = vadd.f32 %v2065_v58, %v4921_v51  ;;  %v1413_v20 = vpack.c.bf16 %v1380_v48, %v1379_v34 }
 0x341   : > { %1641 = vmatmul.bf16.gmra.mxu2 %v1413_v20  ;;  %3311 = vrot.lane.b32.xlu0 %v2066_v10, %s4263_s17  ;;  %v5101_v24 = vpack.c.bf16 %v1695_v56, %v1694_v19  ;;  %v4165_v10 = vld [vmem:[%s4408_s14 + $0x20] sm:$0xff] }
 0x342   : > { %v1314_v9 = vpop.f32.mrf.mxu1  ;;  %2328 = vmatmul.bf16.gmra.mxu1 %v4165_v10  ;;  %v4166_v10 = vld [vmem:[%s4408_s14 + $0x28] sm:$0xff] }
 0x343   : > { %1963 = vmatmul.bf16.gmra.mxu3 %v5101_v24  ;;  %v1315_v42 = vadd.f32 %v4840_v46, %v1314_v9 }
 0x344   : > { %v1602_v17 = vpop.f32.mrf.mxu2 }
 0x345   : > { %v1603_v34 = vadd.f32 %v4996_v49, %v1602_v17  ;;  %v1381_v7 = vmax.f32 %v1315_v42, 0.0 }
 0x346   : > { %v1924_v28 = vpop.f32.mrf.mxu3  ;;  %v2068_v29 = vpop.f32.mrf.mxu0 }
 0x347   : > { %v2069_v33 = vadd.f32 %v2068_v29, %v4921_v51  ;;  %v1696_v20 = vmax.f32 %v1603_v34, 0.0  ;;  %v5113_v29 = vadd.f32 %v1924_v28, %v4817_v16 }
 0x349   : > { %2107 = vmatmul.bf16.gmra.mxu0 %v4986_v32  ;;  %3313 = vrot.lane.b32.xlu1 %v2069_v33, %s4263_s17 }
 0x34a   : > { %v1316_v48 = vpop.f32.mrf.mxu1 }
 0x34b   : > { %v1317_v12 = vadd.f32 %v4840_v46, %v1316_v48 }
 0x34c   : > { %v1604_v19 = vpop.f32.mrf.mxu2 }
 0x34d   : > { %v1382_v58 = vmax.f32 %v1317_v12, 0.0  ;;  %v1605_v56 = vadd.f32 %v4996_v49, %v1604_v19 }
 0x34e   : > { %v1926_v9 = vpop.f32.mrf.mxu3  ;;  %v2070_v32 = vpop.f32.mrf.mxu0 }
 0x34f   : > { %v1697_v23 = vmax.f32 %v1605_v56, 0.0  ;;  %v5116_v33 = vadd.f32 %v1926_v9, %v4817_v16  ;;  %v2071_v17 = vadd.f32 %v2070_v32, %v4921_v51  ;;  %v1414_v46 = vpack.c.bf16 %v1382_v58, %v1381_v7  ;;  %v4107_v7 = vld [vmem:[%s6127_s12] sm:$0xff] }
 0x350   : > { %2990 = vmatpush.bf16.msrb.mxu3 %v4107_v7 }
 0x351   : > { %v2201_v42 = vpack.c.bf16 %v5116_v33, %v5113_v29  ;;  %1646 = vmatmul.bf16.gmra.mxu2 %v1414_v46  ;;  %3315 = vrot.lane.b32.xlu2 %v2071_v17, %s4263_s17  ;;  %v5122_v34 = vpack.c.bf16 %v1697_v23, %v1696_v20 }
 0x352   : > { %2333 = vmatmul.bf16.gmra.mxu1 %v4166_v10 }
 0x353   : > { %1968 = vmatmul.bf16.gmra.mxu3 %v5122_v34 }
 0x354   : > { %v1607_v28 = vpop.f32.mrf.mxu2 }
 0x355   : > { %v1608_v58 = vadd.f32 %v4996_v49, %v1607_v28 }
 0x356   : > { %v1929_v48 = vpop.f32.mrf.mxu3  ;;  %v2073_v12 = vpop.f32.mrf.mxu0 }
 0x357   : > { %v2074_v19 = vadd.f32 %v2073_v12, %v4921_v51  ;;  %v1698_v20 = vmax.f32 %v1608_v58, 0.0  ;;  %v5135_v17 = vadd.f32 %v1929_v48, %v4817_v16 }
 0x359   : > { %2112 = vmatmul.bf16.gmra.mxu0 %v5011_v13  ;;  %3317 = vrot.lane.b32.xlu0 %v2074_v19, %s4263_s17 }
 0x35c   : > { %v1609_v23 = vpop.f32.mrf.mxu2 }
 0x35d   : > { %v1610_v56 = vadd.f32 %v4996_v49, %v1609_v23 }
 0x35e   : > { %v1931_v9 = vpop.f32.mrf.mxu3  ;;  %v2075_v32 = vpop.f32.mrf.mxu0 }
 0x35f   : > { %v1699_v46 = vmax.f32 %v1610_v56, 0.0  ;;  %v5138_v12 = vadd.f32 %v1931_v9, %v4817_v16  ;;  %v2076_v13 = vadd.f32 %v2075_v32, %v4921_v51 }
 0x361   : > { %v2202_v28 = vpack.c.bf16 %v5138_v12, %v5135_v17  ;;  %3319 = vrot.lane.b32.xlu1 %v2076_v13, %s4263_s17  ;;  %2525 = vmatmul.bf16.vlgmr.msrb.gmra.mxu2 %v2188_v35  ;;  %v5147_v19 = vpack.c.bf16 %v1699_v46, %v1698_v20 }
 0x362   : > { %2338 = vmatmul.bf16.gmra.mxu1 %v4167_v27 }
 0x363   : > { %1973 = vmatmul.bf16.gmra.mxu3 %v5147_v19 }
 0x364   : > { %v1612_v48 = vpop.f32.mrf.mxu2 }
 0x365   : > { %v1613_v56 = vadd.f32 %v4996_v49, %v1612_v48 }
 0x366   : > { %v1934_v7 = vpop.f32.mrf.mxu3  ;;  %v2078_v58 = vpop.f32.mrf.mxu0 }
 0x367   : > { %v2079_v23 = vadd.f32 %v2078_v58, %v4921_v51  ;;  %v1700_v31 = vmax.f32 %v1613_v56, 0.0  ;;  %v5157_v32 = vadd.f32 %v1934_v7, %v4817_v16 }
 0x369   : > { %2117 = vmatmul.bf16.gmra.mxu0 %v5038_v2  ;;  %3321 = vrot.lane.b32.xlu2 %v2079_v23, %s4263_s17 }
 0x36c   : > { %v1614_v10 = vpop.f32.mrf.mxu2 }
 0x36d   : > { %v1615_v9 = vadd.f32 %v4996_v49, %v1614_v10 }
 0x36e   : > { %v1936_v35 = vpop.f32.mrf.mxu3  ;;  %v2080_v20 = vpop.f32.mrf.mxu0 }
 0x36f   : > { %v1701_v46 = vmax.f32 %v1615_v9, 0.0  ;;  %v5160_v13 = vadd.f32 %v1936_v35, %v4817_v16  ;;  %v2081_v2 = vadd.f32 %v2080_v20, %v4921_v51 }
 0x371   : > { %v2203_v48 = vpack.c.bf16 %v5160_v13, %v5157_v32  ;;  %3323 = vrot.lane.b32.xlu0 %v2081_v2, %s4263_s17  ;;  %2530 = vmatmul.bf16.gmra.mxu2 %v2189_v26  ;;  %v5169_v58 = vpack.c.bf16 %v1701_v46, %v1700_v31 }
 0x372   : > { %2343 = vmatmul.bf16.gmra.mxu1 %v4168_v38 }
 0x373   : > { %1978 = vmatmul.bf16.gmra.mxu3 %v5169_v58 }
 0x374   : > { %v1617_v7 = vpop.f32.mrf.mxu2 }
 0x375   : > { %v1618_v9 = vadd.f32 %v4996_v49, %v1617_v7 }
 0x376   : > { %v1939_v23 = vpop.f32.mrf.mxu3  ;;  %v2083_v56 = vpop.f32.mrf.mxu0 }
 0x377   : > { %v2084_v10 = vadd.f32 %v2083_v56, %v4921_v51  ;;  %v1702_v0 = vmax.f32 %v1618_v9, 0.0  ;;  %v5179_v20 = vadd.f32 %v1939_v23, %v4817_v16 }
 0x379   : > { %2122 = vmatmul.bf16.gmra.mxu0 %v5059_v61  ;;  %3325 = vrot.lane.b32.xlu1 %v2084_v10, %s4263_s17 }
 0x37c   : > { %v1619_v27 = vpop.f32.mrf.mxu2 }
 0x37d   : > { %v1620_v35 = vadd.f32 %v4996_v49, %v1619_v27 }
 0x37e   : > { %v1941_v26 = vpop.f32.mrf.mxu3  ;;  %v2085_v31 = vpop.f32.mrf.mxu0 }
 0x37f   : > { %v1703_v46 = vmax.f32 %v1620_v35, 0.0  ;;  %v5182_v2 = vadd.f32 %v1941_v26, %v4817_v16  ;;  %v2086_v61 = vadd.f32 %v2085_v31, %v4921_v51 }
 0x381   : > { %v2204_v7 = vpack.c.bf16 %v5182_v2, %v5179_v20  ;;  %3327 = vrot.lane.b32.xlu2 %v2086_v61, %s4263_s17  ;;  %2535 = vmatmul.bf16.gmra.mxu2 %v2190_v39  ;;  %v5191_v56 = vpack.c.bf16 %v1703_v46, %v1702_v0 }
 0x382   : > { %2348 = vmatmul.bf16.gmra.mxu1 %v4169_v25 }
 0x383   : > { %1983 = vmatmul.bf16.gmra.mxu3 %v5191_v56 }
 0x384   : > { %v1622_v23 = vpop.f32.mrf.mxu2 }
 0x385   : > { %v1623_v35 = vadd.f32 %v4996_v49, %v1622_v23 }
 0x386   : > { %v1944_v10 = vpop.f32.mrf.mxu3  ;;  %v2088_v9 = vpop.f32.mrf.mxu0 }
 0x387   : > { %v2089_v27 = vadd.f32 %v2088_v9, %v4921_v51  ;;  %v1704_v30 = vmax.f32 %v1623_v35, 0.0  ;;  %v5201_v31 = vadd.f32 %v1944_v10, %v4817_v16 }
 0x389   : > { %2127 = vmatmul.bf16.gmra.mxu0 %v5080_v37  ;;  %3329 = vrot.lane.b32.xlu0 %v2089_v27, %s4263_s17 }
 0x38c   : > { %v1624_v38 = vpop.f32.mrf.mxu2 }
 0x38d   : > { %v1625_v26 = vadd.f32 %v4996_v49, %v1624_v38 }
 0x38e   : > { %v1946_v39 = vpop.f32.mrf.mxu3  ;;  %v2090_v0 = vpop.f32.mrf.mxu0 }
 0x38f   : > { %v1705_v46 = vmax.f32 %v1625_v26, 0.0  ;;  %v5204_v61 = vadd.f32 %v1946_v39, %v4817_v16  ;;  %v2091_v37 = vadd.f32 %v2090_v0, %v4921_v51 }
 0x391   : > { %v2205_v23 = vpack.c.bf16 %v5204_v61, %v5201_v31  ;;  %3331 = vrot.lane.b32.xlu1 %v2091_v37, %s4263_s17  ;;  %2540 = vmatmul.bf16.gmra.mxu2 %v2191_v6  ;;  %v5213_v9 = vpack.c.bf16 %v1705_v46, %v1704_v30  ;;  %v3282_v61 = vpop.permute.xlu0 %3281 }
 0x392   : > { %2353 = vmatmul.bf16.gmra.mxu1 %v4170_v59 }
 0x393   : > { %1988 = vmatmul.bf16.gmra.mxu3 %v5213_v9 }
 0x394   : > { %v1627_v10 = vpop.f32.mrf.mxu2 }
 0x395   : > { %v1628_v26 = vadd.f32 %v4996_v49, %v1627_v10 }
 0x396   : > { %v1949_v27 = vpop.f32.mrf.mxu3  ;;  %v2093_v35 = vpop.f32.mrf.mxu0 }
 0x397   : > { %v2094_v38 = vadd.f32 %v2093_v35, %v4921_v51  ;;  %v1706_v1 = vmax.f32 %v1628_v26, 0.0  ;;  %v5223_v0 = vadd.f32 %v1949_v27, %v4817_v16 }
 0x399   : > { %2132 = vmatmul.bf16.gmra.mxu0 %v5101_v24  ;;  %3333 = vrot.lane.b32.xlu2 %v2094_v38, %s4263_s17 }
 0x39c   : > { %v1629_v25 = vpop.f32.mrf.mxu2 }
 0x39d   : > { %v1630_v39 = vadd.f32 %v4996_v49, %v1629_v25 }
 0x39e   : > { %v1951_v6 = vpop.f32.mrf.mxu3  ;;  %v2095_v30 = vpop.f32.mrf.mxu0 }
 0x39f   : > { %v1707_v46 = vmax.f32 %v1630_v39, 0.0  ;;  %v5226_v37 = vadd.f32 %v1951_v6, %v4817_v16  ;;  %v2096_v24 = vadd.f32 %v2095_v30, %v4921_v51 }
 0x3a1   : > { %3335 = vrot.lane.b32.xlu0 %v2096_v24, %s4263_s17  ;;  %2545 = vmatmul.bf16.gmra.mxu2 %v2192_v11  ;;  %v5235_v35 = vpack.c.bf16 %v1707_v46, %v1706_v1 }
 0x3a2   : > { %2358 = vmatmul.bf16.gmra.mxu1 %v4171_v62 }
 0x3a3   : > { %1993 = vmatmul.bf16.gmra.mxu3 %v5235_v35 }
 0x3a4   : > { %v1632_v27 = vpop.f32.mrf.mxu2 }
 0x3a5   : > { %v1633_v39 = vadd.f32 %v4996_v49, %v1632_v27 }
 0x3a6   : > { %v1954_v38 = vpop.f32.mrf.mxu3  ;;  %v2098_v26 = vpop.f32.mrf.mxu0 }
 0x3a7   : > { %v2099_v25 = vadd.f32 %v2098_v26, %v4921_v51  ;;  %v1708_v41 = vmax.f32 %v1633_v39, 0.0  ;;  %v5245_v30 = vadd.f32 %v1954_v38, %v4817_v16 }
 0x3a9   : > { %2137 = vmatmul.bf16.gmra.mxu0 %v5122_v34  ;;  %3337 = vrot.lane.b32.xlu1 %v2099_v25, %s4263_s17 }
 0x3ac   : > { %v1634_v59 = vpop.f32.mrf.mxu2 }
 0x3ad   : > { %v1635_v6 = vadd.f32 %v4996_v49, %v1634_v59 }
 0x3ae   : > { %v1956_v11 = vpop.f32.mrf.mxu3  ;;  %v2100_v1 = vpop.f32.mrf.mxu0 }
 0x3af   : > { %v1709_v46 = vmax.f32 %v1635_v6, 0.0  ;;  %v5248_v24 = vadd.f32 %v1956_v11, %v4817_v16  ;;  %v2101_v34 = vadd.f32 %v2100_v1, %v4921_v51  ;;  %v5264_v11 = vpop.f32.mrf.mxu1 }
 0x3b1   : > { %3339 = vrot.lane.b32.xlu2 %v2101_v34, %s4263_s17  ;;  %2550 = vmatmul.bf16.gmra.mxu2 %v2193_v18  ;;  %v5257_v26 = vpack.c.bf16 %v1709_v46, %v1708_v41 }
 0x3b2   : > { %2363 = vmatmul.bf16.gmra.mxu1 %v4172_v14 }
 0x3b3   : > { %1998 = vmatmul.bf16.gmra.mxu3 %v5257_v26 }
 0x3b4   : > { %v1637_v38 = vpop.f32.mrf.mxu2 }
 0x3b5   : > { %v1638_v6 = vadd.f32 %v4996_v49, %v1637_v38 }
 0x3b6   : > { %v1959_v25 = vpop.f32.mrf.mxu3  ;;  %v2103_v39 = vpop.f32.mrf.mxu0 }
 0x3b7   : > { %v2104_v59 = vadd.f32 %v2103_v39, %v4921_v51  ;;  %v1710_v18 = vmax.f32 %v1638_v6, 0.0  ;;  %v5269_v46 = vadd.f32 %v1959_v25, %v4817_v16  ;;  %v2311_v6 = vpop.f32.mrf.mxu1 }
 0x3b9   : > { %2142 = vmatmul.bf16.gmra.mxu0 %v5147_v19  ;;  %3341 = vrot.lane.b32.xlu0 %v2104_v59, %s4263_s17 }
 0x3bc   : > { %v1639_v62 = vpop.f32.mrf.mxu2 }
 0x3bd   : > { %v1640_v8 = vadd.f32 %v4996_v49, %v1639_v62 }
 0x3be   : > { %v1961_v41 = vpop.f32.mrf.mxu3  ;;  %v2105_v1 = vpop.f32.mrf.mxu0 }
 0x3bf   : > { %v1711_v34 = vmax.f32 %v1640_v8, 0.0  ;;  %v5272_v19 = vadd.f32 %v1961_v41, %v4817_v16  ;;  %v2106_v39 = vadd.f32 %v2105_v1, %v4921_v51 }
 0x3c1   : > { %3343 = vrot.lane.b32.xlu1 %v2106_v39, %s4263_s17  ;;  %2555 = vmatmul.bf16.gmra.mxu2 %v2194_v57  ;;  %v5281_v59 = vpack.c.bf16 %v1711_v34, %v1710_v18  ;;  %v5288_v39 = vpop.f32.mrf.mxu1 }
 0x3c2   : > { %2368 = vmatmul.bf16.gmra.mxu1 %v4173_v54 }
 0x3c3   : > { %2003 = vmatmul.bf16.gmra.mxu3 %v5281_v59 }
 0x3c4   : > { %v1642_v25 = vpop.f32.mrf.mxu2 }
 0x3c5   : > { %v1643_v41 = vadd.f32 %v4996_v49, %v1642_v25 }
 0x3c6   : > { %v1964_v62 = vpop.f32.mrf.mxu3  ;;  %v2108_v8 = vpop.f32.mrf.mxu0 }
 0x3c7   : > { %v2109_v14 = vadd.f32 %v2108_v8, %v4921_v51  ;;  %v1712_v57 = vmax.f32 %v1643_v41, 0.0  ;;  %v5293_v38 = vadd.f32 %v1964_v62, %v4817_v16 }
 0x3c9   : > { %2147 = vmatmul.bf16.gmra.mxu0 %v5169_v58  ;;  %3345 = vrot.lane.b32.xlu2 %v2109_v14, %s4263_s17 }
 0x3cc   : > { %v1644_v1 = vpop.f32.mrf.mxu2 }
 0x3cd   : > { %v1645_v50 = vadd.f32 %v4996_v49, %v1644_v1  ;;  %v5308_v1 = vpop.f32.mrf.mxu1 }
 0x3ce   : > { %v1966_v18 = vpop.f32.mrf.mxu3  ;;  %v2110_v34 = vpop.f32.mrf.mxu0 }
 0x3cf   : > { %v1713_v8 = vmax.f32 %v1645_v50, 0.0  ;;  %v5296_v58 = vadd.f32 %v1966_v18, %v4817_v16  ;;  %v2111_v14 = vadd.f32 %v2110_v34, %v4921_v51 }
 0x3d1   : > { %3347 = vrot.lane.b32.xlu0 %v2111_v14, %s4263_s17  ;;  %2560 = vmatmul.bf16.gmra.mxu2 %v2195_v45  ;;  %v5305_v41 = vpack.c.bf16 %v1713_v8, %v1712_v57  ;;  %v4174_v45 = vld [vmem:[%s4408_s14 + $0x68] sm:$0xff] }
 0x3d2   : > { %2373 = vmatmul.bf16.gmra.mxu1 %v4174_v45 }
 0x3d3   : > { %2008 = vmatmul.bf16.gmra.mxu3 %v5305_v41 }
 0x3d4   : > { %v1647_v62 = vpop.f32.mrf.mxu2 }
 0x3d5   : > { %v1648_v34 = vadd.f32 %v4996_v49, %v1647_v62  ;;  %v5314_v21 = vpop.f32.mrf.mxu1 }
 0x3d6   : > { %v1969_v50 = vpop.f32.mrf.mxu3  ;;  %v2113_v54 = vpop.f32.mrf.mxu0 }
 0x3d7   : > { %v2114_v18 = vadd.f32 %v2113_v54, %v4921_v51  ;;  %v1714_v57 = vmax.f32 %v1648_v34, 0.0  ;;  %v5319_v27 = vadd.f32 %v1969_v50, %v4817_v16 }
 0x3d9   : > { %2152 = vmatmul.bf16.gmra.mxu0 %v5191_v56  ;;  %3349 = vrot.lane.b32.xlu1 %v2114_v18, %s4263_s17 }
 0x3dc   : > { %v1649_v14 = vpop.f32.mrf.mxu2 }
 0x3dd   : > { %v1650_v4 = vadd.f32 %v4996_v49, %v1649_v14  ;;  %v5334_v34 = vpop.f32.mrf.mxu1 }
 0x3de   : > { %v1971_v8 = vpop.f32.mrf.mxu3  ;;  %v2115_v25 = vpop.f32.mrf.mxu0 }
 0x3df   : > { %v1715_v54 = vmax.f32 %v1650_v4, 0.0  ;;  %v5322_v56 = vadd.f32 %v1971_v8, %v4817_v16  ;;  %v2116_v18 = vadd.f32 %v2115_v25, %v4921_v51  ;;  %v5341_v8 = vld [vmem:[%s6126_s11] ss:$0 sm:$0xff] }
 0x3e1   : > { %3351 = vrot.lane.b32.xlu2 %v2116_v18, %s4263_s17  ;;  %2565 = vmatmul.bf16.gmra.mxu2 %v2196_v5  ;;  %v5331_v49 = vpack.c.bf16 %v1715_v54, %v1714_v57  ;;  %v4175_v54 = vld [vmem:[%s4408_s14 + $0x70] sm:$0xff] }
 0x3e2   : > { %2378 = vmatmul.bf16.gmra.mxu1 %v4175_v54 }
 0x3e3   : > { %2013 = vmatmul.bf16.gmra.mxu3 %v5331_v49 }
 0x3e4   : > { %v2526_v50 = vpop.f32.mrf.mxu2 }
 0x3e5   : > { %v2527_v45 = vadd.f32 %v2526_v50, %v5264_v11  ;;  %v5345_v3 = vpop.f32.mrf.mxu1 }
 0x3e6   : > { %v1974_v14 = vpop.f32.mrf.mxu3  ;;  %v2118_v4 = vpop.f32.mrf.mxu0 }
 0x3e7   : > { %v2119_v25 = vadd.f32 %v2118_v4, %v4921_v51  ;;  %v2690_v5 = vadd.f32 %v5341_v8, %v2527_v45  ;;  %v5350_v11 = vadd.f32 %v1974_v14, %v4817_v16 }
 0x3e9   : > { %2157 = vmatmul.bf16.gmra.mxu0 %v5213_v9  ;;  %3353 = vrot.lane.b32.xlu0 %v2119_v25, %s4263_s17  ;;  %v2754_v25 = vmax.f32 %v2690_v5, 0.0 }
 0x3ec   : > { %v2528_v40 = vpop.f32.mrf.mxu2 }
 0x3ed   : > { %v2529_v57 = vadd.f32 %v2528_v40, %v2311_v6  ;;  %v5363_v40 = vpop.f32.mrf.mxu1 }
 0x3ee   : > { %v1976_v18 = vpop.f32.mrf.mxu3  ;;  %v2120_v4 = vpop.f32.mrf.mxu0 }
 0x3ef   : > { %v2691_v50 = vadd.f32 %v5341_v8, %v2529_v57  ;;  %v5354_v62 = vadd.f32 %v1976_v18, %v4817_v16  ;;  %v2121_v9 = vadd.f32 %v2120_v4, %v4921_v51  ;;  %v4176_v4 = vld [vmem:[%s4408_s14 + $0x78] sm:$0xff] }
 0x3f1   : > { %v2755_v10 = vmax.f32 %v2691_v50, 0.0  ;;  %v2211_v45 = vpack.c.bf16 %v5354_v62, %v5350_v11  ;;  %3355 = vrot.lane.b32.xlu1 %v2121_v9, %s4263_s17  ;;  %2570 = vmatmul.bf16.gmra.mxu2 %v2197_v22 }
 0x3f2   : > { %2383 = vmatmul.bf16.gmra.mxu1 %v4176_v4 }
 0x3f3   : > { %v2818_v6 = vpack.c.bf16 %v2755_v10, %v2754_v25 }
 0x3f4   : > { %v2531_v14 = vpop.f32.mrf.mxu2 }
 0x3f5   : > { %3984 = vmatmul.msk.bf16.vlgmr.msrb.gmra.mxu3 %vm2886_vm0, %v2818_v6  ;;  %v2532_v18 = vadd.f32 %v2531_v14, %v5288_v39  ;;  %v5370_v60 = vpop.f32.mrf.mxu1 }
 0x3f6   : > { %v1979_v57 = vpop.f32.mrf.mxu3  ;;  %v2123_v5 = vpop.f32.mrf.mxu0 }
 0x3f7   : > { %v2124_v54 = vadd.f32 %v2123_v5, %v4921_v51  ;;  %v2692_v22 = vadd.f32 %v5341_v8, %v2532_v18  ;;  %v5376_v25 = vadd.f32 %v1979_v57, %v4817_v16 }
 0x3f9   : > { %2162 = vmatmul.bf16.gmra.mxu0 %v5235_v35  ;;  %3357 = vrot.lane.b32.xlu2 %v2124_v54, %s4263_s17  ;;  %v2756_v14 = vmax.f32 %v2692_v22, 0.0 }
 0x3fc   : > { %v2533_v55 = vpop.f32.mrf.mxu2 }
 0x3fd   : > { %v2534_v10 = vadd.f32 %v2533_v55, %v5308_v1  ;;  %v5389_v18 = vpop.f32.mrf.mxu1 }
 0x3fe   : > { %v1981_v50 = vpop.f32.mrf.mxu3  ;;  %v2125_v9 = vpop.f32.mrf.mxu0 }
 0x3ff   : > { %v2693_v39 = vadd.f32 %v5341_v8, %v2534_v10  ;;  %v5380_v35 = vadd.f32 %v1981_v50, %v4817_v16  ;;  %v2126_v6 = vadd.f32 %v2125_v9, %v4921_v51  ;;  %v4177_v9 = vld [vmem:[%s4408_s14 + $0x80] sm:$0xff] }
 0x401   : > { %v2757_v5 = vmax.f32 %v2693_v39, 0.0  ;;  %v2212_v54 = vpack.c.bf16 %v5380_v35, %v5376_v25  ;;  %3359 = vrot.lane.b32.xlu0 %v2126_v6, %s4263_s17  ;;  %2575 = vmatmul.bf16.gmra.mxu2 %v2198_v53 }
 0x402   : > { %2388 = vmatmul.bf16.gmra.mxu1 %v4177_v9 }
 0x403   : > { %v2819_v1 = vpack.c.bf16 %v2757_v5, %v2756_v14 }
 0x404   : > { %v2536_v57 = vpop.f32.mrf.mxu2 }
 0x405   : > { %3985 = vmatmul.msk.bf16.gmra.mxu3 %vm2886_vm0, %v2819_v1  ;;  %v2537_v4 = vadd.f32 %v2536_v57, %v5314_v21  ;;  %v5396_v44 = vpop.f32.mrf.mxu1 }
 0x406   : > { %v1984_v55 = vpop.f32.mrf.mxu3  ;;  %v2128_v10 = vpop.f32.mrf.mxu0 }
 0x407   : > { %v2129_v22 = vadd.f32 %v2128_v10, %v4921_v51  ;;  %v2694_v36 = vadd.f32 %v5341_v8, %v2537_v4  ;;  %v5402_v14 = vadd.f32 %v1984_v55, %v4817_v16 }
 0x409   : > { %2167 = vmatmul.bf16.gmra.mxu0 %v5257_v26  ;;  %3361 = vrot.lane.b32.xlu1 %v2129_v22, %s4263_s17  ;;  %v2758_v1 = vmax.f32 %v2694_v36, 0.0 }
 0x40c   : > { %v2538_v50 = vpop.f32.mrf.mxu2 }
 0x40d   : > { %v2539_v53 = vadd.f32 %v2538_v50, %v5334_v34  ;;  %v5415_v22 = vpop.f32.mrf.mxu1 }
 0x40e   : > { %v1986_v39 = vpop.f32.mrf.mxu3  ;;  %v2130_v6 = vpop.f32.mrf.mxu0 }
 0x40f   : > { %v2695_v21 = vadd.f32 %v5341_v8, %v2539_v53  ;;  %v5406_v26 = vadd.f32 %v1986_v39, %v4817_v16  ;;  %v2131_v5 = vadd.f32 %v2130_v6, %v4921_v51  ;;  %v4178_v39 = vld [vmem:[%s4408_s14 + $0x88] sm:$0xff] }
 0x411   : > { %v2759_v57 = vmax.f32 %v2695_v21, 0.0  ;;  %v2213_v10 = vpack.c.bf16 %v5406_v26, %v5402_v14  ;;  %3363 = vrot.lane.b32.xlu2 %v2131_v5, %s4263_s17  ;;  %2580 = vmatmul.bf16.gmra.mxu2 %v2199_v63 }
 0x412   : > { %2393 = vmatmul.bf16.gmra.mxu1 %v4178_v39 }
 0x413   : > { %v2820_v34 = vpack.c.bf16 %v2759_v57, %v2758_v1 }
 0x414   : > { %v2541_v55 = vpop.f32.mrf.mxu2 }
 0x415   : > { %3986 = vmatmul.msk.bf16.gmra.mxu3 %vm2886_vm0, %v2820_v34  ;;  %v2542_v53 = vadd.f32 %v2541_v55, %v5345_v3  ;;  %v5422_v43 = vpop.f32.mrf.mxu1 }
 0x416   : > { %v1989_v4 = vpop.f32.mrf.mxu3  ;;  %v2133_v50 = vpop.f32.mrf.mxu0 }
 0x417   : > { %v2134_v36 = vadd.f32 %v2133_v50, %v4921_v51  ;;  %v2696_v52 = vadd.f32 %v5341_v8, %v2542_v53  ;;  %v5428_v5 = vadd.f32 %v1989_v4, %v4817_v16 }
 0x419   : > { %2172 = vmatmul.bf16.gmra.mxu0 %v5281_v59  ;;  %3365 = vrot.lane.b32.xlu0 %v2134_v36, %s4263_s17  ;;  %v2760_v57 = vmax.f32 %v2696_v52, 0.0 }
 0x41c   : > { %v2543_v9 = vpop.f32.mrf.mxu2 }
 0x41d   : > { %v2544_v63 = vadd.f32 %v2543_v9, %v5363_v40  ;;  %v6141_v40 = vpack.c.bf16 %v5095_v15, %v5092_v47  ;;  %v5441_v36 = vpop.f32.mrf.mxu1 }
 0x41e   : > { %v1991_v6 = vpop.f32.mrf.mxu3  ;;  %v2135_v21 = vpop.f32.mrf.mxu0 }
 0x41f   : > { %v2697_v3 = vadd.f32 %v5341_v8, %v2544_v63  ;;  %v5432_v59 = vadd.f32 %v1991_v6, %v4817_v16  ;;  %v2136_v1 = vadd.f32 %v2135_v21, %v4921_v51  ;;  %v4179_v21 = vld [vmem:[%s4408_s14 + $0x90] sm:$0xff] }
 0x421   : > { %v2761_v34 = vmax.f32 %v2697_v3, 0.0  ;;  %v2214_v55 = vpack.c.bf16 %v5432_v59, %v5428_v5  ;;  %3367 = vrot.lane.b32.xlu1 %v2136_v1, %s4263_s17  ;;  %2585 = vmatmul.bf16.gmra.mxu2 %v6141_v40 }
 0x422   : > { %2398 = vmatmul.bf16.gmra.mxu1 %v4179_v21  ;;  %v4180_v21 = vld [vmem:[%s4408_s14 + $0x98] sm:$0xff] }
 0x423   : > { %v2821_v4 = vpack.c.bf16 %v2761_v34, %v2760_v57 }
 0x424   : > { %v2546_v50 = vpop.f32.mrf.mxu2 }
 0x425   : > { %3987 = vmatmul.msk.bf16.gmra.mxu3 %vm2886_vm0, %v2821_v4  ;;  %v2547_v63 = vadd.f32 %v2546_v50, %v5370_v60  ;;  %v5448_v47 = vpop.f32.mrf.mxu1 }
 0x426   : > { %v1994_v53 = vpop.f32.mrf.mxu3  ;;  %v2138_v9 = vpop.f32.mrf.mxu0 }
 0x427   : > { %v2139_v52 = vadd.f32 %v2138_v9, %v4921_v51  ;;  %v2698_v15 = vadd.f32 %v5341_v8, %v2547_v63  ;;  %v5454_v57 = vadd.f32 %v1994_v53, %v4817_v16 }
 0x429   : > { %2177 = vmatmul.bf16.gmra.mxu0 %v5305_v41  ;;  %3369 = vrot.lane.b32.xlu2 %v2139_v52, %s4263_s17  ;;  %v2762_v40 = vmax.f32 %v2698_v15, 0.0 }
 0x42c   : > { %v2548_v39 = vpop.f32.mrf.mxu2 }
 0x42d   : > { %v2549_v6 = vadd.f32 %v2548_v39, %v5389_v18  ;;  %v5467_v9 = vpop.f32.mrf.mxu1 }
 0x42e   : > { %v1996_v3 = vpop.f32.mrf.mxu3  ;;  %v2140_v1 = vpop.f32.mrf.mxu0 }
 0x42f   : > { %v2699_v60 = vadd.f32 %v5341_v8, %v2549_v6  ;;  %v5458_v41 = vadd.f32 %v1996_v3, %v4817_v16  ;;  %v2141_v34 = vadd.f32 %v2140_v1, %v4921_v51 }
 0x431   : > { %v2763_v4 = vmax.f32 %v2699_v60, 0.0  ;;  %v2215_v50 = vpack.c.bf16 %v5458_v41, %v5454_v57  ;;  %3371 = vrot.lane.b32.xlu0 %v2141_v34, %s4263_s17  ;;  %2590 = vmatmul.bf16.gmra.mxu2 %v2201_v42  ;;  %v5827_v41 = vld [vmem:[%s6126_s11] ss:$0 sm:$0xff] }
 0x432   : > { %2403 = vmatmul.bf16.gmra.mxu1 %v4180_v21 }
 0x433   : > { %v2822_v18 = vpack.c.bf16 %v2763_v4, %v2762_v40 }
 0x434   : > { %v2551_v53 = vpop.f32.mrf.mxu2 }
 0x435   : > { %3988 = vmatmul.msk.bf16.gmra.mxu3 %vm2886_vm0, %v2822_v18  ;;  %v2552_v15 = vadd.f32 %v2551_v53, %v5396_v44  ;;  %v5474_v29 = vpop.f32.mrf.mxu1 }
 0x436   : > { %v1999_v52 = vpop.f32.mrf.mxu3  ;;  %v2143_v63 = vpop.f32.mrf.mxu0 }
 0x437   : > { %v2144_v39 = vadd.f32 %v2143_v63, %v4921_v51  ;;  %v2700_v33 = vadd.f32 %v5341_v8, %v2552_v15  ;;  %v5480_v60 = vadd.f32 %v1999_v52, %v4817_v16 }
 0x439   : > { %2182 = vmatmul.bf16.gmra.mxu0 %v5331_v49  ;;  %3373 = vrot.lane.b32.xlu1 %v2144_v39, %s4263_s17  ;;  %v2764_v40 = vmax.f32 %v2700_v33, 0.0 }
 0x43c   : > { %v2553_v6 = vpop.f32.mrf.mxu2 }
 0x43d   : > { %v2554_v42 = vadd.f32 %v2553_v6, %v5415_v22  ;;  %v5493_v52 = vpop.f32.mrf.mxu1 }
 0x43e   : > { %v2001_v3 = vpop.f32.mrf.mxu3  ;;  %v2145_v1 = vpop.f32.mrf.mxu0 }
 0x43f   : > { %v2701_v44 = vadd.f32 %v5341_v8, %v2554_v42  ;;  %v5484_v49 = vadd.f32 %v2001_v3, %v4817_v16  ;;  %v2146_v34 = vadd.f32 %v2145_v1, %v4921_v51 }
 0x441   : > { %v2765_v4 = vmax.f32 %v2701_v44, 0.0  ;;  %v2216_v18 = vpack.c.bf16 %v5484_v49, %v5480_v60  ;;  %3375 = vrot.lane.b32.xlu2 %v2146_v34, %s4263_s17  ;;  %2595 = vmatmul.bf16.gmra.mxu2 %v2202_v28  ;;  %v4181_v28 = vld [vmem:[%s4408_s14 + $0xa0] sm:$0xff] }
 0x442   : > { %2408 = vmatmul.bf16.gmra.mxu1 %v4181_v28 }
 0x443   : > { %v2823_v22 = vpack.c.bf16 %v2765_v4, %v2764_v40 }
 0x444   : > { %v2556_v53 = vpop.f32.mrf.mxu2 }
 0x445   : > { %3989 = vmatmul.msk.bf16.gmra.mxu3 %vm2886_vm0, %v2823_v22  ;;  %v2557_v6 = vadd.f32 %v2556_v53, %v5422_v43  ;;  %v5499_v42 = vpop.f32.mrf.mxu1 }
 0x446   : > { %v2004_v63 = vpop.f32.mrf.mxu3  ;;  %v2148_v39 = vpop.f32.mrf.mxu0 }
 0x447   : > { %v2149_v15 = vadd.f32 %v2148_v39, %v4921_v51  ;;  %v2702_v17 = vadd.f32 %v5341_v8, %v2557_v6  ;;  %v5505_v1 = vadd.f32 %v2004_v63, %v4817_v16 }
 0x449   : > { %3377 = vrot.lane.b32.xlu0 %v2149_v15, %s4263_s17  ;;  %v2766_v40 = vmax.f32 %v2702_v17, 0.0 }
 0x44c   : > { %v2558_v33 = vpop.f32.mrf.mxu2 }
 0x44d   : > { %v2559_v12 = vadd.f32 %v2558_v33, %v5441_v36  ;;  %v5518_v63 = vpop.f32.mrf.mxu1 }
 0x44e   : > { %v2006_v21 = vpop.f32.mrf.mxu3  ;;  %v2150_v3 = vpop.f32.mrf.mxu0 }
 0x44f   : > { %v2703_v44 = vadd.f32 %v5341_v8, %v2559_v12  ;;  %v5509_v43 = vadd.f32 %v2006_v21, %v4817_v16  ;;  %v2151_v34 = vadd.f32 %v2150_v3, %v4921_v51 }
 0x451   : > { %v2767_v4 = vmax.f32 %v2703_v44, 0.0  ;;  %v2217_v22 = vpack.c.bf16 %v5509_v43, %v5505_v1  ;;  %3379 = vrot.lane.b32.xlu1 %v2151_v34, %s4263_s17  ;;  %2600 = vmatmul.bf16.gmra.mxu2 %v2203_v48  ;;  %v4182_v48 = vld [vmem:[%s4408_s14 + $0xa8] sm:$0xff] }
 0x452   : > { %2413 = vmatmul.bf16.gmra.mxu1 %v4182_v48 }
 0x453   : > { %v2824_v36 = vpack.c.bf16 %v2767_v4, %v2766_v40 }
 0x454   : > { %v2561_v53 = vpop.f32.mrf.mxu2 }
 0x455   : > { %3990 = vmatmul.msk.bf16.gmra.mxu3 %vm2886_vm0, %v2824_v36  ;;  %v2562_v33 = vadd.f32 %v2561_v53, %v5448_v47  ;;  %v5524_v12 = vpop.f32.mrf.mxu1 }
 0x456   : > { %v2009_v39 = vpop.f32.mrf.mxu3  ;;  %v2153_v15 = vpop.f32.mrf.mxu0 }
 0x457   : > { %v2154_v6 = vadd.f32 %v2153_v15, %v4921_v51  ;;  %v2704_v32 = vadd.f32 %v5341_v8, %v2562_v33  ;;  %v5530_v3 = vadd.f32 %v2009_v39, %v4817_v16 }
 0x459   : > { %3381 = vrot.lane.b32.xlu2 %v2154_v6, %s4263_s17  ;;  %v2768_v40 = vmax.f32 %v2704_v32, 0.0 }
 0x45c   : > { %v2563_v17 = vpop.f32.mrf.mxu2 }
 0x45d   : > { %v2564_v13 = vadd.f32 %v2563_v17, %v5467_v9  ;;  %v5543_v39 = vpop.f32.mrf.mxu1 }
 0x45e   : > { %v2011_v28 = vpop.f32.mrf.mxu3  ;;  %v2155_v21 = vpop.f32.mrf.mxu0 }
 0x45f   : > { %v2705_v44 = vadd.f32 %v5341_v8, %v2564_v13  ;;  %v5534_v47 = vadd.f32 %v2011_v28, %v4817_v16  ;;  %v2156_v34 = vadd.f32 %v2155_v21, %v4921_v51  ;;  %v4183_v13 = vld [vmem:[%s4408_s14 + $0xb0] sm:$0xff] }
 0x461   : > { %v2769_v4 = vmax.f32 %v2705_v44, 0.0  ;;  %v2218_v9 = vpack.c.bf16 %v5534_v47, %v5530_v3  ;;  %3383 = vrot.lane.b32.xlu0 %v2156_v34, %s4263_s17  ;;  %2605 = vmatmul.bf16.gmra.mxu2 %v2204_v7 }
 0x462   : > { %2418 = vmatmul.bf16.gmra.mxu1 %v4183_v13 }
 0x463   : > { %v2825_v36 = vpack.c.bf16 %v2769_v4, %v2768_v40 }
 0x464   : > { %v2566_v53 = vpop.f32.mrf.mxu2 }
 0x465   : > { %3991 = vmatmul.msk.bf16.gmra.mxu3 %vm2886_vm0, %v2825_v36  ;;  %v2567_v17 = vadd.f32 %v2566_v53, %v5474_v29  ;;  %v5551_v20 = vpop.f32.mrf.mxu1 }
 0x466   : > { %v2014_v15 = vpop.f32.mrf.mxu3  ;;  %v2158_v6 = vpop.f32.mrf.mxu0 }
 0x467   : > { %v2159_v33 = vadd.f32 %v2158_v6, %v4921_v51  ;;  %v2706_v2 = vadd.f32 %v5341_v8, %v2567_v17  ;;  %v5557_v21 = vadd.f32 %v2014_v15, %v4817_v16 }
 0x469   : > { %3385 = vrot.lane.b32.xlu1 %v2159_v33, %s4263_s17  ;;  %v2770_v40 = vmax.f32 %v2706_v2, 0.0 }
 0x46c   : > { %v2568_v32 = vpop.f32.mrf.mxu2 }
 0x46d   : > { %v2569_v7 = vadd.f32 %v2568_v32, %v5493_v52  ;;  %v5571_v15 = vpop.f32.mrf.mxu1 }
 0x46e   : > { %v2016_v48 = vpop.f32.mrf.mxu3  ;;  %v2160_v28 = vpop.f32.mrf.mxu0 }
 0x46f   : > { %v2707_v29 = vadd.f32 %v5341_v8, %v2569_v7  ;;  %v5561_v44 = vadd.f32 %v2016_v48, %v4817_v16  ;;  %v2161_v34 = vadd.f32 %v2160_v28, %v4921_v51  ;;  %v5577_v16 = vld [vmem:[%s6128_s13] ss:$0 sm:$0xff]  ;;  %v4184_v48 = vld [vmem:[%s4408_s14 + $0xb8] sm:$0xff] }
 0x471   : > { %v2771_v4 = vmax.f32 %v2707_v29, 0.0  ;;  %v2219_v52 = vpack.c.bf16 %v5561_v44, %v5557_v21  ;;  %3387 = vrot.lane.b32.xlu2 %v2161_v34, %s4263_s17  ;;  %2610 = vmatmul.bf16.gmra.mxu2 %v2205_v23 }
 0x472   : > { %2423 = vmatmul.bf16.gmra.mxu1 %v4184_v48 }
 0x473   : > { %v2826_v36 = vpack.c.bf16 %v2771_v4, %v2770_v40 }
 0x474   : > { %v2571_v53 = vpop.f32.mrf.mxu2 }
 0x475   : > { %3992 = vmatmul.msk.bf16.gmra.mxu3 %vm2886_vm0, %v2826_v36  ;;  %v2572_v23 = vadd.f32 %v2571_v53, %v5499_v42  ;;  %v5592_v2 = vpop.f32.mrf.mxu1  ;;  %v6144_v53 = vpack.c.bf16 %v5226_v37, %v5223_v0  ;;  %v3286_v0 = vpop.permute.xlu1 %3285 }
 0x476   : > { %v2163_v6 = vpop.f32.mrf.mxu0 }
 0x477   : > { %v2164_v33 = vadd.f32 %v2163_v6, %v4921_v51  ;;  %v2708_v7 = vadd.f32 %v5341_v8, %v2572_v23 }
 0x478   : > { %v2992_v31 = vpop.f32.mrf.mxu3 }
 0x479   : > { %v2993_v17 = vadd.f32 %v5577_v16, %v2992_v31  ;;  %3389 = vrot.lane.b32.xlu0 %v2164_v33, %s4263_s17  ;;  %v2772_v40 = vmax.f32 %v2708_v7, 0.0 }
 0x47b   : > { %3153 = vst.msk [vmem:[%s5583_s24] sm:$0xff] %vm3152_vm1, %v2993_v17 }
 0x47c   : > { %3474 = vst.msk [vmem:[%s5583_s24] sm:$0xff] %vm3473_vm2, %v3282_v61  ;;  %v2573_v32 = vpop.f32.mrf.mxu2 }
 0x47d   : > { %v2574_v13 = vadd.f32 %v2573_v32, %v5518_v63  ;;  %v3284_v63 = vpop.permute.xlu0 %3283  ;;  %v5608_v31 = vpop.f32.mrf.mxu1 }
 0x47e   : > { %v2165_v42 = vpop.f32.mrf.mxu0 }
 0x47f   : > { %v2709_v28 = vadd.f32 %v5341_v8, %v2574_v13  ;;  %v2166_v29 = vadd.f32 %v2165_v42, %v4921_v51 }
 0x480   : > { %v2994_v34 = vpop.f32.mrf.mxu3 }
 0x481   : > { %v2773_v4 = vmax.f32 %v2709_v28, 0.0  ;;  %v2995_v36 = vadd.f32 %v5577_v16, %v2994_v34  ;;  %3391 = vrot.lane.b32.xlu1 %v2166_v29, %s4263_s17  ;;  %2615 = vmatmul.bf16.gmra.mxu2 %v6144_v53  ;;  %v4185_v28 = vld [vmem:[%s4408_s14 + $0xc0] sm:$0xff] }
 0x482   : > { %2428 = vmatmul.bf16.gmra.mxu1 %v4185_v28  ;;  %v4186_v28 = vld [vmem:[%s4408_s14 + $0xc8] sm:$0xff] }
 0x483   : > { %v2827_v6 = vpack.c.bf16 %v2773_v4, %v2772_v40  ;;  %3154 = vst.msk [vmem:[%s5583_s24 + $0x8] sm:$0xff] %vm3152_vm1, %v2995_v36 }
 0x484   : > { %3475 = vst.msk [vmem:[%s5583_s24 + $0x8] sm:$0xff] %vm3473_vm2, %v3284_v63  ;;  %v2576_v33 = vpop.f32.mrf.mxu2  ;;  %v6145_v63 = vpack.c.bf16 %v5248_v24, %v5245_v30  ;;  %v3290_v30 = vpop.permute.xlu2 %3289 }
 0x485   : > { %3993 = vmatmul.msk.bf16.gmra.mxu3 %vm2886_vm0, %v2827_v6  ;;  %v2577_v37 = vadd.f32 %v2576_v33, %v5524_v12  ;;  %v5619_v13 = vpop.f32.mrf.mxu1 }
 0x486   : > { %v2168_v61 = vpop.f32.mrf.mxu0 }
 0x487   : > { %v2169_v23 = vadd.f32 %v2168_v61, %v4921_v51  ;;  %v2710_v48 = vadd.f32 %v5341_v8, %v2577_v37 }
 0x488   : > { %v2997_v17 = vpop.f32.mrf.mxu3 }
 0x489   : > { %v2998_v32 = vadd.f32 %v5577_v16, %v2997_v17  ;;  %3393 = vrot.lane.b32.xlu2 %v2169_v23, %s4263_s17  ;;  %v2774_v4 = vmax.f32 %v2710_v48, 0.0 }
 0x48b   : > { %3155 = vst.msk [vmem:[%s5583_s24 + $0x10] sm:$0xff] %vm3152_vm1, %v2998_v32 }
 0x48c   : > { %3476 = vst.msk [vmem:[%s5583_s24 + $0x10] sm:$0xff] %vm3473_vm2, %v3286_v0  ;;  %v2578_v7 = vpop.f32.mrf.mxu2 }
 0x48d   : > { %v2579_v42 = vadd.f32 %v2578_v7, %v5543_v39  ;;  %v3288_v39 = vpop.permute.xlu1 %3287  ;;  %v5635_v61 = vpop.f32.mrf.mxu1 }
 0x48e   : > { %v2170_v12 = vpop.f32.mrf.mxu0 }
 0x48f   : > { %v2711_v29 = vadd.f32 %v5341_v8, %v2579_v42  ;;  %v2171_v34 = vadd.f32 %v2170_v12, %v4921_v51 }
 0x490   : > { %v2999_v40 = vpop.f32.mrf.mxu3 }
 0x491   : > { %v2775_v36 = vmax.f32 %v2711_v29, 0.0  ;;  %v3000_v53 = vadd.f32 %v5577_v16, %v2999_v40  ;;  %3395 = vrot.lane.b32.xlu0 %v2171_v34, %s4263_s17  ;;  %2620 = vmatmul.bf16.gmra.mxu2 %v6145_v63 }
 0x492   : > { %2433 = vmatmul.bf16.gmra.mxu1 %v4186_v28 }
 0x493   : > { %v2828_v6 = vpack.c.bf16 %v2775_v36, %v2774_v4  ;;  %3156 = vst.msk [vmem:[%s5583_s24 + $0x18] sm:$0xff] %vm3152_vm1, %v3000_v53  ;;  %v6146_v53 = vpack.c.bf16 %v5272_v19, %v5269_v46 }
 0x494   : > { %3477 = vst.msk [vmem:[%s5583_s24 + $0x18] sm:$0xff] %vm3473_vm2, %v3288_v39  ;;  %v2581_v33 = vpop.f32.mrf.mxu2 }
 0x495   : > { %3994 = vmatmul.msk.bf16.gmra.mxu3 %vm2886_vm0, %v2828_v6  ;;  %v2582_v24 = vadd.f32 %v2581_v33, %v5551_v20  ;;  %v5646_v7 = vpop.f32.mrf.mxu1 }
 0x496   : > { %v2173_v23 = vpop.f32.mrf.mxu0 }
 0x497   : > { %v2174_v17 = vadd.f32 %v2173_v23, %v4921_v51  ;;  %v2712_v48 = vadd.f32 %v5341_v8, %v2582_v24 }
 0x498   : > { %v3002_v0 = vpop.f32.mrf.mxu3 }
 0x499   : > { %v3003_v37 = vadd.f32 %v5577_v16, %v3002_v0  ;;  %3397 = vrot.lane.b32.xlu1 %v2174_v17, %s4263_s17  ;;  %v2776_v40 = vmax.f32 %v2712_v48, 0.0  ;;  %v3294_v0 = vpop.permute.xlu0 %3293  ;;  %v4187_v48 = vld [vmem:[%s4408_s14 + $0xd0] sm:$0xff] }
 0x49b   : > { %3157 = vst.msk [vmem:[%s5583_s24 + $0x20] sm:$0xff] %vm3152_vm1, %v3003_v37 }
 0x49c   : > { %3478 = vst.msk [vmem:[%s5583_s24 + $0x20] sm:$0xff] %vm3473_vm2, %v3290_v30  ;;  %v2583_v32 = vpop.f32.mrf.mxu2 }
 0x49d   : > { %v2584_v42 = vadd.f32 %v2583_v32, %v5571_v15  ;;  %v3292_v15 = vpop.permute.xlu2 %3291  ;;  %v5662_v6 = vpop.f32.mrf.mxu1 }
 0x49e   : > { %v2175_v20 = vpop.f32.mrf.mxu0 }
 0x49f   : > { %v2713_v12 = vadd.f32 %v5341_v8, %v2584_v42  ;;  %v2176_v29 = vadd.f32 %v2175_v20, %v4921_v51 }
 0x4a0   : > { %v3004_v34 = vpop.f32.mrf.mxu3 }
 0x4a1   : > { %v2777_v4 = vmax.f32 %v2713_v12, 0.0  ;;  %v3005_v36 = vadd.f32 %v5577_v16, %v3004_v34  ;;  %3399 = vrot.lane.b32.xlu2 %v2176_v29, %s4263_s17  ;;  %2625 = vmatmul.bf16.gmra.mxu2 %v6146_v53 }
 0x4a2   : > { %2438 = vmatmul.bf16.gmra.mxu1 %v4187_v48 }
 0x4a3   : > { %v2829_v63 = vpack.c.bf16 %v2777_v4, %v2776_v40  ;;  %3158 = vst.msk [vmem:[%s5583_s24 + $0x28] sm:$0xff] %vm3152_vm1, %v3005_v36  ;;  %v6147_v40 = vpack.c.bf16 %v5296_v58, %v5293_v38 }
 0x4a4   : > { %3479 = vst.msk [vmem:[%s5583_s24 + $0x28] sm:$0xff] %vm3473_vm2, %v3292_v15  ;;  %v2586_v39 = vpop.f32.mrf.mxu2 }
 0x4a5   : > { %3995 = vmatmul.msk.bf16.gmra.mxu3 %vm2886_vm0, %v2829_v63  ;;  %v2587_v46 = vadd.f32 %v2586_v39, %v5592_v2  ;;  %v5673_v24 = vpop.f32.mrf.mxu1 }
 0x4a6   : > { %v2178_v33 = vpop.f32.mrf.mxu0 }
 0x4a7   : > { %v2179_v23 = vadd.f32 %v2178_v33, %v4921_v51  ;;  %v2714_v37 = vadd.f32 %v5341_v8, %v2587_v46  ;;  %v3298_v33 = vpop.permute.xlu2 %3297 }
 0x4a8   : > { %v3007_v17 = vpop.f32.mrf.mxu3 }
 0x4a9   : > { %v3008_v19 = vadd.f32 %v5577_v16, %v3007_v17  ;;  %3401 = vrot.lane.b32.xlu0 %v2179_v23, %s4263_s17  ;;  %v2778_v12 = vmax.f32 %v2714_v37, 0.0 }
 0x4ab   : > { %3159 = vst.msk [vmem:[%s5583_s24 + $0x30] sm:$0xff] %vm3152_vm1, %v3008_v19 }
 0x4ac   : > { %3480 = vst.msk [vmem:[%s5583_s24 + $0x30] sm:$0xff] %vm3473_vm2, %v3294_v0  ;;  %v2588_v30 = vpop.f32.mrf.mxu2  ;;  %v4188_v0 = vld [vmem:[%s4408_s14 + $0xd8] sm:$0xff] }
 0x4ad   : > { %v2589_v32 = vadd.f32 %v2588_v30, %v5608_v31  ;;  %v3296_v31 = vpop.permute.xlu1 %3295  ;;  %v5689_v53 = vpop.f32.mrf.mxu1 }
 0x4ae   : > { %v2180_v2 = vpop.f32.mrf.mxu0 }
 0x4af   : > { %v2715_v42 = vadd.f32 %v5341_v8, %v2589_v32  ;;  %v2181_v28 = vadd.f32 %v2180_v2, %v4921_v51 }
 0x4b0   : > { %v3009_v20 = vpop.f32.mrf.mxu3 }
 0x4b1   : > { %v2779_v29 = vmax.f32 %v2715_v42, 0.0  ;;  %v3010_v34 = vadd.f32 %v5577_v16, %v3009_v20  ;;  %3403 = vrot.lane.b32.xlu1 %v2181_v28, %s4263_s17  ;;  %2630 = vmatmul.bf16.gmra.mxu2 %v6147_v40  ;;  %v6148_v28 = vpack.c.bf16 %v5322_v56, %v5319_v27 }
 0x4b2   : > { %2443 = vmatmul.bf16.gmra.mxu1 %v4188_v0 }
 0x4b3   : > { %v2830_v4 = vpack.c.bf16 %v2779_v29, %v2778_v12  ;;  %3160 = vst.msk [vmem:[%s5583_s24 + $0x38] sm:$0xff] %vm3152_vm1, %v3010_v34 }
 0x4b4   : > { %3481 = vst.msk [vmem:[%s5583_s24 + $0x38] sm:$0xff] %vm3473_vm2, %v3296_v31  ;;  %v2591_v36 = vpop.f32.mrf.mxu2 }
 0x4b5   : > { %3996 = vmatmul.msk.bf16.gmra.mxu3 %vm2886_vm0, %v2830_v4  ;;  %v2592_v38 = vadd.f32 %v2591_v36, %v5619_v13  ;;  %v5700_v17 = vpop.f32.mrf.mxu1  ;;  %v3302_v31 = vpop.permute.xlu1 %3301 }
 0x4b6   : > { %v2183_v15 = vpop.f32.mrf.mxu0 }
 0x4b7   : > { %v2184_v63 = vadd.f32 %v2183_v15, %v4921_v51  ;;  %v2716_v46 = vadd.f32 %v5341_v8, %v2592_v38  ;;  %v4189_v15 = vld [vmem:[%s4408_s14 + $0xe0] sm:$0xff] }
 0x4b8   : > { %v3012_v39 = vpop.f32.mrf.mxu3 }
 0x4b9   : > { %v3013_v58 = vadd.f32 %v5577_v16, %v3012_v39  ;;  %3405 = vrot.lane.b32.xlu2 %v2184_v63, %s4263_s17  ;;  %v2780_v48 = vmax.f32 %v2716_v46, 0.0 }
 0x4bb   : > { %3161 = vst.msk [vmem:[%s5583_s24 + $0x40] sm:$0xff] %vm3152_vm1, %v3013_v58 }
 0x4bc   : > { %3482 = vst.msk [vmem:[%s5583_s24 + $0x40] sm:$0xff] %vm3473_vm2, %v3298_v33  ;;  %v2593_v23 = vpop.f32.mrf.mxu2  ;;  %v3304_v33 = vpop.permute.xlu2 %3303 }
 0x4bd   : > { %v2594_v19 = vadd.f32 %v2593_v23, %v5635_v61  ;;  %v3300_v61 = vpop.permute.xlu0 %3299  ;;  %v2391_v12 = vpop.f32.mrf.mxu1 }
 0x4be   : > { %v2185_v13 = vpop.f32.mrf.mxu0 }
 0x4bf   : > { %v2717_v30 = vadd.f32 %v5341_v8, %v2594_v19  ;;  %v2186_v37 = vadd.f32 %v2185_v13, %v4921_v51 }
 0x4c0   : > { %v3014_v32 = vpop.f32.mrf.mxu3 }
 0x4c1   : > { %v2781_v2 = vmax.f32 %v2717_v30, 0.0  ;;  %v3015_v42 = vadd.f32 %v5577_v16, %v3014_v32  ;;  %3407 = vrot.lane.b32.xlu0 %v2186_v37, %s4263_s17  ;;  %2635 = vmatmul.bf16.gmra.mxu2 %v6148_v28  ;;  %v4190_v32 = vld [vmem:[%s4408_s14 + $0xe8] sm:$0xff] }
 0x4c2   : > { %2448 = vmatmul.bf16.gmra.mxu1 %v4189_v15 }
 0x4c3   : > { %v2831_v20 = vpack.c.bf16 %v2781_v2, %v2780_v48  ;;  %3162 = vst.msk [vmem:[%s5583_s24 + $0x48] sm:$0xff] %vm3152_vm1, %v3015_v42 }
 0x4c4   : > { %3483 = vst.msk [vmem:[%s5583_s24 + $0x48] sm:$0xff] %vm3473_vm2, %v3300_v61  ;;  %v2596_v51 = vpop.f32.mrf.mxu2  ;;  %v3308_v61 = vpop.permute.xlu1 %3307 }
 0x4c5   : > { %3997 = vmatmul.msk.bf16.gmra.mxu3 %vm2886_vm0, %v2831_v20  ;;  %v2597_v34 = vadd.f32 %v2596_v51, %v5646_v7  ;;  %v5723_v56 = vpop.f32.mrf.mxu1  ;;  %v3306_v30 = vpop.permute.xlu0 %3305 }
 0x4c7   : > { %v2718_v4 = vadd.f32 %v5341_v8, %v2597_v34 }
 0x4c8   : > { %v3017_v29 = vpop.f32.mrf.mxu3 }
 0x4c9   : > { %v3018_v40 = vadd.f32 %v5577_v16, %v3017_v29  ;;  %v2782_v39 = vmax.f32 %v2718_v4, 0.0  ;;  %v4191_v4 = vld [vmem:[%s4408_s14 + $0xf0] sm:$0xff] }
 0x4cb   : > { %3163 = vst.msk [vmem:[%s5583_s24 + $0x50] sm:$0xff] %vm3152_vm1, %v3018_v40 }
 0x4cc   : > { %3484 = vst.msk [vmem:[%s5583_s24 + $0x50] sm:$0xff] %vm3473_vm2, %v3302_v31  ;;  %v2598_v27 = vpop.f32.mrf.mxu2  ;;  %v3310_v31 = vpop.permute.xlu2 %3309 }
 0x4cd   : > { %v2599_v36 = vadd.f32 %v2598_v27, %v5662_v6  ;;  %v2396_v46 = vpop.f32.mrf.mxu1 }
 0x4cf   : > { %v2719_v7 = vadd.f32 %v5341_v8, %v2599_v36 }
 0x4d0   : > { %v3019_v63 = vpop.f32.mrf.mxu3 }
 0x4d1   : > { %v2783_v38 = vmax.f32 %v2719_v7, 0.0  ;;  %v3020_v58 = vadd.f32 %v5577_v16, %v3019_v63  ;;  %2640 = vmatmul.bf16.gmra.mxu2 %v2211_v45 }
 0x4d2   : > { %2453 = vmatmul.bf16.gmra.mxu1 %v4190_v32 }
 0x4d3   : > { %v2832_v23 = vpack.c.bf16 %v2783_v38, %v2782_v39  ;;  %3164 = vst.msk [vmem:[%s5583_s24 + $0x58] sm:$0xff] %vm3152_vm1, %v3020_v58  ;;  %v3312_v39 = vpop.permute.xlu0 %3311 }
 0x4d4   : > { %3485 = vst.msk [vmem:[%s5583_s24 + $0x58] sm:$0xff] %vm3473_vm2, %v3304_v33  ;;  %v2601_v6 = vpop.f32.mrf.mxu2  ;;  %v3316_v32 = vpop.permute.xlu2 %3315 }
 0x4d5   : > { %3998 = vmatmul.msk.bf16.gmra.mxu3 %vm2886_vm0, %v2832_v23  ;;  %v2602_v0 = vadd.f32 %v2601_v6, %v5673_v24  ;;  %v5744_v11 = vpop.f32.mrf.mxu1 }
 0x4d7   : > { %v2720_v45 = vadd.f32 %v5341_v8, %v2602_v0 }
 0x4d8   : > { %v3022_v19 = vpop.f32.mrf.mxu3 }
 0x4d9   : > { %v3023_v13 = vadd.f32 %v5577_v16, %v3022_v19  ;;  %v2784_v2 = vmax.f32 %v2720_v45, 0.0  ;;  %v3314_v19 = vpop.permute.xlu1 %3313 }
 0x4db   : > { %3165 = vst.msk [vmem:[%s5583_s24 + $0x60] sm:$0xff] %vm3152_vm1, %v3023_v13  ;;  %v4192_v13 = vld [vmem:[%s4408_s14 + $0xf8] sm:$0xff] }
 0x4dc   : > { %3486 = vst.msk [vmem:[%s5583_s24 + $0x60] sm:$0xff] %vm3473_vm2, %v3306_v30  ;;  %v2603_v62 = vpop.f32.mrf.mxu2 }
 0x4dd   : > { %v2604_v37 = vadd.f32 %v2603_v62, %v5689_v53  ;;  %v2401_v51 = vpop.f32.mrf.mxu1 }
 0x4df   : > { %v2721_v24 = vadd.f32 %v5341_v8, %v2604_v37 }
 0x4e0   : > { %v3024_v48 = vpop.f32.mrf.mxu3 }
 0x4e1   : > { %v2785_v42 = vmax.f32 %v2721_v24, 0.0  ;;  %v3025_v28 = vadd.f32 %v5577_v16, %v3024_v48  ;;  %2645 = vmatmul.bf16.gmra.mxu2 %v2212_v54 }
 0x4e2   : > { %2458 = vmatmul.bf16.gmra.mxu1 %v4191_v4 }
 0x4e3   : > { %v2833_v20 = vpack.c.bf16 %v2785_v42, %v2784_v2  ;;  %3166 = vst.msk [vmem:[%s5583_s24 + $0x68] sm:$0xff] %vm3152_vm1, %v3025_v28 }
 0x4e4   : > { %3487 = vst.msk [vmem:[%s5583_s24 + $0x68] sm:$0xff] %vm3473_vm2, %v3308_v61  ;;  %v2606_v53 = vpop.f32.mrf.mxu2  ;;  %v3318_v61 = vpop.permute.xlu0 %3317 }
 0x4e5   : > { %3999 = vmatmul.msk.bf16.gmra.mxu3 %vm2886_vm0, %v2833_v20  ;;  %v2607_v34 = vadd.f32 %v2606_v53, %v5700_v17  ;;  %v5765_v35 = vpop.f32.mrf.mxu1 }
 0x4e7   : > { %v2722_v54 = vadd.f32 %v5341_v8, %v2607_v34 }
 0x4e8   : > { %v3027_v29 = vpop.f32.mrf.mxu3 }
 0x4e9   : > { %v3028_v40 = vadd.f32 %v5577_v16, %v3027_v29  ;;  %v2786_v15 = vmax.f32 %v2722_v54, 0.0 }
 0x4eb   : > { %3167 = vst.msk [vmem:[%s5583_s24 + $0x70] sm:$0xff] %vm3152_vm1, %v3028_v40 }
 0x4ec   : > { %3488 = vst.msk [vmem:[%s5583_s24 + $0x70] sm:$0xff] %vm3473_vm2, %v3310_v31  ;;  %v2608_v25 = vpop.f32.mrf.mxu2  ;;  %v3320_v31 = vpop.permute.xlu1 %3319 }
 0x4ed   : > { %v2609_v27 = vadd.f32 %v2608_v25, %v2391_v12  ;;  %v2406_v58 = vpop.f32.mrf.mxu1 }
 0x4ef   : > { %v2723_v36 = vadd.f32 %v5341_v8, %v2609_v27 }
 0x4f0   : > { %v3029_v17 = vpop.f32.mrf.mxu3 }
 0x4f1   : > { %v2787_v7 = vmax.f32 %v2723_v36, 0.0  ;;  %v3030_v63 = vadd.f32 %v5577_v16, %v3029_v17  ;;  %2650 = vmatmul.bf16.gmra.mxu2 %v2213_v10  ;;  %v3322_v36 = vpop.permute.xlu2 %3321 }
 0x4f2   : > { %2463 = vmatmul.bf16.gmra.mxu1 %v4192_v13 }
 0x4f3   : > { %v2834_v38 = vpack.c.bf16 %v2787_v7, %v2786_v15  ;;  %3168 = vst.msk [vmem:[%s5583_s24 + $0x78] sm:$0xff] %vm3152_vm1, %v3030_v63 }
 0x4f4   : > { %3489 = vst.msk [vmem:[%s5583_s24 + $0x78] sm:$0xff] %vm3473_vm2, %v3312_v39  ;;  %v2611_v12 = vpop.f32.mrf.mxu2 }
 0x4f5   : > { %4000 = vmatmul.msk.bf16.gmra.mxu3 %vm2886_vm0, %v2834_v38  ;;  %v2612_v23 = vadd.f32 %v2611_v12, %v5723_v56  ;;  %v5785_v26 = vpop.f32.mrf.mxu1  ;;  %v3324_v12 = vpop.permute.xlu0 %3323 }
 0x4f7   : > { %v2724_v10 = vadd.f32 %v5341_v8, %v2612_v23 }
 0x4f8   : > { %v3032_v33 = vpop.f32.mrf.mxu3 }
 0x4f9   : > { %v3033_v6 = vadd.f32 %v5577_v16, %v3032_v33  ;;  %v2788_v62 = vmax.f32 %v2724_v10, 0.0  ;;  %v3326_v10 = vpop.permute.xlu1 %3325 }
 0x4fb   : > { %3169 = vst.msk [vmem:[%s5583_s24 + $0x80] sm:$0xff] %vm3152_vm1, %v3033_v6 }
 0x4fc   : > { %3490 = vst.msk [vmem:[%s5583_s24 + $0x80] sm:$0xff] %vm3473_vm2, %v3314_v19  ;;  %v2613_v14 = vpop.f32.mrf.mxu2 }
 0x4fd   : > { %v2614_v0 = vadd.f32 %v2613_v14, %v2396_v46  ;;  %v2411_v48 = vpop.f32.mrf.mxu1 }
 0x4ff   : > { %v2725_v30 = vadd.f32 %v5341_v8, %v2614_v0 }
 0x500   : > { %v3034_v56 = vpop.f32.mrf.mxu3 }
 0x501   : > { %v2789_v45 = vmax.f32 %v2725_v30, 0.0  ;;  %v3035_v37 = vadd.f32 %v5577_v16, %v3034_v56  ;;  %2655 = vmatmul.bf16.gmra.mxu2 %v2214_v55 }
 0x503   : > { %v2835_v24 = vpack.c.bf16 %v2789_v45, %v2788_v62  ;;  %3170 = vst.msk [vmem:[%s5583_s24 + $0x88] sm:$0xff] %vm3152_vm1, %v3035_v37  ;;  %v3328_v45 = vpop.permute.xlu2 %3327 }
 0x504   : > { %3491 = vst.msk [vmem:[%s5583_s24 + $0x88] sm:$0xff] %vm3473_vm2, %v3316_v32  ;;  %v2616_v46 = vpop.f32.mrf.mxu2 }
 0x505   : > { %4001 = vmatmul.msk.bf16.gmra.mxu3 %vm2886_vm0, %v2835_v24  ;;  %v2617_v42 = vadd.f32 %v2616_v46, %v5744_v11  ;;  %v5805_v59 = vpop.f32.mrf.mxu1 }
 0x507   : > { %v2726_v55 = vadd.f32 %v5341_v8, %v2617_v42 }
 0x508   : > { %v3037_v2 = vpop.f32.mrf.mxu3 }
 0x509   : > { %v3038_v28 = vadd.f32 %v5577_v16, %v3037_v2  ;;  %v2790_v11 = vmax.f32 %v2726_v55, 0.0  ;;  %v3330_v2 = vpop.permute.xlu0 %3329 }
 0x50b   : > { %3171 = vst.msk [vmem:[%s5583_s24 + $0x90] sm:$0xff] %vm3152_vm1, %v3038_v28 }
 0x50c   : > { %3492 = vst.msk [vmem:[%s5583_s24 + $0x90] sm:$0xff] %vm3473_vm2, %v3318_v61  ;;  %v2618_v5 = vpop.f32.mrf.mxu2 }
 0x50d   : > { %v2619_v20 = vadd.f32 %v2618_v5, %v2401_v51  ;;  %v2416_v54 = vpop.f32.mrf.mxu1 }
 0x50f   : > { %v2727_v53 = vadd.f32 %v5341_v8, %v2619_v20  ;;  %v3332_v20 = vpop.permute.xlu1 %3331 }
 0x510   : > { %v3039_v29 = vpop.f32.mrf.mxu3 }
 0x511   : > { %v2791_v34 = vmax.f32 %v2727_v53, 0.0  ;;  %v3040_v40 = vadd.f32 %v5577_v16, %v3039_v29  ;;  %2660 = vmatmul.bf16.gmra.mxu2 %v2215_v50 }
 0x513   : > { %v2836_v25 = vpack.c.bf16 %v2791_v34, %v2790_v11  ;;  %3172 = vst.msk [vmem:[%s5583_s24 + $0x98] sm:$0xff] %vm3152_vm1, %v3040_v40 }
 0x514   : > { %3493 = vst.msk [vmem:[%s5583_s24 + $0x98] sm:$0xff] %vm3473_vm2, %v3320_v31  ;;  %v2621_v51 = vpop.f32.mrf.mxu2 }
 0x515   : > { %4002 = vmatmul.msk.bf16.gmra.mxu3 %vm2886_vm0, %v2836_v25  ;;  %v2622_v27 = vadd.f32 %v2621_v51, %v5765_v35  ;;  %v2419_v15 = vpop.f32.mrf.mxu1  ;;  %v3334_v25 = vpop.permute.xlu2 %3333 }
 0x517   : > { %v2728_v50 = vadd.f32 %v5827_v41, %v2622_v27 }
 0x518   : > { %v3042_v8 = vpop.f32.mrf.mxu3 }
 0x519   : > { %v3043_v4 = vadd.f32 %v5577_v16, %v3042_v8  ;;  %v2792_v63 = vmax.f32 %v2728_v50, 0.0 }
 0x51b   : > { %3173 = vst.msk [vmem:[%s5583_s24 + $0xa0] sm:$0xff] %vm3152_vm1, %v3043_v4 }
 0x51c   : > { %3494 = vst.msk [vmem:[%s5583_s24 + $0xa0] sm:$0xff] %vm3473_vm2, %v3322_v36  ;;  %v2623_v57 = vpop.f32.mrf.mxu2 }
 0x51d   : > { %v2624_v17 = vadd.f32 %v2623_v57, %v2406_v58  ;;  %v2421_v6 = vpop.f32.mrf.mxu1  ;;  %v3336_v57 = vpop.permute.xlu0 %3335 }
 0x51f   : > { %v2729_v35 = vadd.f32 %v5827_v41, %v2624_v17 }
 0x520   : > { %v3044_v7 = vpop.f32.mrf.mxu3 }
 0x521   : > { %v2793_v39 = vmax.f32 %v2729_v35, 0.0  ;;  %v3045_v38 = vadd.f32 %v5577_v16, %v3044_v7  ;;  %2665 = vmatmul.bf16.gmra.mxu2 %v2216_v18 }
 0x523   : > { %v2837_v33 = vpack.c.bf16 %v2793_v39, %v2792_v63  ;;  %3174 = vst.msk [vmem:[%s5583_s24 + $0xa8] sm:$0xff] %vm3152_vm1, %v3045_v38  ;;  %v3338_v39 = vpop.permute.xlu1 %3337 }
 0x524   : > { %3495 = vst.msk [vmem:[%s5583_s24 + $0xa8] sm:$0xff] %vm3473_vm2, %v3324_v12  ;;  %v2626_v58 = vpop.f32.mrf.mxu2 }
 0x525   : > { %4003 = vmatmul.msk.bf16.gmra.mxu3 %vm2886_vm0, %v2837_v33  ;;  %v2627_v19 = vadd.f32 %v2626_v58, %v5785_v26  ;;  %v2424_v62 = vpop.f32.mrf.mxu1 }
 0x527   : > { %v2730_v49 = vadd.f32 %v5827_v41, %v2627_v19 }
 0x528   : > { %v3047_v23 = vpop.f32.mrf.mxu3 }
 0x529   : > { %v3048_v14 = vadd.f32 %v5577_v16, %v3047_v23  ;;  %v2794_v30 = vmax.f32 %v2730_v49, 0.0 }
 0x52b   : > { %3175 = vst.msk [vmem:[%s5583_s24 + $0xb0] sm:$0xff] %vm3152_vm1, %v3048_v14 }
 0x52c   : > { %3496 = vst.msk [vmem:[%s5583_s24 + $0xb0] sm:$0xff] %vm3473_vm2, %v3326_v10  ;;  %v2628_v60 = vpop.f32.mrf.mxu2 }
 0x52d   : > { %v2629_v18 = vadd.f32 %v2628_v60, %v2411_v48  ;;  %v2426_v43 = vpop.f32.mrf.mxu1 }
 0x52f   : > { %v2731_v0 = vadd.f32 %v5827_v41, %v2629_v18 }
 0x530   : > { %v3049_v13 = vpop.f32.mrf.mxu3 }
 0x531   : > { %v2795_v26 = vmax.f32 %v2731_v0, 0.0  ;;  %v3050_v56 = vadd.f32 %v5577_v16, %v3049_v13  ;;  %2670 = vmatmul.bf16.gmra.mxu2 %v2217_v22  ;;  %v3342_v0 = vpop.permute.xlu0 %3341 }
 0x533   : > { %v2838_v37 = vpack.c.bf16 %v2795_v26, %v2794_v30  ;;  %3176 = vst.msk [vmem:[%s5583_s24 + $0xb8] sm:$0xff] %vm3152_vm1, %v3050_v56 }
 0x534   : > { %3497 = vst.msk [vmem:[%s5583_s24 + $0xb8] sm:$0xff] %vm3473_vm2, %v3328_v45  ;;  %v2631_v32 = vpop.f32.mrf.mxu2 }
 0x535   : > { %4004 = vmatmul.msk.bf16.gmra.mxu3 %vm2886_vm0, %v2838_v37  ;;  %v2632_v46 = vadd.f32 %v2631_v32, %v5805_v59  ;;  %v2429_v11 = vpop.f32.mrf.mxu1 }
 0x537   : > { %v2732_v22 = vadd.f32 %v5827_v41, %v2632_v46  ;;  %v3344_v46 = vpop.permute.xlu1 %3343 }
 0x538   : > { %v3052_v24 = vpop.f32.mrf.mxu3 }
 0x539   : > { %v3053_v48 = vadd.f32 %v5577_v16, %v3052_v24  ;;  %v2796_v5 = vmax.f32 %v2732_v22, 0.0 }
 0x53b   : > { %3177 = vst.msk [vmem:[%s5583_s24 + $0xc0] sm:$0xff] %vm3152_vm1, %v3053_v48 }
 0x53c   : > { %3498 = vst.msk [vmem:[%s5583_s24 + $0xc0] sm:$0xff] %vm3473_vm2, %v3330_v2  ;;  %v2633_v1 = vpop.f32.mrf.mxu2 }
 0x53d   : > { %v2634_v42 = vadd.f32 %v2633_v1, %v2416_v54  ;;  %v2431_v8 = vpop.f32.mrf.mxu1 }
 0x53f   : > { %v2733_v28 = vadd.f32 %v5827_v41, %v2634_v42 }
 0x540   : > { %v3054_v61 = vpop.f32.mrf.mxu3 }
 0x541   : > { %v2797_v59 = vmax.f32 %v2733_v28, 0.0  ;;  %v3055_v55 = vadd.f32 %v5577_v16, %v3054_v61  ;;  %2675 = vmatmul.bf16.gmra.mxu2 %v2218_v9 }
 0x543   : > { %v2839_v53 = vpack.c.bf16 %v2797_v59, %v2796_v5  ;;  %3178 = vst.msk [vmem:[%s5583_s24 + $0xc8] sm:$0xff] %vm3152_vm1, %v3055_v55 }
 0x544   : > { %3499 = vst.msk [vmem:[%s5583_s24 + $0xc8] sm:$0xff] %vm3473_vm2, %v3332_v20  ;;  %v2636_v29 = vpop.f32.mrf.mxu2 }
 0x545   : > { %4005 = vmatmul.msk.bf16.gmra.mxu3 %vm2886_vm0, %v2839_v53  ;;  %v2637_v40 = vadd.f32 %v2636_v29, %v2419_v15  ;;  %v2434_v63 = vpop.f32.mrf.mxu1 }
 0x547   : > { %v2734_v47 = vadd.f32 %v5827_v41, %v2637_v40  ;;  %v3348_v40 = vpop.permute.xlu0 %3347 }
 0x548   : > { %v3057_v34 = vpop.f32.mrf.mxu3 }
 0x549   : > { %v3058_v31 = vadd.f32 %v5577_v16, %v3057_v34  ;;  %v2798_v27 = vmax.f32 %v2734_v47, 0.0 }
 0x54b   : > { %3179 = vst.msk [vmem:[%s5583_s24 + $0xd0] sm:$0xff] %vm3152_vm1, %v3058_v31 }
 0x54c   : > { %3500 = vst.msk [vmem:[%s5583_s24 + $0xd0] sm:$0xff] %vm3473_vm2, %v3334_v25  ;;  %v2638_v3 = vpop.f32.mrf.mxu2 }
 0x54d   : > { %v2639_v9 = vadd.f32 %v2638_v3, %v2421_v6  ;;  %v3340_v6 = vpop.permute.xlu2 %3339  ;;  %v2436_v10 = vpop.f32.mrf.mxu1 }
 0x54f   : > { %v2735_v51 = vadd.f32 %v5827_v41, %v2639_v9 }
 0x550   : > { %v3059_v54 = vpop.f32.mrf.mxu3 }
 0x551   : > { %v2799_v4 = vmax.f32 %v2735_v51, 0.0  ;;  %v3060_v36 = vadd.f32 %v5577_v16, %v3059_v54  ;;  %2680 = vmatmul.bf16.gmra.mxu2 %v2219_v52  ;;  %v3350_v51 = vpop.permute.xlu1 %3349 }
 0x553   : > { %v2840_v50 = vpack.c.bf16 %v2799_v4, %v2798_v27  ;;  %3180 = vst.msk [vmem:[%s5583_s24 + $0xd8] sm:$0xff] %vm3152_vm1, %v3060_v36 }
 0x554   : > { %3501 = vst.msk [vmem:[%s5583_s24 + $0xd8] sm:$0xff] %vm3473_vm2, %v3336_v57  ;;  %v2641_v17 = vpop.f32.mrf.mxu2 }
 0x555   : > { %4006 = vmatmul.msk.bf16.gmra.mxu3 %vm2886_vm0, %v2840_v50  ;;  %v2642_v35 = vadd.f32 %v2641_v17, %v2424_v62  ;;  %v2439_v56 = vpop.f32.mrf.mxu1  ;;  %v3346_v28 = vpop.permute.xlu2 %3345 }
 0x557   : > { %v2736_v44 = vadd.f32 %v5827_v41, %v2642_v35 }
 0x558   : > { %v3062_v15 = vpop.f32.mrf.mxu3 }
 0x559   : > { %v3063_v7 = vadd.f32 %v5577_v16, %v3062_v15  ;;  %v2800_v33 = vmax.f32 %v2736_v44, 0.0 }
 0x55b   : > { %3181 = vst.msk [vmem:[%s5583_s24 + $0xe0] sm:$0xff] %vm3152_vm1, %v3063_v7 }
 0x55c   : > { %3502 = vst.msk [vmem:[%s5583_s24 + $0xe0] sm:$0xff] %vm3473_vm2, %v3338_v39  ;;  %v2643_v21 = vpop.f32.mrf.mxu2 }
 0x55d   : > { %v2644_v52 = vadd.f32 %v2643_v21, %v2426_v43  ;;  %v2441_v43 = vpop.f32.mrf.mxu1  ;;  %v3352_v35 = vpop.permute.xlu2 %3351 }
 0x55f   : > { %v2737_v38 = vadd.f32 %v5827_v41, %v2644_v52 }
 0x560   : > { %v3064_v12 = vpop.f32.mrf.mxu3 }
 0x561   : > { %v2801_v58 = vmax.f32 %v2737_v38, 0.0  ;;  %v3065_v23 = vadd.f32 %v5577_v16, %v3064_v12  ;;  %v3354_v38 = vpop.permute.xlu0 %3353 }
 0x563   : > { %v2841_v19 = vpack.c.bf16 %v2801_v58, %v2800_v33  ;;  %3182 = vst.msk [vmem:[%s5583_s24 + $0xe8] sm:$0xff] %vm3152_vm1, %v3065_v23 }
 0x564   : > { %3503 = vst.msk [vmem:[%s5583_s24 + $0xe8] sm:$0xff] %vm3473_vm2, %v3340_v6  ;;  %v2646_v14 = vpop.f32.mrf.mxu2 }
 0x565   : > { %4007 = vmatmul.msk.bf16.gmra.mxu3 %vm2886_vm0, %v2841_v19  ;;  %v2647_v49 = vadd.f32 %v2646_v14, %v2429_v11  ;;  %v2444_v34 = vpop.f32.mrf.mxu1 }
 0x567   : > { %v2738_v30 = vadd.f32 %v5827_v41, %v2647_v49  ;;  %v3356_v49 = vpop.permute.xlu1 %3355 }
 0x568   : > { %v3067_v60 = vpop.f32.mrf.mxu3 }
 0x569   : > { %v3068_v18 = vadd.f32 %v5577_v16, %v3067_v60  ;;  %v2802_v37 = vmax.f32 %v2738_v30, 0.0 }
 0x56b   : > { %3183 = vst.msk [vmem:[%s5583_s24 + $0xf0] sm:$0xff] %vm3152_vm1, %v3068_v18 }
 0x56c   : > { %3504 = vst.msk [vmem:[%s5583_s24 + $0xf0] sm:$0xff] %vm3473_vm2, %v3342_v0  ;;  %v2648_v13 = vpop.f32.mrf.mxu2 }
 0x56d   : > { %v2649_v26 = vadd.f32 %v2648_v13, %v2431_v8  ;;  %v2446_v8 = vpop.f32.mrf.mxu1 }
 0x56f   : > { %v2739_v62 = vadd.f32 %v5827_v41, %v2649_v26 }
 0x570   : > { %v3069_v45 = vpop.f32.mrf.mxu3 }
 0x571   : > { %v2803_v32 = vmax.f32 %v2739_v62, 0.0  ;;  %v3070_v24 = vadd.f32 %v5577_v16, %v3069_v45  ;;  %v3358_v62 = vpop.permute.xlu2 %3357 }
 0x573   : > { %v2842_v48 = vpack.c.bf16 %v2803_v32, %v2802_v37  ;;  %3184 = vst.msk [vmem:[%s5583_s24 + $0xf8] sm:$0xff] %vm3152_vm1, %v3070_v24 }
 0x574   : > { %3505 = vst.msk [vmem:[%s5583_s24 + $0xf8] sm:$0xff] %vm3473_vm2, %v3344_v46  ;;  %v2651_v2 = vpop.f32.mrf.mxu2 }
 0x575   : > { %4008 = vmatmul.msk.bf16.gmra.mxu3 %vm2886_vm0, %v2842_v48  ;;  %v2652_v22 = vadd.f32 %v2651_v2, %v2434_v63  ;;  %v2449_v39 = vpop.f32.mrf.mxu1 }
 0x577   : > { %v2740_v5 = vadd.f32 %v5827_v41, %v2652_v22 }
 0x578   : > { %v3072_v1 = vpop.f32.mrf.mxu3 }
 0x579   : > { %v3073_v42 = vadd.f32 %v5577_v16, %v3072_v1  ;;  %v2804_v53 = vmax.f32 %v2740_v5, 0.0 }
 0x57b   : > { %3185 = vst.msk [vmem:[%s5583_s24 + $0x100] sm:$0xff] %vm3152_vm1, %v3073_v42 }
 0x57c   : > { %3506 = vst.msk [vmem:[%s5583_s24 + $0x100] sm:$0xff] %vm3473_vm2, %v3346_v28  ;;  %v2653_v61 = vpop.f32.mrf.mxu2 }
 0x57d   : > { %v2654_v59 = vadd.f32 %v2653_v61, %v2436_v10  ;;  %v2451_v19 = vpop.f32.mrf.mxu1 }
 0x57f   : > { %v2741_v55 = vadd.f32 %v5827_v41, %v2654_v59 }
 0x580   : > { %v3074_v20 = vpop.f32.mrf.mxu3 }
 0x581   : > { %v2805_v29 = vmax.f32 %v2741_v55, 0.0  ;;  %v3075_v11 = vadd.f32 %v5577_v16, %v3074_v20  ;;  %v3362_v55 = vpop.permute.xlu1 %3361 }
 0x583   : > { %v2843_v31 = vpack.c.bf16 %v2805_v29, %v2804_v53  ;;  %3186 = vst.msk [vmem:[%s5583_s24 + $0x108] sm:$0xff] %vm3152_vm1, %v3075_v11 }
 0x584   : > { %3507 = vst.msk [vmem:[%s5583_s24 + $0x108] sm:$0xff] %vm3473_vm2, %v3348_v40  ;;  %v2656_v25 = vpop.f32.mrf.mxu2 }
 0x585   : > { %4009 = vmatmul.msk.bf16.gmra.mxu3 %vm2886_vm0, %v2843_v31  ;;  %v2657_v47 = vadd.f32 %v2656_v25, %v2439_v56  ;;  %v2454_v56 = vpop.f32.mrf.mxu1 }
 0x587   : > { %v2742_v27 = vadd.f32 %v5827_v41, %v2657_v47  ;;  %v3364_v47 = vpop.permute.xlu2 %3363 }
 0x588   : > { %v3077_v3 = vpop.f32.mrf.mxu3 }
 0x589   : > { %v3078_v9 = vadd.f32 %v5577_v16, %v3077_v3  ;;  %v2806_v50 = vmax.f32 %v2742_v27, 0.0 }
 0x58b   : > { %3187 = vst.msk [vmem:[%s5583_s24 + $0x110] sm:$0xff] %vm3152_vm1, %v3078_v9 }
 0x58c   : > { %3508 = vst.msk [vmem:[%s5583_s24 + $0x110] sm:$0xff] %vm3473_vm2, %v3350_v51  ;;  %v2658_v54 = vpop.f32.mrf.mxu2 }
 0x58d   : > { %v2659_v4 = vadd.f32 %v2658_v54, %v2441_v43  ;;  %v3360_v43 = vpop.permute.xlu0 %3359  ;;  %v2456_v42 = vpop.f32.mrf.mxu1 }
 0x58f   : > { %v2743_v36 = vadd.f32 %v5827_v41, %v2659_v4  ;;  %v5984_v4 = vld [vmem:[%s6128_s13] ss:$0 sm:$0xff] }
 0x590   : > { %v3079_v57 = vpop.f32.mrf.mxu3 }
 0x591   : > { %v2807_v17 = vmax.f32 %v2743_v36, 0.0  ;;  %v3080_v15 = vadd.f32 %v5577_v16, %v3079_v57 }
 0x593   : > { %v2844_v7 = vpack.c.bf16 %v2807_v17, %v2806_v50  ;;  %3188 = vst.msk [vmem:[%s5583_s24 + $0x118] sm:$0xff] %vm3152_vm1, %v3080_v15 }
 0x594   : > { %3509 = vst.msk [vmem:[%s5583_s24 + $0x118] sm:$0xff] %vm3473_vm2, %v3352_v35  ;;  %v2661_v63 = vpop.f32.mrf.mxu2 }
 0x595   : > { %4010 = vmatmul.msk.bf16.gmra.mxu3 %vm2886_vm0, %v2844_v7  ;;  %v2662_v44 = vadd.f32 %v2661_v63, %v2444_v34  ;;  %v2459_v11 = vpop.f32.mrf.mxu1  ;;  %v3366_v36 = vpop.permute.xlu0 %3365 }
 0x597   : > { %v2744_v33 = vadd.f32 %v5827_v41, %v2662_v44  ;;  %v3368_v44 = vpop.permute.xlu1 %3367 }
 0x598   : > { %v3082_v21 = vpop.f32.mrf.mxu3 }
 0x599   : > { %v3083_v52 = vadd.f32 %v5577_v16, %v3082_v21  ;;  %v2808_v14 = vmax.f32 %v2744_v33, 0.0 }
 0x59b   : > { %3189 = vst.msk [vmem:[%s5583_s24 + $0x120] sm:$0xff] %vm3152_vm1, %v3083_v52 }
 0x59c   : > { %3510 = vst.msk [vmem:[%s5583_s24 + $0x120] sm:$0xff] %vm3473_vm2, %v3354_v38  ;;  %v2663_v12 = vpop.f32.mrf.mxu2 }
 0x59d   : > { %v2664_v58 = vadd.f32 %v2663_v12, %v2446_v8  ;;  %v2461_v54 = vpop.f32.mrf.mxu1 }
 0x59f   : > { %v2745_v23 = vadd.f32 %v5827_v41, %v2664_v58 }
 0x5a0   : > { %v3084_v6 = vpop.f32.mrf.mxu3 }
 0x5a1   : > { %v2809_v10 = vmax.f32 %v2745_v23, 0.0  ;;  %v3085_v60 = vadd.f32 %v5577_v16, %v3084_v6  ;;  %v3370_v23 = vpop.permute.xlu2 %3369 }
 0x5a3   : > { %v2845_v18 = vpack.c.bf16 %v2809_v10, %v2808_v14  ;;  %3190 = vst.msk [vmem:[%s5583_s24 + $0x128] sm:$0xff] %vm3152_vm1, %v3085_v60 }
 0x5a4   : > { %3511 = vst.msk [vmem:[%s5583_s24 + $0x128] sm:$0xff] %vm3473_vm2, %v3356_v49  ;;  %v2666_v0 = vpop.f32.mrf.mxu2 }
 0x5a5   : > { %4011 = vmatmul.msk.bf16.gmra.mxu3 %vm2886_vm0, %v2845_v18  ;;  %v2667_v30 = vadd.f32 %v2666_v0, %v2449_v39  ;;  %v2464_v21 = vpop.f32.mrf.mxu1 }
 0x5a7   : > { %v2746_v37 = vadd.f32 %v5827_v41, %v2667_v30  ;;  %v3372_v30 = vpop.permute.xlu0 %3371 }
 0x5a8   : > { %v3087_v13 = vpop.f32.mrf.mxu3 }
 0x5a9   : > { %v3088_v26 = vadd.f32 %v5577_v16, %v3087_v13  ;;  %v2810_v48 = vmax.f32 %v2746_v37, 0.0 }
 0x5ab   : > { %3191 = vst.msk [vmem:[%s5583_s24 + $0x130] sm:$0xff] %vm3152_vm1, %v3088_v26 }
 0x5ac   : > { %3512 = vst.msk [vmem:[%s5583_s24 + $0x130] sm:$0xff] %vm3473_vm2, %v3358_v62  ;;  %v2668_v45 = vpop.f32.mrf.mxu2  ;;  %v3374_v62 = vpop.permute.xlu1 %3373 }
 0x5ad   : > { %v2669_v32 = vadd.f32 %v2668_v45, %v2451_v19  ;;  %v2466_v6 = vpop.f32.mrf.mxu1 }
 0x5af   : > { %v2747_v24 = vadd.f32 %v5827_v41, %v2669_v32  ;;  %v3376_v32 = vpop.permute.xlu2 %3375 }
 0x5b0   : > { %v3089_v46 = vpop.f32.mrf.mxu3 }
 0x5b1   : > { %v2811_v2 = vmax.f32 %v2747_v24, 0.0  ;;  %v3090_v1 = vadd.f32 %v5577_v16, %v3089_v46 }
 0x5b3   : > { %v2846_v22 = vpack.c.bf16 %v2811_v2, %v2810_v48  ;;  %3192 = vst.msk [vmem:[%s5583_s24 + $0x138] sm:$0xff] %vm3152_vm1, %v3090_v1  ;;  %v3378_v48 = vpop.permute.xlu0 %3377 }
 0x5b4   : > { %3513 = vst.msk [vmem:[%s5583_s24 + $0x138] sm:$0xff] %vm3473_vm2, %v3360_v43  ;;  %v2671_v28 = vpop.f32.mrf.mxu2  ;;  %v3380_v43 = vpop.permute.xlu1 %3379 }
 0x5b5   : > { %4012 = vmatmul.msk.bf16.gmra.mxu3 %vm2886_vm0, %v2846_v22  ;;  %v2672_v5 = vadd.f32 %v2671_v28, %v2454_v56 }
 0x5b7   : > { %v2748_v53 = vadd.f32 %v5827_v41, %v2672_v5  ;;  %v3382_v28 = vpop.permute.xlu2 %3381 }
 0x5b8   : > { %v3092_v61 = vpop.f32.mrf.mxu3 }
 0x5b9   : > { %v3093_v59 = vadd.f32 %v5577_v16, %v3092_v61  ;;  %v2812_v31 = vmax.f32 %v2748_v53, 0.0 }
 0x5bb   : > { %3193 = vst.msk [vmem:[%s5583_s24 + $0x140] sm:$0xff] %vm3152_vm1, %v3093_v59  ;;  %v3384_v59 = vpop.permute.xlu0 %3383 }
 0x5bc   : > { %3514 = vst.msk [vmem:[%s5583_s24 + $0x140] sm:$0xff] %vm3473_vm2, %v3362_v55  ;;  %v2673_v20 = vpop.f32.mrf.mxu2  ;;  %v3386_v53 = vpop.permute.xlu1 %3385 }
 0x5bd   : > { %v2674_v29 = vadd.f32 %v2673_v20, %v2456_v42 }
 0x5bf   : > { %v2749_v34 = vadd.f32 %v5827_v41, %v2674_v29 }
 0x5c0   : > { %v3094_v40 = vpop.f32.mrf.mxu3 }
 0x5c1   : > { %v2813_v25 = vmax.f32 %v2749_v34, 0.0  ;;  %v3095_v3 = vadd.f32 %v5577_v16, %v3094_v40  ;;  %v3388_v34 = vpop.permute.xlu2 %3387 }
 0x5c3   : > { %v2847_v9 = vpack.c.bf16 %v2813_v25, %v2812_v31  ;;  %3194 = vst.msk [vmem:[%s5583_s24 + $0x148] sm:$0xff] %vm3152_vm1, %v3095_v3  ;;  %v3390_v25 = vpop.permute.xlu0 %3389 }
 0x5c4   : > { %3515 = vst.msk [vmem:[%s5583_s24 + $0x148] sm:$0xff] %vm3473_vm2, %v3364_v47  ;;  %v2676_v51 = vpop.f32.mrf.mxu2 }
 0x5c5   : > { %4013 = vmatmul.msk.bf16.gmra.mxu3 %vm2886_vm0, %v2847_v9  ;;  %v2677_v27 = vadd.f32 %v2676_v51, %v2459_v11  ;;  %v3392_v9 = vpop.permute.xlu1 %3391 }
 0x5c7   : > { %v2750_v50 = vadd.f32 %v5827_v41, %v2677_v27 }
 0x5c8   : > { %v3097_v8 = vpop.f32.mrf.mxu3 }
 0x5c9   : > { %v3098_v16 = vadd.f32 %v5984_v4, %v3097_v8  ;;  %v2814_v7 = vmax.f32 %v2750_v50, 0.0  ;;  %v3394_v8 = vpop.permute.xlu2 %3393 }
 0x5cb   : > { %3195 = vst.msk [vmem:[%s5583_s24 + $0x150] sm:$0xff] %vm3152_vm1, %v3098_v16 }
 0x5cc   : > { %3516 = vst.msk [vmem:[%s5583_s24 + $0x150] sm:$0xff] %vm3473_vm2, %v3366_v36  ;;  %v2678_v57 = vpop.f32.mrf.mxu2  ;;  %v3396_v36 = vpop.permute.xlu0 %3395 }
 0x5cd   : > { %v2679_v17 = vadd.f32 %v2678_v57, %v2461_v54 }
 0x5cf   : > { %v2751_v15 = vadd.f32 %v5827_v41, %v2679_v17  ;;  %v3398_v17 = vpop.permute.xlu1 %3397 }
 0x5d0   : > { %v3099_v35 = vpop.f32.mrf.mxu3 }
 0x5d1   : > { %v2815_v63 = vmax.f32 %v2751_v15, 0.0  ;;  %v3100_v39 = vadd.f32 %v5984_v4, %v3099_v35 }
 0x5d3   : > { %v2848_v52 = vpack.c.bf16 %v2815_v63, %v2814_v7  ;;  %3196 = vst.msk [vmem:[%s5583_s24 + $0x158] sm:$0xff] %vm3152_vm1, %v3100_v39  ;;  %v3400_v7 = vpop.permute.xlu2 %3399 }
 0x5d4   : > { %3517 = vst.msk [vmem:[%s5583_s24 + $0x158] sm:$0xff] %vm3473_vm2, %v3368_v44  ;;  %v2681_v38 = vpop.f32.mrf.mxu2 }
 0x5d5   : > { %4014 = vmatmul.msk.bf16.gmra.mxu3 %vm2886_vm0, %v2848_v52  ;;  %v2682_v33 = vadd.f32 %v2681_v38, %v2464_v21  ;;  %v3402_v21 = vpop.permute.xlu0 %3401 }
 0x5d7   : > { %v2752_v14 = vadd.f32 %v5827_v41, %v2682_v33  ;;  %v3404_v38 = vpop.permute.xlu1 %3403 }
 0x5d8   : > { %v3102_v12 = vpop.f32.mrf.mxu3 }
 0x5d9   : > { %v3103_v58 = vadd.f32 %v5984_v4, %v3102_v12  ;;  %v2816_v18 = vmax.f32 %v2752_v14, 0.0 }
 0x5db   : > { %3197 = vst.msk [vmem:[%s5583_s24 + $0x160] sm:$0xff] %vm3152_vm1, %v3103_v58  ;;  %v3406_v58 = vpop.permute.xlu2 %3405 }
 0x5dc   : > { %3518 = vst.msk [vmem:[%s5583_s24 + $0x160] sm:$0xff] %vm3473_vm2, %v3370_v23  ;;  %v2683_v19 = vpop.f32.mrf.mxu2 }
 0x5dd   : > { %v2684_v10 = vadd.f32 %v2683_v19, %v2466_v6  ;;  %v3408_v19 = vpop.permute.xlu0 %3407 }
 0x5df   : > { %v2753_v60 = vadd.f32 %v5827_v41, %v2684_v10 }
 0x5e0   : > { %v3104_v49 = vpop.f32.mrf.mxu3 }
 0x5e1   : > { %v2817_v0 = vmax.f32 %v2753_v60, 0.0  ;;  %v3105_v13 = vadd.f32 %v5984_v4, %v3104_v49 }
 0x5e3   : > { %v2849_v26 = vpack.c.bf16 %v2817_v0, %v2816_v18  ;;  %3198 = vst.msk [vmem:[%s5583_s24 + $0x168] sm:$0xff] %vm3152_vm1, %v3105_v13 }
 0x5e4   : > { %3519 = vst.msk [vmem:[%s5583_s24 + $0x168] sm:$0xff] %vm3473_vm2, %v3372_v30 }
 0x5e5   : > { %4015 = vmatmul.msk.bf16.gmra.mxu3 %vm2886_vm0, %v2849_v26 }
 0x5e8   : > { %v3107_v56 = vpop.f32.mrf.mxu3 }
 0x5e9   : > { %v3108_v41 = vadd.f32 %v5984_v4, %v3107_v56 }
 0x5eb   : > { %3199 = vst.msk [vmem:[%s5583_s24 + $0x170] sm:$0xff] %vm3152_vm1, %v3108_v41 }
 0x5ec   : > { %3520 = vst.msk [vmem:[%s5583_s24 + $0x170] sm:$0xff] %vm3473_vm2, %v3374_v62 }
 0x5f0   : > { %v3109_v45 = vpop.f32.mrf.mxu3 }
 0x5f1   : > { %v3110_v37 = vadd.f32 %v5984_v4, %v3109_v45 }
 0x5f3   : > { %3200 = vst.msk [vmem:[%s5583_s24 + $0x178] sm:$0xff] %vm3152_vm1, %v3110_v37 }
 0x5f4   : > { %3521 = vst.msk [vmem:[%s5583_s24 + $0x178] sm:$0xff] %vm3473_vm2, %v3376_v32 }
 0x5f8   : > { %v3112_v24 = vpop.f32.mrf.mxu3 }
 0x5f9   : > { %v3113_v46 = vadd.f32 %v5984_v4, %v3112_v24 }
 0x5fb   : > { %3201 = vst.msk [vmem:[%s5583_s24 + $0x180] sm:$0xff] %vm3152_vm1, %v3113_v46 }
 0x5fc   : > { %3522 = vst.msk [vmem:[%s5583_s24 + $0x180] sm:$0xff] %vm3473_vm2, %v3378_v48 }
 0x600   : > { %v3114_v2 = vpop.f32.mrf.mxu3 }
 0x601   : > { %v3115_v1 = vadd.f32 %v5984_v4, %v3114_v2 }
 0x603   : > { %3202 = vst.msk [vmem:[%s5583_s24 + $0x188] sm:$0xff] %vm3152_vm1, %v3115_v1 }
 0x604   : > { %3523 = vst.msk [vmem:[%s5583_s24 + $0x188] sm:$0xff] %vm3473_vm2, %v3380_v43 }
 0x608   : > { %v3117_v22 = vpop.f32.mrf.mxu3 }
 0x609   : > { %v3118_v42 = vadd.f32 %v5984_v4, %v3117_v22 }
 0x60b   : > { %3203 = vst.msk [vmem:[%s5583_s24 + $0x190] sm:$0xff] %vm3152_vm1, %v3118_v42 }
 0x60c   : > { %3524 = vst.msk [vmem:[%s5583_s24 + $0x190] sm:$0xff] %vm3473_vm2, %v3382_v28 }
 0x610   : > { %v3119_v61 = vpop.f32.mrf.mxu3 }
 0x611   : > { %v3120_v5 = vadd.f32 %v5984_v4, %v3119_v61 }
 0x613   : > { %3204 = vst.msk [vmem:[%s5583_s24 + $0x198] sm:$0xff] %vm3152_vm1, %v3120_v5 }
 0x614   : > { %3525 = vst.msk [vmem:[%s5583_s24 + $0x198] sm:$0xff] %vm3473_vm2, %v3384_v59 }
 0x618   : > { %v3122_v55 = vpop.f32.mrf.mxu3 }
 0x619   : > { %v3123_v20 = vadd.f32 %v5984_v4, %v3122_v55 }
 0x61b   : > { %3205 = vst.msk [vmem:[%s5583_s24 + $0x1a0] sm:$0xff] %vm3152_vm1, %v3123_v20 }
 0x61c   : > { %3526 = vst.msk [vmem:[%s5583_s24 + $0x1a0] sm:$0xff] %vm3473_vm2, %v3386_v53 }
 0x620   : > { %v3124_v29 = vpop.f32.mrf.mxu3 }
 0x621   : > { %v3125_v11 = vadd.f32 %v5984_v4, %v3124_v29 }
 0x623   : > { %3206 = vst.msk [vmem:[%s5583_s24 + $0x1a8] sm:$0xff] %vm3152_vm1, %v3125_v11 }
 0x624   : > { %3527 = vst.msk [vmem:[%s5583_s24 + $0x1a8] sm:$0xff] %vm3473_vm2, %v3388_v34 }
 0x628   : > { %v3127_v40 = vpop.f32.mrf.mxu3 }
 0x629   : > { %v3128_v31 = vadd.f32 %v5984_v4, %v3127_v40 }
 0x62b   : > { %3207 = vst.msk [vmem:[%s5583_s24 + $0x1b0] sm:$0xff] %vm3152_vm1, %v3128_v31 }
 0x62c   : > { %3528 = vst.msk [vmem:[%s5583_s24 + $0x1b0] sm:$0xff] %vm3473_vm2, %v3390_v25 }
 0x630   : > { %v3129_v3 = vpop.f32.mrf.mxu3 }
 0x631   : > { %v3130_v47 = vadd.f32 %v5984_v4, %v3129_v3 }
 0x633   : > { %3208 = vst.msk [vmem:[%s5583_s24 + $0x1b8] sm:$0xff] %vm3152_vm1, %v3130_v47 }
 0x634   : > { %3529 = vst.msk [vmem:[%s5583_s24 + $0x1b8] sm:$0xff] %vm3473_vm2, %v3392_v9 }
 0x638   : > { %v3132_v51 = vpop.f32.mrf.mxu3 }
 0x639   : > { %v3133_v54 = vadd.f32 %v5984_v4, %v3132_v51 }
 0x63b   : > { %3209 = vst.msk [vmem:[%s5583_s24 + $0x1c0] sm:$0xff] %vm3152_vm1, %v3133_v54 }
 0x63c   : > { %3530 = vst.msk [vmem:[%s5583_s24 + $0x1c0] sm:$0xff] %vm3473_vm2, %v3394_v8 }
 0x640   : > { %v3134_v27 = vpop.f32.mrf.mxu3 }
 0x641   : > { %v3135_v16 = vadd.f32 %v5984_v4, %v3134_v27 }
 0x643   : > { %3210 = vst.msk [vmem:[%s5583_s24 + $0x1c8] sm:$0xff] %vm3152_vm1, %v3135_v16 }
 0x644   : > { %3531 = vst.msk [vmem:[%s5583_s24 + $0x1c8] sm:$0xff] %vm3473_vm2, %v3396_v36 }
 0x648   : > { %v3137_v57 = vpop.f32.mrf.mxu3 }
 0x649   : > { %v3138_v50 = vadd.f32 %v5984_v4, %v3137_v57 }
 0x64b   : > { %3211 = vst.msk [vmem:[%s5583_s24 + $0x1d0] sm:$0xff] %vm3152_vm1, %v3138_v50 }
 0x64c   : > { %3532 = vst.msk [vmem:[%s5583_s24 + $0x1d0] sm:$0xff] %vm3473_vm2, %v3398_v17 }
 0x650   : > { %v3139_v15 = vpop.f32.mrf.mxu3 }
 0x651   : > { %v3140_v35 = vadd.f32 %v5984_v4, %v3139_v15 }
 0x653   : > { %3212 = vst.msk [vmem:[%s5583_s24 + $0x1d8] sm:$0xff] %vm3152_vm1, %v3140_v35 }
 0x654   : > { %3533 = vst.msk [vmem:[%s5583_s24 + $0x1d8] sm:$0xff] %vm3473_vm2, %v3400_v7 }
 0x658   : > { %v3142_v63 = vpop.f32.mrf.mxu3 }
 0x659   : > { %v3143_v39 = vadd.f32 %v5984_v4, %v3142_v63 }
 0x65b   : > { %3213 = vst.msk [vmem:[%s5583_s24 + $0x1e0] sm:$0xff] %vm3152_vm1, %v3143_v39 }
 0x65c   : > { %3534 = vst.msk [vmem:[%s5583_s24 + $0x1e0] sm:$0xff] %vm3473_vm2, %v3402_v21 }
 0x660   : > { %v3144_v44 = vpop.f32.mrf.mxu3 }
 0x661   : > { %v3145_v52 = vadd.f32 %v5984_v4, %v3144_v44 }
 0x663   : > { %3214 = vst.msk [vmem:[%s5583_s24 + $0x1e8] sm:$0xff] %vm3152_vm1, %v3145_v52 }
 0x664   : > { %3535 = vst.msk [vmem:[%s5583_s24 + $0x1e8] sm:$0xff] %vm3473_vm2, %v3404_v38 }
 0x668   : > { %v3147_v12 = vpop.f32.mrf.mxu3 }
 0x669   : > { %v3148_v33 = vadd.f32 %v5984_v4, %v3147_v12 }
 0x66b   : > { %3215 = vst.msk [vmem:[%s5583_s24 + $0x1f0] sm:$0xff] %vm3152_vm1, %v3148_v33 }
 0x66c   : > { %3536 = vst.msk [vmem:[%s5583_s24 + $0x1f0] sm:$0xff] %vm3473_vm2, %v3406_v58 }
 0x670   : > { %v3149_v23 = vpop.f32.mrf.mxu3 }
 0x671   : > { %v3150_v6 = vadd.f32 %v5984_v4, %v3149_v23 }
 0x673   : > { %3216 = vst.msk [vmem:[%s5583_s24 + $0x1f8] sm:$0xff] %vm3152_vm1, %v3150_v6 }
 0x674   : > { %3537 = vst.msk [vmem:[%s5583_s24 + $0x1f8] sm:$0xff] %vm3473_vm2, %v3408_v19 }
 0x675 PF: > { %s6149_s16 = sld [smem:[#allocation6_spill]]  ;;  %s6152_s29 = smov %s4251_s30 }
 0x676   : > { %s6150_s25 = sld [smem:[#allocation5_spill]] }
 0x677   : > { %s6151_s15 = sld [smem:[#allocation7_spill]] }
 0x67b   : > { %p24_p7 = scmp.ge.s32.totalorder %s6149_s16, 6  }
 0x67c   : > { %s6153_s30 = smov %s6150_s25 }
 0x67d   :  { %26 = sbr.rel (!%p24_p7) target bundleno = 5 (0x5), region = 116 }
 0x682   :  { %3560 = vsyncpa [#allocation3], 1 }
 0x683   :  { %3562 = vsyncpa [#allocation3 + $0x1], 1 }

</bundles_post_ra>
